<compile_context>
chip_gen: v5e
topology: v5e:2x2
jax: 0.10.0
libtpu: 0.0.40
codegen_flags: <defaults>
</compile_context>

<pallas_src>
import jax
import jax.numpy as jnp
from jax.experimental import pallas as pl
from jax.experimental.pallas import tpu as pltpu


# ----------------------------------------------------------------------------
# Helpers
# ----------------------------------------------------------------------------
def _round_up(v, m):
    return ((v + m - 1) // m) * m


def _vmem_limit_bytes():
    """Scoped-VMEM budget: above the small default, below physical capacity
    (128 MiB v5e/v6e, 64 MiB per-TC v7x)."""
    cap = 64 * 1024 * 1024  # conservative fallback (v7x per-TC physical)
    get_info = getattr(pltpu, "get_tpu_info", None)
    if get_info is not None:
        try:
            cap = int(get_info().vmem_capacity_bytes)
        except Exception:
            pass
    return int(min(cap - 16 * 1024 * 1024, 100 * 1024 * 1024))


def _conv_out_size(size, k, stride, pad, dil):
    return (size + 2 * pad - dil * (k - 1) - 1) // stride + 1


# ----------------------------------------------------------------------------
# Pallas kernel: tiled matmul with bias, accumulating into the resident output
# ----------------------------------------------------------------------------
def _matmul_bias_kernel(a_ref, b_ref, bias_ref, o_ref):
    k = pl.program_id(1)

    @pl.when(k == 0)
    def _init():
        # f32 output block is resident across the K axis (index map ignores k);
        # seed it with the bias so no separate accumulator / epilogue is needed.
        o_ref[...] = jnp.broadcast_to(bias_ref[...], o_ref.shape)

    o_ref[...] += jnp.dot(a_ref[...], b_ref[...],
                          preferred_element_type=jnp.float32)


def pallas_matmul_bias(a, b, bias, *, tm=None):
    """a: [M, K], b: [K, N], bias: [N] -> [M, N] float32.

    A/B feed the MXU in bf16; accumulation, bias and output are f32.
    Output N is padded to a multiple of 128 (lane-dense stores), sliced after.
    """
    M, K = a.shape
    K2, N = b.shape
    assert K == K2

    a = a.astype(jnp.bfloat16)
    b = b.astype(jnp.bfloat16)
    bias = bias.astype(jnp.float32)

    n_pad = _round_up(N, 128)
    if n_pad != N:
        b = jnp.pad(b, ((0, 0), (0, n_pad - N)))
        bias = jnp.pad(bias, ((0, n_pad - N),))
    bias2 = bias.reshape(1, n_pad)

    vmem_budget = _vmem_limit_bytes()

    if tm is None:
        # Bigger row tiles on big-VMEM parts (v5e/v6e) when the output is
        # narrow; keep >= 2 M tiles so megacore / dual-TC can split M.
        tm = 1024 if (vmem_budget >= 80 * 1024 * 1024 and n_pad <= 256) else 512
        tm = min(tm, max(128, _round_up(pl.cdiv(M, 2), 128)))

    def tiles_fit(tk_):
        # double-buffered bf16 A/B tiles + double-buffered f32 output + bias
        need = 2 * (tm * tk_ + tk_ * n_pad) * 2 + 2 * tm * n_pad * 4 + n_pad * 4
        return need <= int(0.75 * vmem_budget)

    if tiles_fit(K):
        # Single full-K step (the common DCN case, K = C_in*k*k): B's block
        # index is constant -> weight slab fetched once; no jnp.pad of A.
        tk_eff, k_steps = K, 1
    else:
        # Rare fallback for very large K: 256-aligned K tiles, zero-padded so
        # partial blocks never contribute garbage to the accumulation.
        tk_eff = 2048
        while not tiles_fit(tk_eff) and tk_eff > 256:
            tk_eff //= 2
        k_padded = _round_up(K, tk_eff)
        if k_padded != K:
            a = jnp.pad(a, ((0, 0), (0, k_padded - K)))
            b = jnp.pad(b, ((0, k_padded - K), (0, 0)))
        k_steps = k_padded // tk_eff

    m_tiles = pl.cdiv(M, tm)

    flops = 2 * M * K * n_pad
    bytes_accessed = int(M * K * 2 + K * n_pad * 2 + n_pad * 4 + M * n_pad * 4)

    out = pl.pallas_call(
        _matmul_bias_kernel,
        out_shape=jax.ShapeDtypeStruct((M, n_pad), jnp.float32),
        grid_spec=pltpu.PrefetchScalarGridSpec(
            num_scalar_prefetch=0,
            grid=(m_tiles, k_steps),
            in_specs=[
                pl.BlockSpec((tm, tk_eff), lambda i, kk: (i, kk)),     # A tile
                pl.BlockSpec((tk_eff, n_pad), lambda i, kk: (kk, 0)),  # B slab
                pl.BlockSpec((1, n_pad), lambda i, kk: (0, 0)),        # bias
            ],
            out_specs=pl.BlockSpec((tm, n_pad), lambda i, kk: (i, 0)),
        ),
        compiler_params=pltpu.CompilerParams(
            dimension_semantics=("parallel", "arbitrary"),
            vmem_limit_bytes=vmem_budget,
        ),
        cost_estimate=pl.CostEstimate(flops=flops, transcendentals=0,
                                      bytes_accessed=bytes_accessed),
    )(a, b, bias2)

    if n_pad != N:
        out = out[:, :N]
    return out


# ----------------------------------------------------------------------------
# conv_offset_mask: tiny 3*k*k-channel conv -> native XLA conv (NHWC, f32)
# ----------------------------------------------------------------------------
def conv_offset_mask_nhwc(x_nhwc, w_oihw, b, stride, pad):
    w_hwio = jnp.transpose(w_oihw, (2, 3, 1, 0))
    out = jax.lax.conv_general_dilated(
        x_nhwc, w_hwio,
        window_strides=(stride, stride),
        padding=[(pad, pad), (pad, pad)],
        dimension_numbers=("NHWC", "HWIO", "NHWC"))
    return out + b[None, None, None, :]


# ----------------------------------------------------------------------------
# Deformable im2col: channels-last gather, no transpose of the expanded tensor
# ----------------------------------------------------------------------------
def deform_im2col(x_nhwc, offset, mask, k, stride, pad, dil):
    """Modulated deformable im2col (DCNv2 semantics, offset_groups=1).

    x_nhwc: [N, H, W, C]
    offset: [N, Ho, Wo, k*k, 2]  per-tap (dy, dx), interleaved like DCNv2 CUDA
    mask:   [N, Ho, Wo, k*k]
    -> cols [N*Ho*Wo, k*k*C] bf16, reduction order (tap, channel)
    """
    N, H, W, C = x_nhwc.shape
    kk = k * k
    Ho, Wo = offset.shape[1], offset.shape[2]
    Q = Ho * Wo * kk

    dy = offset[..., 0].astype(jnp.float32)
    dx = offset[..., 1].astype(jnp.float32)

    kh = (jnp.arange(kk) // k).astype(jnp.float32)
    kw = (jnp.arange(kk) % k).astype(jnp.float32)
    base_y = (jnp.arange(Ho, dtype=jnp.float32) * stride - pad)[:, None, None] \
        + kh[None, None, :] * dil                                   # [Ho, 1, kk]
    base_x = (jnp.arange(Wo, dtype=jnp.float32) * stride - pad)[None, :, None] \
        + kw[None, None, :] * dil                                   # [1, Wo, kk]
    py = (base_y[None] + dy).reshape(N, Q)
    px = (base_x[None] + dx).reshape(N, Q)

    y0 = jnp.floor(py)
    x0 = jnp.floor(px)
    y1 = y0 + 1.0
    x1 = x0 + 1.0
    wy1 = py - y0
    wy0 = 1.0 - wy1
    wx1 = px - x0
    wx0 = 1.0 - wx1

    # Channels-last: each sampled pixel is one contiguous length-C read.
    x_flat = x_nhwc.reshape(N, H * W, C).astype(jnp.float32)

    def corner(yc, xc, wgt):
        yi = yc.astype(jnp.int32)
        xi = xc.astype(jnp.int32)
        valid = (yi >= 0) & (yi < H) & (xi >= 0) & (xi < W)
        yi = jnp.clip(yi, 0, H - 1)
        xi = jnp.clip(xi, 0, W - 1)
        idx = (yi * W + xi)[:, :, None]                              # [N, Q, 1]
        v = jnp.take_along_axis(x_flat, jnp.broadcast_to(idx, (N, Q, C)), axis=1)
        w = jnp.where(valid, wgt, 0.0)[:, :, None]
        return v * w

    val = (corner(y0, x0, wy0 * wx0) + corner(y0, x1, wy0 * wx1)
           + corner(y1, x0, wy1 * wx0) + corner(y1, x1, wy1 * wx1))
    val = val * mask.reshape(N, Q, 1)                                # modulation
    # [N, Ho*Wo*kk, C] -> rows (n, ho, wo), columns (tap, c): a pure reshape.
    cols = val.reshape(N * Ho * Wo, kk * C)
    return cols.astype(jnp.bfloat16)


# ----------------------------------------------------------------------------
# DCN_V2 module (parameters initialized deterministically in-script)
# ----------------------------------------------------------------------------
class DCNv2Pallas:
    def __init__(self, in_channels, out_channels, kernel_size, stride, padding,
                 dilation=1, groups=1, key=None):
        assert groups == 1  # TODO(synk): grouped deformable conv not implemented
        self.k = kernel_size
        self.stride = stride
        self.pad = padding
        self.dil = dilation
        self.offset_channel = 2 * kernel_size ** 2
        self.mask_channel = kernel_size ** 2
        channels_ = groups * 3 * kernel_size ** 2

        # conv_offset_mask: zero-initialized (matches init_offset()).
        self.w_om = jnp.zeros((channels_, in_channels, kernel_size, kernel_size),
                              jnp.float32)
        self.b_om = jnp.zeros((channels_,), jnp.float32)

        # DeformConv2d weight / bias: deterministic uniform init (kaiming bound).
        k1, k2 = jax.random.split(key)
        fan_in = in_channels * kernel_size * kernel_size
        bound = 1.0 / (fan_in ** 0.5)
        self.w_dcn = jax.random.uniform(
            k1, (out_channels, in_channels, kernel_size, kernel_size),
            jnp.float32, -bound, bound)
        self.b_dcn = jax.random.uniform(k2, (out_channels,), jnp.float32,
                                        -bound, bound)

    def __call__(self, x):
        # x: [N, C_in, H, W]  (NCHW, same as PyTorch)
        N, C, H, W = x.shape
        k, kk = self.k, self.k * self.k

        # Single NCHW -> NHWC transpose of the activation; reused by both the
        # offset conv and the deformable gather.
        x_nhwc = jnp.transpose(x, (0, 2, 3, 1))

        # 1) conv_offset_mask (regular conv, f32, NHWC) via XLA's native conv.
        om = conv_offset_mask_nhwc(x_nhwc, self.w_om, self.b_om,
                                   self.stride, self.pad)            # [N,Ho,Wo,3kk]
        Ho, Wo = om.shape[1], om.shape[2]

        # 2) split offset / mask (channels interleaved (dy_i, dx_i) per tap,
        #    matching the DCNv2 CUDA layout), sigmoid mask.
        offset = om[..., : self.offset_channel].reshape(N, Ho, Wo, kk, 2)
        mask = jax.nn.sigmoid(om[..., self.offset_channel:
                                 self.offset_channel + self.mask_channel])

        # 3) modulated deformable conv = channels-last deformable im2col
        #    + one Pallas GEMM.  Weight reordered to (tap, channel) reduction
        #    order so the big cols matrix never needs a transpose.
        cols = deform_im2col(x_nhwc, offset, mask, k, self.stride,
                             self.pad, self.dil)                     # [M, kk*C]
        w_mat = jnp.transpose(self.w_dcn, (2, 3, 1, 0)).reshape(kk * C, -1)
        out = pallas_matmul_bias(cols, w_mat, self.b_dcn)            # [M, C_out] f32
        out = out.reshape(N, Ho, Wo, -1).transpose(0, 3, 1, 2)       # NHWC -> NCHW
        return out


if __name__ == "__main__":
    key = jax.random.PRNGKey(0)
    kx, kp = jax.random.split(key)

    # Small deterministic example consistent with the module.
    x = jax.random.normal(kx, (2, 4, 16, 16), jnp.float32)
    dcn = DCNv2Pallas(in_channels=4, out_channels=8, kernel_size=3,
                      stride=1, padding=1, dilation=1, groups=1, key=kp)

    y = jax.jit(dcn.__call__)(x)
    jax.block_until_ready(y)
    assert y.shape == (2, 8, 16, 16)
    assert jnp.all(jnp.isfinite(y))
    print("KERNEL_OK")
</pallas_src>

<mosaic_0001>
module attributes {stable_mosaic.version = 11 : i64} {
  func.func @_matmul_bias_kernel(%arg0: i32, %arg1: i32, %arg2: memref<256x36xbf16, #tpu.memory_space<vmem>>, %arg3: memref<36x128xbf16, #tpu.memory_space<vmem>>, %arg4: memref<1x128xf32, #tpu.memory_space<vmem>>, %arg5: memref<256x128xf32, #tpu.memory_space<vmem>>) attributes {dimension_semantics = [#tpu.dimension_semantics<parallel>, #tpu.dimension_semantics<arbitrary>], iteration_bounds = array<i64: 2, 1>, scalar_prefetch = 0 : i64, scratch_operands = 0 : i64, tpu.core_type = #tpu.core_type<tc>, window_params = [{transform_indices = @transform_0, window_bounds = array<i64: 256, 36>}, {transform_indices = @transform_1, window_bounds = array<i64: 36, 128>}, {pipeline_mode = #tpu.pipeline_mode<synchronous>, transform_indices = @transform_2, window_bounds = array<i64: 1, 128>}, {transform_indices = @transform_3, window_bounds = array<i64: 256, 128>}]} {
    %c0_i32 = arith.constant 0 : i32
    %0 = arith.cmpi eq, %arg1, %c0_i32 : i32
    %1 = arith.extui %0 : i1 to i32
    %c0_i32_0 = arith.constant 0 : i32
    %2 = arith.cmpi ne, %1, %c0_i32_0 : i32
    scf.if %2 {
      %c0_8 = arith.constant 0 : index
      %c0_9 = arith.constant 0 : index
      %9 = vector.load %arg4[%c0_8, %c0_9] : memref<1x128xf32, #tpu.memory_space<vmem>>, vector<1x128xf32>
      %10 = vector.shape_cast %9 : vector<1x128xf32> to vector<1x128xf32>
      %11 = vector.broadcast %10 : vector<1x128xf32> to vector<256x128xf32>
      %c0_10 = arith.constant 0 : index
      %c0_11 = arith.constant 0 : index
      %12 = vector.load %arg5[%c0_10, %c0_11] : memref<256x128xf32, #tpu.memory_space<vmem>>, vector<256x128xf32>
      tpu.vector_store %arg5[%c0_10, %c0_11], %11 {strides = array<i32>} : memref<256x128xf32, #tpu.memory_space<vmem>>, vector<256x128xf32>,
    } else {
    }
    %c0 = arith.constant 0 : index
    %c0_1 = arith.constant 0 : index
    %3 = vector.load %arg5[%c0, %c0_1] : memref<256x128xf32, #tpu.memory_space<vmem>>, vector<256x128xf32>
    %c0_2 = arith.constant 0 : index
    %c0_3 = arith.constant 0 : index
    %4 = vector.load %arg2[%c0_2, %c0_3] : memref<256x36xbf16, #tpu.memory_space<vmem>>, vector<256x36xbf16>
    %c0_4 = arith.constant 0 : index
    %c0_5 = arith.constant 0 : index
    %5 = vector.load %arg3[%c0_4, %c0_5] : memref<36x128xbf16, #tpu.memory_space<vmem>>, vector<36x128xbf16>
    %cst = arith.constant dense<0.000000e+00> : vector<256x128xf32>
    %6 = tpu.matmul %4, %5, %cst {dimension_numbers = #tpu.dot_dimension_numbers<[1], [0], [0], [1], [0, 0, 1, 1], [], []>} : vector<256x36xbf16>, vector<36x128xbf16>, vector<256x128xf32> -> vector<256x128xf32>
    %7 = arith.addf %3, %6 : vector<256x128xf32>
    %c0_6 = arith.constant 0 : index
    %c0_7 = arith.constant 0 : index
    %8 = vector.load %arg5[%c0_6, %c0_7] : memref<256x128xf32, #tpu.memory_space<vmem>>, vector<256x128xf32>
    tpu.vector_store %arg5[%c0_6, %c0_7], %7 {strides = array<i32>} : memref<256x128xf32, #tpu.memory_space<vmem>>, vector<256x128xf32>,
    return
  }
  func.func @transform_0(%arg0: i32, %arg1: i32) -> (i32, i32) {
    %c0_i32 = arith.constant 0 : i32
    return %arg0, %arg1 : i32, i32
  }
  func.func @transform_1(%arg0: i32, %arg1: i32) -> (i32, i32) {
    %c0_i32 = arith.constant 0 : i32
    %c0_i32_0 = arith.constant 0 : i32
    return %arg1, %c0_i32 : i32, i32
  }
  func.func @transform_2(%arg0: i32, %arg1: i32) -> (i32, i32) {
    %c0_i32 = arith.constant 0 : i32
    %c0_i32_0 = arith.constant 0 : i32
    %c0_i32_1 = arith.constant 0 : i32
    return %c0_i32, %c0_i32_0 : i32, i32
  }
  func.func @transform_3(%arg0: i32, %arg1: i32) -> (i32, i32) {
    %c0_i32 = arith.constant 0 : i32
    %c0_i32_0 = arith.constant 0 : i32
    return %arg0, %c0_i32 : i32, i32
  }
}

</mosaic_0001>

<bundles_post_ra>
// kernel: mul.53
= control target key start
LH: loop header
LB: loop body
LE: loop exit
PB: predicated region body
PF: predicated region fallthrough
CT: control target
= control target key end

     0   :  { %vm6_vm0 = vcmask 1041409   ;;  %vm10_vm1 = vcmask 1042434   ;;  %vm14_vm2 = vcmask 1043459   ;;  %vm48_vm3 = vcmask 7168   ;;  %s3658_s11 = smov 127   ;;  %s3659_s28 = smov 125   ;;  %s6059_s0 = inlined_call_operand.vmem [shape: f32[2,16,16,9], index: 0, kind: input, shape index: {}]   ;;  %s6060_s1 = inlined_call_operand.hbm [shape: f32[2,2304], index: 1, kind: output, shape index: {}]  }
   0x1   :  { %v2964_v0 = vld [vmem:[%s6059_s0 + $0x47] sm:$0x1]   ;;  %v2980_v11 = vld [vmem:[%s6059_s0 + $0x55] sm:$0x1]   ;;  %vm131_vm4 = vcmask 23552   ;;  %vm90_vm5 = vcmask 15360  }
   0x2   :  { %v2965_v1 = vld [vmem:[%s6059_s0 + $0x146] sm:$0x2]   ;;  %v2981_v14 = vld [vmem:[%s6059_s0 + $0x154] sm:$0x2]   ;;  %v2972_v26 = vld [vmem:[%s6059_s0 + $0xe] sm:$0x1]  }
   0x3   :  { %v2966_v2 = vld [vmem:[%s6059_s0 + $0xc5] sm:$0x4]   ;;  %v25_v4 = vsel %vm6_vm0, %v2965_v1, %v2964_v0  ;;  %v2982_v15 = vld [vmem:[%s6059_s0 + $0xd3] sm:$0x4]   ;;  %v108_v18 = vsel %vm6_vm0, %v2981_v14, %v2980_v11  ;;  %v2973_v29 = vld [vmem:[%s6059_s0 + $0x10d] sm:$0x2]  }
   0x4   :  { %v2967_v3 = vld [vmem:[%s6059_s0 + $0x1c4] sm:$0x8]   ;;  %v29_v8 = vsel %vm10_vm1, %v2966_v2, %v25_v4  ;;  %v2983_v16 = vld [vmem:[%s6059_s0 + $0x1d2] sm:$0x8]   ;;  %v112_v23 = vsel %vm10_vm1, %v2982_v15, %v108_v18  ;;  %v2974_v30 = vld [vmem:[%s6059_s0 + $0x8c] sm:$0x4]   ;;  %v67_v33 = vsel %vm6_vm0, %v2973_v29, %v2972_v26 }
   0x5   :  { %v2968_v5 = vld [vmem:[%s6059_s0 + $0x47] sm:$0x1]   ;;  %v33_v12 = vsel %vm14_vm2, %v2967_v3, %v29_v8  ;;  %v2984_v19 = vld [vmem:[%s6059_s0 + $0x55] sm:$0x1]   ;;  %v116_v27 = vsel %vm14_vm2, %v2983_v16, %v112_v23  ;;  %v2975_v31 = vld [vmem:[%s6059_s0 + $0x18b] sm:$0x8]   ;;  %v71_v38 = vsel %vm10_vm1, %v2974_v30, %v67_v33 }
   0x6   :  { %v2969_v6 = vld [vmem:[%s6059_s0 + $0x146] sm:$0x2]   ;;  %v2985_v20 = vld [vmem:[%s6059_s0 + $0x154] sm:$0x2]   ;;  %v2976_v34 = vld [vmem:[%s6059_s0 + $0xe] sm:$0x1]   ;;  %v75_v42 = vsel %vm14_vm2, %v2975_v31, %v71_v38 }
   0x7   :  { %v2970_v7 = vld [vmem:[%s6059_s0 + $0xc5] sm:$0x4]   ;;  %v39_v9 = vsel %vm6_vm0, %v2969_v6, %v2968_v5  ;;  %v2986_v21 = vld [vmem:[%s6059_s0 + $0xd3] sm:$0x4]   ;;  %v122_v24 = vsel %vm6_vm0, %v2985_v20, %v2984_v19  ;;  %v2977_v35 = vld [vmem:[%s6059_s0 + $0x10d] sm:$0x2]  }
   0x8   :  { %v2971_v10 = vld [vmem:[%s6059_s0 + $0x1c4] sm:$0x8]   ;;  %v43_v13 = vsel %vm10_vm1, %v2970_v7, %v39_v9  ;;  %v2987_v25 = vld [vmem:[%s6059_s0 + $0x1d2] sm:$0x8]   ;;  %v126_v28 = vsel %vm10_vm1, %v2986_v21, %v122_v24  ;;  %v2978_v36 = vld [vmem:[%s6059_s0 + $0x8c] sm:$0x4]   ;;  %v81_v39 = vsel %vm6_vm0, %v2977_v35, %v2976_v34 }
   0x9   :  { %v47_v17 = vsel %vm14_vm2, %v2971_v10, %v43_v13  ;;  %v130_v32 = vsel %vm14_vm2, %v2987_v25, %v126_v28  ;;  %v2979_v40 = vld [vmem:[%s6059_s0 + $0x18b] sm:$0x8]   ;;  %v2988_v41 = vld [vmem:[%s6059_s0 + $0x1c] sm:$0x1]   ;;  %v85_v43 = vsel %vm10_vm1, %v2978_v36, %v81_v39  ;;  %vm173_vm6 = vcmask 31744   ;;  %s3661_s16 = smov 124  }
   0xa   :  { %v49_v22 = vsel %vm48_vm3, %v47_v17, %v33_v12  ;;  %v132_v37 = vsel %vm131_vm4, %v130_v32, %v116_v27  ;;  %v2989_v44 = vld [vmem:[%s6059_s0 + $0x11b] sm:$0x2]   ;;  %v89_v47 = vsel %vm14_vm2, %v2979_v40, %v85_v43  ;;  %v3012_v56 = vld [vmem:[%s6059_s0 + $0x71] sm:$0x1]   ;;  %vm94_vm7 = vcmask 56320   ;;  %s3662_s12 = smov 121  }
   0xb   :  { %50 = vrot.lane.b32.xlu0 %v49_v22, %s3658_s11  ;;  %133 = vrot.lane.b32.xlu1 %v132_v37, %s3659_s28  ;;  %v2990_v45 = vld [vmem:[%s6059_s0 + $0x9a] sm:$0x4]   ;;  %v150_v48 = vsel %vm6_vm0, %v2989_v44, %v2988_v41  ;;  %v91_v52 = vsel %vm90_vm5, %v89_v47, %v75_v42  ;;  %v3013_v59 = vld [vmem:[%s6059_s0 + $0x170] sm:$0x2]   ;;  %s3660_s28 = smov 126   ;;  %vm52_vm8 = vcmask 64512  }
   0xc   :  { %v2991_v46 = vld [vmem:[%s6059_s0 + $0x199] sm:$0x8]   ;;  %v154_v53 = vsel %vm10_vm1, %v2990_v45, %v150_v48  ;;  %v3014_v60 = vld [vmem:[%s6059_s0 + $0xef] sm:$0x4]   ;;  %v276_v63 = vsel %vm6_vm0, %v3013_v59, %v3012_v56  ;;  %v3020_v7 = vld [vmem:[%s6059_s0 + $0x38] sm:$0x1]  }
   0xd   :  { %v2992_v49 = vld [vmem:[%s6059_s0 + $0x1c] sm:$0x1]   ;;  %v158_v57 = vsel %vm14_vm2, %v2991_v46, %v154_v53  ;;  %v3015_v61 = vld [vmem:[%s6059_s0 + $0x1ee] sm:$0x8]   ;;  %v280_v4 = vsel %vm10_vm1, %v3014_v60, %v276_v63  ;;  %v3021_v9 = vld [vmem:[%s6059_s0 + $0x137] sm:$0x2]  }
   0xe   :  { %v2993_v50 = vld [vmem:[%s6059_s0 + $0x11b] sm:$0x2]   ;;  %v3016_v0 = vld [vmem:[%s6059_s0 + $0xf1] sm:$0x1]   ;;  %v3022_v10 = vld [vmem:[%s6059_s0 + $0xb6] sm:$0x4]   ;;  %v284_v12 = vsel %vm14_vm2, %v3015_v61, %v280_v4  ;;  %v318_v14 = vsel %vm6_vm0, %v3021_v9, %v3020_v7 }
   0xf   :  { %v2994_v51 = vld [vmem:[%s6059_s0 + $0x9a] sm:$0x4]   ;;  %v164_v54 = vsel %vm6_vm0, %v2993_v50, %v2992_v49  ;;  %v3017_v1 = vld [vmem:[%s6059_s0 + $0x1f0] sm:$0x2]   ;;  %v3023_v11 = vld [vmem:[%s6059_s0 + $0x1b5] sm:$0x8]   ;;  %v322_v18 = vsel %vm10_vm1, %v3022_v10, %v318_v14 }
  0x10   :  { %v2995_v55 = vld [vmem:[%s6059_s0 + $0x199] sm:$0x8]   ;;  %v168_v58 = vsel %vm10_vm1, %v2994_v51, %v164_v54  ;;  %v3018_v2 = vld [vmem:[%s6059_s0 + $0x6f] sm:$0x4]   ;;  %v290_v5 = vsel %vm6_vm0, %v3017_v1, %v3016_v0  ;;  %v3024_v15 = vld [vmem:[%s6059_s0 + $0xb8] sm:$0x1]   ;;  %v326_v25 = vsel %vm14_vm2, %v3023_v11, %v322_v18 }
  0x11   :  { %v172_v62 = vsel %vm14_vm2, %v2995_v55, %v168_v58  ;;  %v3019_v6 = vld [vmem:[%s6059_s0 + $0x16e] sm:$0x8]   ;;  %v294_v8 = vsel %vm10_vm1, %v3018_v2, %v290_v5  ;;  %v3025_v16 = vld [vmem:[%s6059_s0 + $0x1b7] sm:$0x2]   ;;  %v3032_v22 = vld [vmem:[%s6059_s0 + $0x46] sm:$0x1]  }
  0x12   :  { %v174_v3 = vsel %vm173_vm6, %v172_v62, %v158_v57  ;;  %v298_v13 = vsel %vm14_vm2, %v3019_v6, %v294_v8  ;;  %v3026_v17 = vld [vmem:[%s6059_s0 + $0x36] sm:$0x4]   ;;  %v332_v19 = vsel %vm6_vm0, %v3025_v16, %v3024_v15  ;;  %v3033_v23 = vld [vmem:[%s6059_s0 + $0x145] sm:$0x2]   ;;  %v2996_v28 = vld [vmem:[%s6059_s0 + $0xe3] sm:$0x1]  }
  0x13   :  { %92 = vrot.lane.b32.xlu0 %v91_v52, %s3660_s28  ;;  %175 = vrot.lane.b32.xlu1 %v174_v3, %s3661_s16  ;;  %v3027_v20 = vld [vmem:[%s6059_s0 + $0x135] sm:$0x8]   ;;  %v336_v21 = vsel %vm10_vm1, %v3026_v17, %v332_v19  ;;  %v300_v24 = vsel %vm94_vm7, %v298_v13, %v284_v12  ;;  %v3034_v27 = vld [vmem:[%s6059_s0 + $0xc4] sm:$0x4]   ;;  %v381_v34 = vsel %vm6_vm0, %v3033_v23, %v3032_v22  ;;  %vm177_vm9 = vcmask 39936   ;;  %s3663_s23 = smov 120  }
  0x14   :  { %v340_v26 = vsel %vm14_vm2, %v3027_v20, %v336_v21  ;;  %v2997_v29 = vld [vmem:[%s6059_s0 + $0x1e2] sm:$0x2]   ;;  %v3036_v42 = vld [vmem:[%s6059_s0 + $0xd] sm:$0x1]   ;;  %v385_v45 = vsel %vm10_vm1, %v3034_v27, %v381_v34  ;;  %v3035_v46 = vld [vmem:[%s6059_s0 + $0x1c3] sm:$0x8]  }
  0x15   :  { %v192_v30 = vsel %vm6_vm0, %v2997_v29, %v2996_v28  ;;  %v2998_v31 = vld [vmem:[%s6059_s0 + $0x61] sm:$0x4]   ;;  %v342_v39 = vsel %vm52_vm8, %v340_v26, %v326_v25  ;;  %v3037_v43 = vld [vmem:[%s6059_s0 + $0x10c] sm:$0x2]   ;;  %v3044_v50 = vld [vmem:[%s6059_s0 + $0x1b] sm:$0x1]   ;;  %v389_v60 = vsel %vm14_vm2, %v3035_v46, %v385_v45 }
  0x16   :  { %v2999_v32 = vld [vmem:[%s6059_s0 + $0x160] sm:$0x8]   ;;  %v196_v35 = vsel %vm10_vm1, %v2998_v31, %v192_v30  ;;  %v402_v48 = vsel %vm6_vm0, %v3037_v43, %v3036_v42  ;;  %v3038_v49 = vld [vmem:[%s6059_s0 + $0x8b] sm:$0x4]   ;;  %v3045_v53 = vld [vmem:[%s6059_s0 + $0x11a] sm:$0x2]  }
  0x17   :  { %v3000_v33 = vld [vmem:[%s6059_s0 + $0x63] sm:$0x1]   ;;  %v200_v40 = vsel %vm14_vm2, %v2999_v32, %v196_v35  ;;  %v3039_v52 = vld [vmem:[%s6059_s0 + $0x18a] sm:$0x8]   ;;  %v3004_v54 = vld [vmem:[%s6059_s0 + $0xaa] sm:$0x1]   ;;  %v406_v61 = vsel %vm10_vm1, %v3038_v49, %v402_v48  ;;  %v443_v4 = vsel %vm6_vm0, %v3045_v53, %v3044_v50 }
  0x18   :  { %v3001_v36 = vld [vmem:[%s6059_s0 + $0x162] sm:$0x2]   ;;  %v3005_v55 = vld [vmem:[%s6059_s0 + $0x1a9] sm:$0x2]   ;;  %s3664_s3 = smov 123   ;;  %vm135_vm10 = vcmask 48128   ;;  %v410_v9 = vsel %vm14_vm2, %v3039_v52, %v406_v61 }
  0x19   :  { %v3002_v37 = vld [vmem:[%s6059_s0 + $0xe1] sm:$0x4]   ;;  %v206_v41 = vsel %vm6_vm0, %v3001_v36, %v3000_v33  ;;  %v234_v56 = vsel %vm6_vm0, %v3005_v55, %v3004_v54  ;;  %v3006_v57 = vld [vmem:[%s6059_s0 + $0x28] sm:$0x4]   ;;  %v3046_v5 = vld [vmem:[%s6059_s0 + $0x99] sm:$0x4]  }
  0x1a   :  { %v3003_v38 = vld [vmem:[%s6059_s0 + $0x1e0] sm:$0x8]   ;;  %v210_v44 = vsel %vm10_vm1, %v3002_v37, %v206_v41  ;;  %v3007_v58 = vld [vmem:[%s6059_s0 + $0x127] sm:$0x8]   ;;  %v238_v62 = vsel %vm10_vm1, %v3006_v57, %v234_v56  ;;  %v3048_v7 = vld [vmem:[%s6059_s0 + $0x62] sm:$0x1]   ;;  %v447_v14 = vsel %vm10_vm1, %v3046_v5, %v443_v4 }
  0x1b   :  { %301 = vrot.lane.b32.xlu0 %v300_v24, %s3662_s12  ;;  %v214_v47 = vsel %vm14_vm2, %v3003_v38, %v210_v44  ;;  %343 = vrot.lane.b32.xlu1 %v342_v39, %s3663_s23  ;;  %v3008_v59 = vld [vmem:[%s6059_s0 + $0x2a] sm:$0x1]   ;;  %v242_v2 = vsel %vm14_vm2, %v3007_v58, %v238_v62  ;;  %v3049_v8 = vld [vmem:[%s6059_s0 + $0x161] sm:$0x2]   ;;  %s3665_s22 = smov 118   ;;  %s3666_s2 = smov 117  }
  0x1c   :  { %v216_v51 = vsel %vm177_vm9, %v214_v47, %v200_v40  ;;  %v3009_v63 = vld [vmem:[%s6059_s0 + $0x129] sm:$0x2]   ;;  %v3028_v12 = vld [vmem:[%s6059_s0 + $0x7f] sm:$0x1]   ;;  %v3047_v15 = vld [vmem:[%s6059_s0 + $0x198] sm:$0x8]   ;;  %v464_v16 = vsel %vm6_vm0, %v3049_v8, %v3048_v7 }
  0x1d   :  { %217 = vrot.lane.b32.xlu2 %v216_v51, %s3664_s3  ;;  %v3010_v0 = vld [vmem:[%s6059_s0 + $0xa8] sm:$0x4]   ;;  %v248_v3 = vsel %vm6_vm0, %v3009_v63, %v3008_v59  ;;  %v3029_v13 = vld [vmem:[%s6059_s0 + $0x17e] sm:$0x2]   ;;  %v3050_v17 = vld [vmem:[%s6059_s0 + $0xe0] sm:$0x4]   ;;  %v451_v22 = vsel %vm14_vm2, %v3047_v15, %v447_v14 }
  0x1e   :  { %v3011_v1 = vld [vmem:[%s6059_s0 + $0x1a7] sm:$0x8]   ;;  %v252_v6 = vsel %vm10_vm1, %v3010_v0, %v248_v3  ;;  %v360_v18 = vsel %vm6_vm0, %v3029_v13, %v3028_v12  ;;  %v3030_v19 = vld [vmem:[%s6059_s0 + $0xfd] sm:$0x4]   ;;  %s3667_s5 = smov 122   ;;  %v468_v23 = vsel %vm10_vm1, %v3050_v17, %v464_v16  ;;  %s3668_s20 = smov 115  }
  0x1f   :  { %v256_v10 = vsel %vm14_vm2, %v3011_v1, %v252_v6  ;;  %v3056_v20 = vld [vmem:[%s6059_s0 + $0xf0] sm:$0x1]   ;;  %v3051_v24 = vld [vmem:[%s6059_s0 + $0x1df] sm:$0x8]   ;;  %v364_v25 = vsel %vm10_vm1, %v3030_v19, %v360_v18  ;;  %v3031_v26 = vld [vmem:[%s6059_s0 + $0x1fc] sm:$0x8]  }
  0x20   :  { %v258_v11 = vsel %vm135_vm10, %v256_v10, %v242_v2  ;;  %v3057_v21 = vld [vmem:[%s6059_s0 + $0x1ef] sm:$0x2]   ;;  %v3060_v29 = vld [vmem:[%s6059_s0 + $0xb7] sm:$0x1]   ;;  %v472_v31 = vsel %vm14_vm2, %v3051_v24, %v468_v23  ;;  %v3040_v32 = vld [vmem:[%s6059_s0 + $0x54] sm:$0x1]   ;;  %v368_v34 = vsel %vm14_vm2, %v3031_v26, %v364_v25 }
  0x21   :  { %v506_v27 = vsel %vm6_vm0, %v3057_v21, %v3056_v20  ;;  %v3058_v28 = vld [vmem:[%s6059_s0 + $0x6e] sm:$0x4]   ;;  %v3061_v30 = vld [vmem:[%s6059_s0 + $0x1b6] sm:$0x2]   ;;  %v3041_v33 = vld [vmem:[%s6059_s0 + $0x153] sm:$0x2]  }
  0x22   :  { %v510_v35 = vsel %vm10_vm1, %v3058_v28, %v506_v27  ;;  %v3059_v36 = vld [vmem:[%s6059_s0 + $0x16d] sm:$0x8]   ;;  %v527_v37 = vsel %vm6_vm0, %v3061_v30, %v3060_v29  ;;  %v3062_v38 = vld [vmem:[%s6059_s0 + $0x35] sm:$0x4]   ;;  %s3669_s29 = smov 114   ;;  %v422_v39 = vsel %vm6_vm0, %v3041_v33, %v3040_v32  ;;  %s3670_s3 = smov 119  }
  0x23   :  { %390 = vrot.lane.b32.xlu0 %v389_v60, %s3665_s22  ;;  %411 = vrot.lane.b32.xlu1 %v410_v9, %s3666_s2  ;;  %v3042_v40 = vld [vmem:[%s6059_s0 + $0xd2] sm:$0x4]   ;;  %v3068_v41 = vld [vmem:[%s6059_s0 + $0x45] sm:$0x1]   ;;  %v514_v43 = vsel %vm14_vm2, %v3059_v36, %v510_v35  ;;  %v531_v44 = vsel %vm10_vm1, %v3062_v38, %v527_v37  ;;  %s3671_s18 = smov 112   ;;  %s3672_s27 = smov 111  }
  0x24   :  { %v3069_v42 = vld [vmem:[%s6059_s0 + $0x144] sm:$0x2]   ;;  %v3063_v45 = vld [vmem:[%s6059_s0 + $0x134] sm:$0x8]   ;;  %v426_v46 = vsel %vm10_vm1, %v3042_v40, %v422_v39  ;;  %v3043_v47 = vld [vmem:[%s6059_s0 + $0x1d1] sm:$0x8]  }
  0x25   :  { %259 = vrot.lane.b32.xlu2 %v258_v11, %s3667_s5  ;;  %v569_v48 = vsel %vm6_vm0, %v3069_v42, %v3068_v41  ;;  %v3070_v49 = vld [vmem:[%s6059_s0 + $0xc3] sm:$0x4]   ;;  %v3072_v50 = vld [vmem:[%s6059_s0 + $0xc] sm:$0x1]   ;;  %v535_v52 = vsel %vm14_vm2, %v3063_v45, %v531_v44  ;;  %v3052_v53 = vld [vmem:[%s6059_s0 + $0x29] sm:$0x1]   ;;  %v430_v55 = vsel %vm14_vm2, %v3043_v47, %v426_v46 }
  0x26   :  { %v3073_v51 = vld [vmem:[%s6059_s0 + $0x10b] sm:$0x2]   ;;  %v3053_v54 = vld [vmem:[%s6059_s0 + $0x128] sm:$0x2]   ;;  %v573_v56 = vsel %vm10_vm1, %v3070_v49, %v569_v48  ;;  %v3071_v57 = vld [vmem:[%s6059_s0 + $0x1c2] sm:$0x8]  }
  0x27   :  { %v590_v58 = vsel %vm6_vm0, %v3073_v51, %v3072_v50  ;;  %v3074_v59 = vld [vmem:[%s6059_s0 + $0x8a] sm:$0x4]   ;;  %v485_v60 = vsel %vm6_vm0, %v3053_v54, %v3052_v53  ;;  %v3054_v61 = vld [vmem:[%s6059_s0 + $0xa7] sm:$0x4]   ;;  %s3673_s30 = smov 116   ;;  %v577_v0 = vsel %vm14_vm2, %v3071_v57, %v573_v56 }
  0x28   :  { %v3080_v62 = vld [vmem:[%s6059_s0 + $0x1a] sm:$0x1]   ;;  %v594_v1 = vsel %vm10_vm1, %v3074_v59, %v590_v58  ;;  %v3075_v2 = vld [vmem:[%s6059_s0 + $0x189] sm:$0x8]   ;;  %v489_v4 = vsel %vm10_vm1, %v3054_v61, %v485_v60  ;;  %v3055_v5 = vld [vmem:[%s6059_s0 + $0x1a6] sm:$0x8]  }
  0x29   :  { %v3081_v63 = vld [vmem:[%s6059_s0 + $0x119] sm:$0x2]   ;;  %v3084_v7 = vld [vmem:[%s6059_s0 + $0x61] sm:$0x1]  }
  0x2a   :  { %v3082_v3 = vld [vmem:[%s6059_s0 + $0x98] sm:$0x4]   ;;  %v631_v6 = vsel %vm6_vm0, %v3081_v63, %v3080_v62  ;;  %v3085_v8 = vld [vmem:[%s6059_s0 + $0x160] sm:$0x2]  }
  0x2b   :  { %452 = vrot.lane.b32.xlu0 %v451_v22, %s3668_s20  ;;  %473 = vrot.lane.b32.xlu1 %v472_v31, %s3669_s29 }
  0x2d   :  { %369 = vrot.lane.b32.xlu2 %v368_v34, %s3670_s3 }
  0x33   :  { %515 = vrot.lane.b32.xlu0 %v514_v43, %s3671_s18  ;;  %536 = vrot.lane.b32.xlu1 %v535_v52, %s3672_s27 }
  0x35   :  { %431 = vrot.lane.b32.xlu2 %v430_v55, %s3673_s30 }
  0x36   :  { %2 = vsyncpa [#allocation1], 0  ;;  %s3674_s16 = smov 109   ;;  %v598_v9 = vsel %vm14_vm2, %v3075_v2, %v594_v1  ;;  %v3064_v10 = vld [vmem:[%s6059_s0 + $0x7e] sm:$0x1]   ;;  %v493_v12 = vsel %vm14_vm2, %v3055_v5, %v489_v4  ;;  %v635_v13 = vsel %vm10_vm1, %v3082_v3, %v631_v6  ;;  %v652_v15 = vsel %vm6_vm0, %v3085_v8, %v3084_v7  ;;  %s3675_s25 = smov 108  }
  0x37   :  { %v3065_v11 = vld [vmem:[%s6059_s0 + $0x17d] sm:$0x2]   ;;  %v3083_v14 = vld [vmem:[%s6059_s0 + $0x197] sm:$0x8]   ;;  %v3086_v16 = vld [vmem:[%s6059_s0 + $0xdf] sm:$0x4]  }
  0x38   :  { %v548_v17 = vsel %vm6_vm0, %v3065_v11, %v3064_v10  ;;  %v3066_v18 = vld [vmem:[%s6059_s0 + $0xfc] sm:$0x4]   ;;  %s3676_s28 = smov 113   ;;  %v3092_v19 = vld [vmem:[%s6059_s0 + $0xef] sm:$0x1]   ;;  %v639_v21 = vsel %vm14_vm2, %v3083_v14, %v635_v13  ;;  %v656_v22 = vsel %vm10_vm1, %v3086_v16, %v652_v15  ;;  %s3677_s14 = smov 106  }
  0x39   :  { %v3093_v20 = vld [vmem:[%s6059_s0 + $0x1ee] sm:$0x2]   ;;  %v3087_v23 = vld [vmem:[%s6059_s0 + $0x1de] sm:$0x8]   ;;  %v552_v24 = vsel %vm10_vm1, %v3066_v18, %v548_v17  ;;  %v3067_v25 = vld [vmem:[%s6059_s0 + $0x1fb] sm:$0x8]  }
  0x3a   :  { %v694_v26 = vsel %vm6_vm0, %v3093_v20, %v3092_v19  ;;  %v3094_v27 = vld [vmem:[%s6059_s0 + $0x6d] sm:$0x4]   ;;  %v3096_v28 = vld [vmem:[%s6059_s0 + $0xb6] sm:$0x1]   ;;  %v660_v30 = vsel %vm14_vm2, %v3087_v23, %v656_v22  ;;  %v3076_v31 = vld [vmem:[%s6059_s0 + $0x53] sm:$0x1]   ;;  %v556_v33 = vsel %vm14_vm2, %v3067_v25, %v552_v24 }
  0x3b   :  { %578 = vrot.lane.b32.xlu0 %v577_v0, %s3674_s16  ;;  %599 = vrot.lane.b32.xlu1 %v598_v9, %s3675_s25  ;;  %v3097_v29 = vld [vmem:[%s6059_s0 + $0x1b5] sm:$0x2]   ;;  %v3077_v32 = vld [vmem:[%s6059_s0 + $0x152] sm:$0x2]   ;;  %v698_v34 = vsel %vm10_vm1, %v3094_v27, %v694_v26  ;;  %s3678_s23 = smov 105   ;;  %s3679_s26 = smov 110  }
  0x3c   :  { %v3095_v35 = vld [vmem:[%s6059_s0 + $0x16c] sm:$0x8]   ;;  %v715_v36 = vsel %vm6_vm0, %v3097_v29, %v3096_v28  ;;  %v3098_v37 = vld [vmem:[%s6059_s0 + $0x34] sm:$0x4]   ;;  %v610_v38 = vsel %vm6_vm0, %v3077_v32, %v3076_v31  ;;  %v3078_v39 = vld [vmem:[%s6059_s0 + $0xd1] sm:$0x4]  }
  0x3d   :  { %494 = vrot.lane.b32.xlu2 %v493_v12, %s3676_s28  ;;  %v3104_v40 = vld [vmem:[%s6059_s0 + $0x44] sm:$0x1]   ;;  %v702_v42 = vsel %vm14_vm2, %v3095_v35, %v698_v34  ;;  %v719_v43 = vsel %vm10_vm1, %v3098_v37, %v715_v36  ;;  %v3099_v44 = vld [vmem:[%s6059_s0 + $0x133] sm:$0x8]   ;;  %v614_v45 = vsel %vm10_vm1, %v3078_v39, %v610_v38  ;;  %v3079_v46 = vld [vmem:[%s6059_s0 + $0x1d0] sm:$0x8]  }
  0x3e   :  { %v3105_v41 = vld [vmem:[%s6059_s0 + $0x143] sm:$0x2]   ;;  %v3108_v49 = vld [vmem:[%s6059_s0 + $0xb] sm:$0x1]   ;;  %s3680_s12 = smov 103   ;;  %v723_v51 = vsel %vm14_vm2, %v3099_v44, %v719_v43  ;;  %v618_v54 = vsel %vm14_vm2, %v3079_v46, %v614_v45  ;;  %s3681_s21 = smov 102  }
  0x3f   :  { %v757_v47 = vsel %vm6_vm0, %v3105_v41, %v3104_v40  ;;  %v3106_v48 = vld [vmem:[%s6059_s0 + $0xc2] sm:$0x4]   ;;  %v3109_v50 = vld [vmem:[%s6059_s0 + $0x10a] sm:$0x2]   ;;  %v3088_v52 = vld [vmem:[%s6059_s0 + $0x28] sm:$0x1]  }
  0x40   :  { %v3089_v53 = vld [vmem:[%s6059_s0 + $0x127] sm:$0x2]   ;;  %v761_v55 = vsel %vm10_vm1, %v3106_v48, %v757_v47  ;;  %v3107_v56 = vld [vmem:[%s6059_s0 + $0x1c1] sm:$0x8]   ;;  %v778_v57 = vsel %vm6_vm0, %v3109_v50, %v3108_v49  ;;  %v3110_v58 = vld [vmem:[%s6059_s0 + $0x89] sm:$0x4]  }
  0x41   :  { %v673_v59 = vsel %vm6_vm0, %v3089_v53, %v3088_v52  ;;  %v3090_v60 = vld [vmem:[%s6059_s0 + $0xa6] sm:$0x4]   ;;  %s3682_s24 = smov 107   ;;  %v3116_v61 = vld [vmem:[%s6059_s0 + $0x19] sm:$0x1]   ;;  %v765_v63 = vsel %vm14_vm2, %v3107_v56, %v761_v55  ;;  %v782_v0 = vsel %vm10_vm1, %v3110_v58, %v778_v57  ;;  %s3683_s10 = smov 100  }
  0x42   :  { %v3117_v62 = vld [vmem:[%s6059_s0 + $0x118] sm:$0x2]   ;;  %v3111_v1 = vld [vmem:[%s6059_s0 + $0x188] sm:$0x8]   ;;  %v677_v2 = vsel %vm10_vm1, %v3090_v60, %v673_v59  ;;  %v3091_v3 = vld [vmem:[%s6059_s0 + $0x1a5] sm:$0x8]  }
  0x43   :  { %640 = vrot.lane.b32.xlu0 %v639_v21, %s3677_s14  ;;  %661 = vrot.lane.b32.xlu1 %v660_v30, %s3678_s23  ;;  %v819_v4 = vsel %vm6_vm0, %v3117_v62, %v3116_v61  ;;  %v3118_v5 = vld [vmem:[%s6059_s0 + $0x97] sm:$0x4]   ;;  %v3120_v6 = vld [vmem:[%s6059_s0 + $0x60] sm:$0x1]   ;;  %v786_v8 = vsel %vm14_vm2, %v3111_v1, %v782_v0  ;;  %v681_v11 = vsel %vm14_vm2, %v3091_v3, %v677_v2  ;;  %s3684_s19 = smov 99   ;;  %s3685_s22 = smov 104  }
  0x44   :  { %v3121_v7 = vld [vmem:[%s6059_s0 + $0x15f] sm:$0x2]   ;;  %v3100_v9 = vld [vmem:[%s6059_s0 + $0x7d] sm:$0x1]   ;;  %v823_v12 = vsel %vm10_vm1, %v3118_v5, %v819_v4  ;;  %v3119_v13 = vld [vmem:[%s6059_s0 + $0x196] sm:$0x8]  }
  0x45   :  { %557 = vrot.lane.b32.xlu2 %v556_v33, %s3679_s26  ;;  %v3101_v10 = vld [vmem:[%s6059_s0 + $0x17c] sm:$0x2]   ;;  %v840_v14 = vsel %vm6_vm0, %v3121_v7, %v3120_v6  ;;  %v3122_v15 = vld [vmem:[%s6059_s0 + $0xde] sm:$0x4]   ;;  %v3128_v18 = vld [vmem:[%s6059_s0 + $0xee] sm:$0x1]   ;;  %v827_v20 = vsel %vm14_vm2, %v3119_v13, %v823_v12 }
  0x46   :  { %v736_v16 = vsel %vm6_vm0, %v3101_v10, %v3100_v9  ;;  %v3102_v17 = vld [vmem:[%s6059_s0 + $0xfb] sm:$0x4]   ;;  %v3129_v19 = vld [vmem:[%s6059_s0 + $0x1ed] sm:$0x2]   ;;  %v844_v21 = vsel %vm10_vm1, %v3122_v15, %v840_v14  ;;  %v3123_v22 = vld [vmem:[%s6059_s0 + $0x1dd] sm:$0x8]  }
  0x47   :  { %v740_v23 = vsel %vm10_vm1, %v3102_v17, %v736_v16  ;;  %v3103_v24 = vld [vmem:[%s6059_s0 + $0x1fa] sm:$0x8]   ;;  %v882_v25 = vsel %vm6_vm0, %v3129_v19, %v3128_v18  ;;  %v3130_v26 = vld [vmem:[%s6059_s0 + $0x6c] sm:$0x4]   ;;  %v3132_v27 = vld [vmem:[%s6059_s0 + $0xb5] sm:$0x1]   ;;  %v848_v29 = vsel %vm14_vm2, %v3123_v22, %v844_v21 }
  0x48   :  { %v3133_v28 = vld [vmem:[%s6059_s0 + $0x1b4] sm:$0x2]   ;;  %s3686_s8 = smov 97   ;;  %v3112_v30 = vld [vmem:[%s6059_s0 + $0x52] sm:$0x1]   ;;  %v744_v32 = vsel %vm14_vm2, %v3103_v24, %v740_v23  ;;  %v886_v33 = vsel %vm10_vm1, %v3130_v26, %v882_v25  ;;  %s3687_s17 = smov 96  }
  0x49   :  { %v3113_v31 = vld [vmem:[%s6059_s0 + $0x151] sm:$0x2]   ;;  %v3131_v34 = vld [vmem:[%s6059_s0 + $0x16b] sm:$0x8]   ;;  %v903_v35 = vsel %vm6_vm0, %v3133_v28, %v3132_v27  ;;  %v3134_v36 = vld [vmem:[%s6059_s0 + $0x33] sm:$0x4]  }
  0x4a   :  { %v798_v37 = vsel %vm6_vm0, %v3113_v31, %v3112_v30  ;;  %v3114_v38 = vld [vmem:[%s6059_s0 + $0xd0] sm:$0x4]   ;;  %s3688_s20 = smov 101   ;;  %v3140_v39 = vld [vmem:[%s6059_s0 + $0x43] sm:$0x1]   ;;  %v890_v41 = vsel %vm14_vm2, %v3131_v34, %v886_v33  ;;  %s3689_s6 = smov 94  }
  0x4b   :  { %703 = vrot.lane.b32.xlu0 %v702_v42, %s3680_s12  ;;  %724 = vrot.lane.b32.xlu1 %v723_v51, %s3681_s21  ;;  %v3141_v40 = vld [vmem:[%s6059_s0 + $0x142] sm:$0x2]   ;;  %v907_v42 = vsel %vm10_vm1, %v3134_v36, %v903_v35  ;;  %v3135_v43 = vld [vmem:[%s6059_s0 + $0x132] sm:$0x8]   ;;  %v802_v44 = vsel %vm10_vm1, %v3114_v38, %v798_v37  ;;  %s3690_s15 = smov 93   ;;  %s3692_s12 = smov 91  }
  0x4c   :  { %v3115_v45 = vld [vmem:[%s6059_s0 + $0x1cf] sm:$0x8]   ;;  %v945_v46 = vsel %vm6_vm0, %v3141_v40, %v3140_v39  ;;  %v3142_v47 = vld [vmem:[%s6059_s0 + $0xc1] sm:$0x4]   ;;  %v3144_v48 = vld [vmem:[%s6059_s0 + $0xa] sm:$0x1]   ;;  %v911_v50 = vsel %vm14_vm2, %v3135_v43, %v907_v42 }
  0x4d   :  { %619 = vrot.lane.b32.xlu2 %v618_v54, %s3682_s24  ;;  %v3145_v49 = vld [vmem:[%s6059_s0 + $0x109] sm:$0x2]   ;;  %v3124_v51 = vld [vmem:[%s6059_s0 + $0x27] sm:$0x1]   ;;  %v806_v53 = vsel %vm14_vm2, %v3115_v45, %v802_v44  ;;  %v949_v54 = vsel %vm10_vm1, %v3142_v47, %v945_v46  ;;  %v3143_v55 = vld [vmem:[%s6059_s0 + $0x1c0] sm:$0x8]  }
  0x4e   :  { %v3125_v52 = vld [vmem:[%s6059_s0 + $0x126] sm:$0x2]   ;;  %v966_v56 = vsel %vm6_vm0, %v3145_v49, %v3144_v48  ;;  %v3146_v57 = vld [vmem:[%s6059_s0 + $0x88] sm:$0x4]   ;;  %v3_v60 = vld [vmem:[%s6059_s0] sm:$0x1]   ;;  %v953_v0 = vsel %vm14_vm2, %v3143_v55, %v949_v54 }
  0x4f   :  { %v861_v58 = vsel %vm6_vm0, %v3125_v52, %v3124_v51  ;;  %v3126_v59 = vld [vmem:[%s6059_s0 + $0xa5] sm:$0x4]   ;;  %v2961_v61 = vld [vmem:[%s6059_s0 + $0x7f] sm:$0x2]   ;;  %v3152_v62 = vld [vmem:[%s6059_s0 + $0x18] sm:$0x1]   ;;  %v970_v1 = vsel %vm10_vm1, %v3146_v57, %v966_v56 }
  0x50   :  { %v3147_v2 = vld [vmem:[%s6059_s0 + $0x187] sm:$0x8]   ;;  %v3154_v3 = vld [vmem:[%s6059_s0 + $0x96] sm:$0x4]   ;;  %v865_v4 = vsel %vm10_vm1, %v3126_v59, %v861_v58  ;;  %v3127_v5 = vld [vmem:[%s6059_s0 + $0x1a4] sm:$0x8]   ;;  %v7_v7 = vsel %vm6_vm0, %v2961_v61, %v3_v60 }
  0x51   :  { %v3156_v6 = vld [vmem:[%s6059_s0 + $0x5f] sm:$0x1]   ;;  %v3136_v10 = vld [vmem:[%s6059_s0 + $0x7c] sm:$0x1]   ;;  %v974_v12 = vsel %vm14_vm2, %v3147_v2, %v970_v1  ;;  %v2962_v13 = vld [vmem:[%s6059_s0 + $0xfe] sm:$0x4]   ;;  %v869_v15 = vsel %vm14_vm2, %v3127_v5, %v865_v4 }
  0x52   :  { %v3157_v9 = vld [vmem:[%s6059_s0 + $0x15e] sm:$0x2]   ;;  %v2963_v14 = vld [vmem:[%s6059_s0 + $0x17d] sm:$0x8]   ;;  %vm16_vm11 = vcmask 72704   ;;  %v11_v16 = vsel %vm10_vm1, %v2962_v13, %v7_v7  ;;  %s3693_s21 = smov 90  }
  0x53   :  { %766 = vrot.lane.b32.xlu0 %v765_v63, %s3683_s10  ;;  %787 = vrot.lane.b32.xlu1 %v786_v8, %s3684_s19  ;;  %v3153_v63 = vld [vmem:[%s6059_s0 + $0x117] sm:$0x2]   ;;  %v1028_v19 = vsel %vm6_vm0, %v3157_v9, %v3156_v6  ;;  %v15_v21 = vsel %vm14_vm2, %v2963_v14, %v11_v16  ;;  %v3138_v23 = vld [vmem:[%s6059_s0 + $0xfa] sm:$0x4]   ;;  %s3694_s24 = smov 95   ;;  %s3696_s19 = smov 87  }
  0x54   :  { %v1007_v8 = vsel %vm6_vm0, %v3153_v63, %v3152_v62  ;;  %v3155_v18 = vld [vmem:[%s6059_s0 + $0x195] sm:$0x8]   ;;  %17 = vst.msk [vmem:[#allocation2] ss:$72 sm:$0x3] %vm16_vm11, %v15_v21   ;;  %vm57_vm12 = vcmask 1048568  }
  0x55   :  { %682 = vrot.lane.b32.xlu2 %v681_v11, %s3685_s22  ;;  %s3691_s22 = smov 98   ;;  %v3137_v11 = vld [vmem:[%s6059_s0 + $0x17b] sm:$0x2]   ;;  %v1011_v17 = vsel %vm10_vm1, %v3154_v3, %v1007_v8  ;;  %v3164_v24 = vld [vmem:[%s6059_s0 + $0xed] sm:$0x1]   ;;  %vm140_vm13 = vcmask 1048552  }
  0x56   :  { %v924_v22 = vsel %vm6_vm0, %v3137_v11, %v3136_v10  ;;  %v3165_v25 = vld [vmem:[%s6059_s0 + $0x1ec] sm:$0x2]   ;;  %v1015_v26 = vsel %vm14_vm2, %v3155_v18, %v1011_v17  ;;  %v3159_v28 = vld [vmem:[%s6059_s0 + $0x1dc] sm:$0x8]   ;;  %v3139_v31 = vld [vmem:[%s6059_s0 + $0x1f9] sm:$0x8]  }
  0x57   :  { %v928_v30 = vsel %vm10_vm1, %v3138_v23, %v924_v22  ;;  %v3168_v33 = vld [vmem:[%s6059_s0 + $0xb4] sm:$0x1]   ;;  %v3148_v35 = vld [vmem:[%s6059_s0 + $0x51] sm:$0x1]   ;;  %v3167_v40 = vld [vmem:[%s6059_s0 + $0x16a] sm:$0x8]  }
  0x58   :  { %v3169_v34 = vld [vmem:[%s6059_s0 + $0x1b3] sm:$0x2]   ;;  %v3149_v37 = vld [vmem:[%s6059_s0 + $0x150] sm:$0x2]   ;;  %v932_v38 = vsel %vm14_vm2, %v3139_v31, %v928_v30  ;;  %v3176_v45 = vld [vmem:[%s6059_s0 + $0x42] sm:$0x1]  }
  0x59   :  { %19 = vst.msk [vmem:[#allocation2 - $0x8f] ss:$72 sm:$0xc] %vm16_vm11, %v15_v21   ;;  %v3170_v42 = vld [vmem:[%s6059_s0 + $0x32] sm:$0x4]   ;;  %v986_v43 = vsel %vm6_vm0, %v3149_v37, %v3148_v35  ;;  %s3703_s18 = smov 86  }
  0x5a   :  { %v3150_v44 = vld [vmem:[%s6059_s0 + $0xcf] sm:$0x4]   ;;  %v3177_v46 = vld [vmem:[%s6059_s0 + $0x141] sm:$0x2]   ;;  %v3171_v49 = vld [vmem:[%s6059_s0 + $0x131] sm:$0x8]  }
  0x5b   :  { %828 = vrot.lane.b32.xlu0 %v827_v20, %s3686_s8  ;;  %849 = vrot.lane.b32.xlu1 %v848_v29, %s3687_s17  ;;  %v3158_v20 = vld [vmem:[%s6059_s0 + $0xdd] sm:$0x4]   ;;  %v3166_v29 = vld [vmem:[%s6059_s0 + $0x6b] sm:$0x4]   ;;  %v990_v52 = vsel %vm10_vm1, %v3150_v44, %v986_v43  ;;  %v1133_v54 = vsel %vm6_vm0, %v3177_v46, %v3176_v45  ;;  %s3698_s8 = smov 85   ;;  %s3699_s17 = smov 84  }
  0x5c   :  { %v1032_v27 = vsel %vm10_vm1, %v3158_v20, %v1028_v19  ;;  %v3180_v55 = vld [vmem:[%s6059_s0 + $0x9] sm:$0x1]   ;;  %v3160_v58 = vld [vmem:[%s6059_s0 + $0x26] sm:$0x1]   ;;  %v3179_v63 = vld [vmem:[%s6059_s0 + $0x1bf] sm:$0x8]  }
  0x5d   :  { %745 = vrot.lane.b32.xlu2 %v744_v32, %s3688_s20  ;;  %v1070_v32 = vsel %vm6_vm0, %v3165_v25, %v3164_v24  ;;  %v1036_v36 = vsel %vm14_vm2, %v3159_v28, %v1032_v27  ;;  %v3181_v56 = vld [vmem:[%s6059_s0 + $0x108] sm:$0x2]   ;;  %v3161_v59 = vld [vmem:[%s6059_s0 + $0x125] sm:$0x2]   ;;  %s3700_s20 = smov 89   ;;  %vm99_vm14 = vcmask 1048560  }
  0x5e   :  { %v1074_v39 = vsel %vm10_vm1, %v3166_v29, %v1070_v32  ;;  %v3182_v1 = vld [vmem:[%s6059_s0 + $0x87] sm:$0x4]   ;;  %v1049_v2 = vsel %vm6_vm0, %v3161_v59, %v3160_v58  ;;  %v3162_v3 = vld [vmem:[%s6059_s0 + $0xa4] sm:$0x4]   ;;  %v3188_v4 = vld [vmem:[%s6059_s0 + $0x17] sm:$0x1]  }
  0x5f   :  { %v1078_v47 = vsel %vm14_vm2, %v3167_v40, %v1074_v39  ;;  %v3189_v5 = vld [vmem:[%s6059_s0 + $0x116] sm:$0x2]   ;;  %v3183_v9 = vld [vmem:[%s6059_s0 + $0x186] sm:$0x8]   ;;  %v3163_v13 = vld [vmem:[%s6059_s0 + $0x1a3] sm:$0x8]  }
  0x60   :  { %v3190_v10 = vld [vmem:[%s6059_s0 + $0x95] sm:$0x4]   ;;  %v1195_v14 = vsel %vm6_vm0, %v3189_v5, %v3188_v4  ;;  %v3193_v16 = vld [vmem:[%s6059_s0 + $0x15d] sm:$0x2]   ;;  %v3172_v18 = vld [vmem:[%s6059_s0 + $0x7b] sm:$0x1]  }
  0x61   :  { %v3173_v19 = vld [vmem:[%s6059_s0 + $0x17a] sm:$0x2]   ;;  %v3191_v20 = vld [vmem:[%s6059_s0 + $0x194] sm:$0x8]   ;;  %v1199_v23 = vsel %vm10_vm1, %v3190_v10, %v1195_v14  ;;  %v3194_v25 = vld [vmem:[%s6059_s0 + $0xdc] sm:$0x4]  }
  0x62   :  { %v3174_v27 = vld [vmem:[%s6059_s0 + $0xf9] sm:$0x4]   ;;  %v3200_v28 = vld [vmem:[%s6059_s0 + $0xec] sm:$0x1]   ;;  %v1203_v30 = vsel %vm14_vm2, %v3191_v20, %v1199_v23  ;;  %v3204_v39 = vld [vmem:[%s6059_s0 + $0xb3] sm:$0x1]  }
  0x63   :  { %891 = vrot.lane.b32.xlu0 %v890_v41, %s3689_s6  ;;  %912 = vrot.lane.b32.xlu1 %v911_v50, %s3690_s15  ;;  %v1091_v41 = vsel %vm6_vm0, %v3169_v34, %v3168_v33  ;;  %v3178_v50 = vld [vmem:[%s6059_s0 + $0xc0] sm:$0x4]   ;;  %s3701_s6 = smov 82   ;;  %s3702_s15 = smov 81   ;;  %v3201_v29 = vld [vmem:[%s6059_s0 + $0x1eb] sm:$0x2]  }
  0x64   :  { %v1095_v48 = vsel %vm10_vm1, %v3170_v42, %v1091_v41  ;;  %v1137_v62 = vsel %vm10_vm1, %v3178_v50, %v1133_v54  ;;  %v3195_v33 = vld [vmem:[%s6059_s0 + $0x1db] sm:$0x8]   ;;  %v3202_v34 = vld [vmem:[%s6059_s0 + $0x6a] sm:$0x4]   ;;  %v3175_v37 = vld [vmem:[%s6059_s0 + $0x1f8] sm:$0x8]  }
  0x65   :  { %807 = vrot.lane.b32.xlu2 %v806_v53, %s3691_s22  ;;  %s3697_s22 = smov 92   ;;  %v3151_v53 = vld [vmem:[%s6059_s0 + $0x1ce] sm:$0x8]   ;;  %v1099_v57 = vsel %vm14_vm2, %v3171_v49, %v1095_v48  ;;  %v1141_v6 = vsel %vm14_vm2, %v3179_v63, %v1137_v62  ;;  %v3205_v40 = vld [vmem:[%s6059_s0 + $0x1b2] sm:$0x2]   ;;  %s3704_s4 = smov 79  }
  0x66   :  { %v994_v60 = vsel %vm14_vm2, %v3151_v53, %v990_v52  ;;  %v3184_v42 = vld [vmem:[%s6059_s0 + $0x50] sm:$0x1]   ;;  %v3203_v44 = vld [vmem:[%s6059_s0 + $0x169] sm:$0x8]   ;;  %vm371_vm15 = vcmask 1048504   ;;  %v1279_v48 = vsel %vm6_vm0, %v3205_v40, %v3204_v39  ;;  %s3705_s13 = smov 78  }
  0x67   :  { %v3185_v43 = vld [vmem:[%s6059_s0 + $0x14f] sm:$0x2]   ;;  %v3206_v49 = vld [vmem:[%s6059_s0 + $0x31] sm:$0x4]   ;;  %s3706_s16 = smov 83   ;;  %s3707_s2 = smov 76  }
  0x68   :  { %v1174_v50 = vsel %vm6_vm0, %v3185_v43, %v3184_v42  ;;  %v3186_v52 = vld [vmem:[%s6059_s0 + $0xce] sm:$0x4]   ;;  %v3212_v53 = vld [vmem:[%s6059_s0 + $0x41] sm:$0x1]   ;;  %v3207_v58 = vld [vmem:[%s6059_s0 + $0x130] sm:$0x8]  }
  0x69   :  { %v3213_v54 = vld [vmem:[%s6059_s0 + $0x140] sm:$0x2]   ;;  %v3187_v62 = vld [vmem:[%s6059_s0 + $0x1cd] sm:$0x8]   ;;  %v3197_v4 = vld [vmem:[%s6059_s0 + $0x124] sm:$0x2]  }
  0x6a   :  { %v3214_v59 = vld [vmem:[%s6059_s0 + $0xbf] sm:$0x4]   ;;  %v1321_v63 = vsel %vm6_vm0, %v3213_v54, %v3212_v53  ;;  %v3218_v10 = vld [vmem:[%s6059_s0 + $0x86] sm:$0x4]   ;;  %s3708_s11 = smov 75   ;;  %s3709_s14 = smov 80  }
  0x6b   :  { %954 = vrot.lane.b32.xlu0 %v953_v0, %s3692_s12  ;;  %975 = vrot.lane.b32.xlu1 %v974_v12, %s3693_s21  ;;  %s3695_s12 = smov 88   ;;  %v1154_v0 = vsel %vm6_vm0, %v3181_v56, %v3180_v55  ;;  %v1053_v12 = vsel %vm10_vm1, %v3162_v3, %v1049_v2  ;;  %v3196_v3 = vld [vmem:[%s6059_s0 + $0x25] sm:$0x1]   ;;  %v3224_v14 = vld [vmem:[%s6059_s0 + $0x16] sm:$0x1]   ;;  %s3710_s29 = smov 73  }
  0x6c   :  { %v1158_v8 = vsel %vm10_vm1, %v3182_v1, %v1154_v0  ;;  %v1057_v21 = vsel %vm14_vm2, %v3163_v13, %v1053_v12  ;;  %v3216_v0 = vld [vmem:[%s6059_s0 + $0x8] sm:$0x1]   ;;  %v1237_v12 = vsel %vm6_vm0, %v3197_v4, %v3196_v3  ;;  %v3198_v13 = vld [vmem:[%s6059_s0 + $0xa3] sm:$0x4]   ;;  %v3226_v20 = vld [vmem:[%s6059_s0 + $0x94] sm:$0x4]  }
  0x6d   :  { %870 = vrot.lane.b32.xlu2 %v869_v15, %s3694_s24  ;;  %v3192_v15 = vld [vmem:[%s6059_s0 + $0x5e] sm:$0x1]   ;;  %v1162_v17 = vsel %vm14_vm2, %v3183_v9, %v1158_v8  ;;  %v3217_v1 = vld [vmem:[%s6059_s0 + $0x107] sm:$0x2]   ;;  %v3215_v8 = vld [vmem:[%s6059_s0 + $0x1be] sm:$0x8]  }
  0x6e   :  { %v1216_v24 = vsel %vm6_vm0, %v3193_v16, %v3192_v15  ;;  %v1342_v9 = vsel %vm6_vm0, %v3217_v1, %v3216_v0  ;;  %v3225_v15 = vld [vmem:[%s6059_s0 + $0x115] sm:$0x2]   ;;  %v3199_v23 = vld [vmem:[%s6059_s0 + $0x1a2] sm:$0x8]   ;;  %s3711_s9 = smov 72   ;;  %vm475_vm11 = vcmask 1007504  }
  0x6f   :  { %v1220_v32 = vsel %vm10_vm1, %v3194_v25, %v1216_v24  ;;  %v1383_v24 = vsel %vm6_vm0, %v3225_v15, %v3224_v14  ;;  %v3228_v25 = vld [vmem:[%s6059_s0 + $0x5d] sm:$0x1]   ;;  %v3238_v43 = vld [vmem:[%s6059_s0 + $0x69] sm:$0x4]   ;;  %s3713_s27 = smov 70   ;;  %s3714_s7 = smov 69  }
  0x70   :  { %v1224_v41 = vsel %vm14_vm2, %v3195_v33, %v1220_v32  ;;  %v1387_v33 = vsel %vm10_vm1, %v3226_v20, %v1383_v24  ;;  %v3231_v42 = vld [vmem:[%s6059_s0 + $0x1da] sm:$0x8]   ;;  %v3221_v53 = vld [vmem:[%s6059_s0 + $0x14e] sm:$0x2]   ;;  %s3715_s10 = smov 74   ;;  %s3716_s25 = smov 67  }
  0x71   :  { %v3243_v3 = vld [vmem:[%s6059_s0 + $0x12f] sm:$0x8]   ;;  %v3250_v4 = vld [vmem:[%s6059_s0 + $0xbe] sm:$0x4]   ;;  %v3233_v14 = vld [vmem:[%s6059_s0 + $0x123] sm:$0x2]  }
  0x72   :  { %s3717_s5 = smov 66   ;;  %s3719_s23 = smov 64  }
  0x73   :  { %1016 = vrot.lane.b32.xlu0 %v1015_v26, %s3695_s12  ;;  %1037 = vrot.lane.b32.xlu1 %v1036_v36, %s3696_s19  ;;  %v1112_v26 = vsel %vm6_vm0, %v3173_v19, %v3172_v18  ;;  %v1346_v18 = vsel %vm10_vm1, %v3218_v10, %v1342_v9  ;;  %v3219_v19 = vld [vmem:[%s6059_s0 + $0x185] sm:$0x8]   ;;  %s3712_s12 = smov 77   ;;  %v3252_v9 = vld [vmem:[%s6059_s0 + $0x7] sm:$0x1]   ;;  %s3720_s3 = smov 63  }
  0x74   :  { %v1116_v36 = vsel %vm10_vm1, %v3174_v27, %v1112_v26  ;;  %v3229_v26 = vld [vmem:[%s6059_s0 + $0x15c] sm:$0x2]   ;;  %v1350_v27 = vsel %vm14_vm2, %v3219_v19, %v1346_v18  ;;  %v3253_v10 = vld [vmem:[%s6059_s0 + $0x106] sm:$0x2]   ;;  %s3722_s21 = smov 61   ;;  %s3723_s30 = smov 60  }
  0x75   :  { %933 = vrot.lane.b32.xlu2 %v932_v38, %s3697_s22  ;;  %v1258_v38 = vsel %vm6_vm0, %v3201_v29, %v3200_v28  ;;  %v1120_v45 = vsel %vm14_vm2, %v3175_v37, %v1116_v36  ;;  %v3208_v28 = vld [vmem:[%s6059_s0 + $0x7a] sm:$0x1]   ;;  %v3236_v37 = vld [vmem:[%s6059_s0 + $0xeb] sm:$0x1]   ;;  %v1530_v18 = vsel %vm6_vm0, %v3253_v10, %v3252_v9  ;;  %v3254_v19 = vld [vmem:[%s6059_s0 + $0x85] sm:$0x4]  }
  0x76   :  { %v3209_v29 = vld [vmem:[%s6059_s0 + $0x179] sm:$0x2]   ;;  %s3725_s19 = smov 58   ;;  %s3726_s28 = smov 57  }
  0x77   :  { %v4589_v51 = vpop.permute.xlu2 %217   ;;  %v3210_v36 = vld [vmem:[%s6059_s0 + $0xf8] sm:$0x4]   ;;  %s3729_s26 = smov 54   ;;  %s3732_s24 = smov 51  }
  0x78   :  { %221 = vst.msk [vmem:[#allocation2 + $0x80] sm:$0x3] %vm173_vm6, %v4589_v51   ;;  %s3735_s22 = smov 48   ;;  %s2954_s1 = sshll.u32 %s6060_s1, 4  ;;  %s2955_s1 = int_to_ptr.hbm [resolvable:$true] %s2954_s1 }
  0x79   :  { %223 = vst.msk [vmem:[#allocation2 + $0x36] sm:$0xc] %vm173_vm6, %v4589_v51   ;;  %vm413_vm6 = vcmask 1032104  }
  0x7b   :  { %1079 = vrot.lane.b32.xlu0 %v1078_v47, %s3698_s8  ;;  %1100 = vrot.lane.b32.xlu1 %v1099_v57, %s3699_s17  ;;  %v1262_v47 = vsel %vm10_vm1, %v3202_v34, %v1258_v38  ;;  %v1283_v57 = vsel %vm10_vm1, %v3206_v49, %v1279_v48  ;;  %v3230_v34 = vld [vmem:[%s6059_s0 + $0xdb] sm:$0x4]   ;;  %v3237_v38 = vld [vmem:[%s6059_s0 + $0x1ea] sm:$0x2]   ;;  %s3718_s8 = smov 71   ;;  %s3728_s17 = smov 55  }
  0x7c   :  { %v1266_v55 = vsel %vm14_vm2, %v3203_v44, %v1262_v47  ;;  %v1287_v2 = vsel %vm14_vm2, %v3207_v58, %v1283_v57  ;;  %v3211_v47 = vld [vmem:[%s6059_s0 + $0x1f7] sm:$0x8]   ;;  %v1446_v48 = vsel %vm6_vm0, %v3237_v38, %v3236_v37  ;;  %v3240_v49 = vld [vmem:[%s6059_s0 + $0xb2] sm:$0x1]   ;;  %v3239_v58 = vld [vmem:[%s6059_s0 + $0x168] sm:$0x8]  }
  0x7d   :  { %v51_v61 = vpop.permute.xlu0 %50   ;;  %995 = vrot.lane.b32.xlu2 %v994_v60, %s3700_s20  ;;  %v134_v7 = vpop.permute.xlu1 %133   ;;  %v1450_v57 = vsel %vm10_vm1, %v3238_v43, %v1446_v48  ;;  %v3263_v37 = vld [vmem:[%s6059_s0 + $0x192] sm:$0x8]   ;;  %s3738_s20 = smov 45  }
  0x7e   :  { %54 = vst.msk [vmem:[#allocation2 + $0x28] sm:$0x3] %vm52_vm8, %v51_v61   ;;  %v1454_v0 = vsel %vm14_vm2, %v3239_v58, %v1450_v57  ;;  %v3276_v58 = vld [vmem:[%s6059_s0 + $0xb1] sm:$0x1]  }
  0x7f   :  { %56 = vst.msk [vmem:[#allocation2 + $0x6e] sm:$0xc] %vm52_vm8, %v51_v61   ;;  %v4644_v11 = vpop.permute.xlu2 %259   ;;  %vm266_vm8 = vcmask 1048528  }
  0x80   :  { %59 = vst.msk [vmem:[#allocation2 + $0x20] sm:$0x3] %vm57_vm12, %v51_v61  }
  0x81   :  { %61 = vst.msk [vmem:[#allocation2 + $0x66] sm:$0xc] %vm57_vm12, %v51_v61   ;;  %v1178_v61 = vsel %vm10_vm1, %v3186_v52, %v1174_v50  ;;  %vm308_vm12 = vcmask 1048520   ;;  %v3241_v50 = vld [vmem:[%s6059_s0 + $0x1b1] sm:$0x2]  }
  0x82   :  { %137 = vst.msk [vmem:[#allocation2 + $0x30] sm:$0x3] %vm135_vm10, %v134_v7   ;;  %v1182_v5 = vsel %vm14_vm2, %v3187_v62, %v1178_v61  ;;  %v3220_v52 = vld [vmem:[%s6059_s0 + $0x4f] sm:$0x1]  }
  0x83   :  { %1142 = vrot.lane.b32.xlu0 %v1141_v6, %s3701_s6  ;;  %139 = vst.msk [vmem:[#allocation2 + $0x76] sm:$0xc] %vm135_vm10, %v134_v7   ;;  %1163 = vrot.lane.b32.xlu1 %v1162_v17, %s3702_s15  ;;  %vm224_vm10 = vcmask 1048536   ;;  %v1362_v61 = vsel %vm6_vm0, %v3221_v53, %v3220_v52  ;;  %v3222_v62 = vld [vmem:[%s6059_s0 + $0xcd] sm:$0x4]   ;;  %s3721_s6 = smov 68  }
  0x84   :  { %263 = vst.msk [vmem:[#allocation2 + $0x60] sm:$0x3] %vm131_vm4, %v4644_v11   ;;  %v3274_v52 = vld [vmem:[%s6059_s0 + $0x68] sm:$0x4]   ;;  %s3731_s15 = smov 52  }
  0x85   :  { %v93_v22 = vpop.permute.xlu0 %92   ;;  %265 = vst.msk [vmem:[#allocation2 + $0x16] sm:$0xc] %vm131_vm4, %v4644_v11   ;;  %1058 = vrot.lane.b32.xlu2 %v1057_v21, %s3703_s18  ;;  %v4692_v31 = vpop.permute.xlu1 %175   ;;  %vm392_vm4 = vcmask 1040304   ;;  %s3741_s18 = smov 42  }
  0x86   :  { %96 = vst.msk [vmem:[#allocation2 + $0x8] sm:$0x3] %vm94_vm7, %v93_v22  }
  0x87   :  { %98 = vst.msk [vmem:[#allocation2 + $0x4e] sm:$0xc] %vm94_vm7, %v93_v22   ;;  %v370_v35 = vpop.permute.xlu2 %369   ;;  %vm454_vm7 = vcmask 1015704  }
  0x88   :  { %142 = vst.msk [vmem:[#allocation2 + $0x28] sm:$0x3] %vm140_vm13, %v134_v7  }
  0x89   :  { %179 = vst.msk [vmem:[#allocation2 + $0x10] sm:$0x3] %vm177_vm9, %v4692_v31  }
  0x8a   :  { %181 = vst.msk [vmem:[#allocation2 + $0x56] sm:$0xc] %vm177_vm9, %v4692_v31   ;;  %vm496_vm9 = vcmask 999304  }
  0x8b   :  { %1204 = vrot.lane.b32.xlu0 %v1203_v30, %s3704_s4  ;;  %144 = vst.msk [vmem:[#allocation2 + $0x6e] sm:$0xc] %vm140_vm13, %v134_v7   ;;  %1225 = vrot.lane.b32.xlu1 %v1224_v41, %s3705_s13  ;;  %v1325_v7 = vsel %vm10_vm1, %v3214_v59, %v1321_v63  ;;  %v3227_v30 = vld [vmem:[%s6059_s0 + $0x193] sm:$0x8]   ;;  %vm517_vm13 = vcmask 991104   ;;  %v1467_v59 = vsel %vm6_vm0, %v3241_v50, %v3240_v49  ;;  %s3724_s4 = smov 65  }
  0x8c   :  { %100 = vst.msk [vmem:[#allocation2] sm:$0x3] %vm99_vm14, %v93_v22   ;;  %v1329_v16 = vsel %vm14_vm2, %v3215_v8, %v1325_v7  ;;  %v1391_v39 = vsel %vm14_vm2, %v3227_v30, %v1387_v33  ;;  %v3249_v63 = vld [vmem:[%s6059_s0 + $0x13f] sm:$0x2]   ;;  %v3223_v7 = vld [vmem:[%s6059_s0 + $0x1cc] sm:$0x8]  }
  0x8d   :  { %v4730_v46 = vpop.permute.xlu0 %301   ;;  %102 = vst.msk [vmem:[#allocation2 + $0x46] sm:$0xc] %vm99_vm14, %v93_v22   ;;  %1121 = vrot.lane.b32.xlu2 %v1120_v45, %s3706_s16  ;;  %v4753_v56 = vpop.permute.xlu1 %343   ;;  %v1241_v22 = vsel %vm10_vm1, %v3198_v13, %v1237_v12  ;;  %vm559_vm14 = vcmask 974704   ;;  %v3232_v13 = vld [vmem:[%s6059_s0 + $0x24] sm:$0x1]   ;;  %s3734_s13 = smov 49  }
  0x8e   :  { %305 = vst.msk [vmem:[#allocation2 + $0x40] sm:$0x3] %vm90_vm5, %v4730_v46   ;;  %v1425_v20 = vsel %vm6_vm0, %v3233_v14, %v3232_v13  ;;  %v3264_v33 = vld [vmem:[%s6059_s0 + $0x5c] sm:$0x1]   ;;  %v3286_v13 = vld [vmem:[%s6059_s0 + $0xbd] sm:$0x4]  }
  0x8f   :  { %307 = vst.msk [vmem:[#allocation2 + $0x86] sm:$0xc] %vm90_vm5, %v4730_v46   ;;  %vm433_vm5 = vcmask 1023904   ;;  %v432_v60 = vpop.permute.xlu2 %431   ;;  %s3744_s16 = smov 39  }
  0x90   :  { %373 = vst.msk [vmem:[#allocation2 + $0x40] sm:$0x3] %vm371_vm15, %v370_v35  }
  0x91   :  { %347 = vst.msk [vmem:[#allocation2 + $0x20] sm:$0x3] %vm48_vm3, %v4753_v56  }
  0x92   :  { %349 = vst.msk [vmem:[#allocation2 + $0x66] sm:$0xc] %vm48_vm3, %v4753_v56   ;;  %vm182_vm3 = vcmask 1048544  }
  0x93   :  { %1267 = vrot.lane.b32.xlu0 %v1266_v55, %s3707_s2  ;;  %375 = vst.msk [vmem:[#allocation2 + $0x86] sm:$0xc] %vm371_vm15, %v370_v35   ;;  %1288 = vrot.lane.b32.xlu1 %v1287_v2, %s3708_s11  ;;  %v1300_v35 = vsel %vm6_vm0, %v3209_v29, %v3208_v28  ;;  %vm350_vm15 = vcmask 1048512   ;;  %v3262_v28 = vld [vmem:[%s6059_s0 + $0x93] sm:$0x4]   ;;  %s3727_s2 = smov 62  }
  0x94   :  { %435 = vst.msk [vmem:[#allocation2 + $0x28] sm:$0x3] %vm433_vm5, %v432_v60   ;;  %v1304_v45 = vsel %vm10_vm1, %v3210_v36, %v1300_v35  ;;  %v3244_v35 = vld [vmem:[%s6059_s0 + $0x79] sm:$0x1]   ;;  %s3737_s11 = smov 46  }
  0x95   :  { %v391_v6 = vpop.permute.xlu0 %390   ;;  %437 = vst.msk [vmem:[#allocation2 + $0x6e] sm:$0xc] %vm433_vm5, %v432_v60   ;;  %1183 = vrot.lane.b32.xlu2 %v1182_v5, %s3709_s14  ;;  %v412_v17 = vpop.permute.xlu1 %411   ;;  %v1308_v54 = vsel %vm14_vm2, %v3211_v47, %v1304_v45  ;;  %v3242_v60 = vld [vmem:[%s6059_s0 + $0x30] sm:$0x4]   ;;  %vm580_vm5 = vcmask 966504   ;;  %s3747_s14 = smov 36  }
  0x96   :  { %394 = vst.msk [vmem:[#allocation2 + $0x20] sm:$0x3] %vm392_vm4, %v391_v6   ;;  %v1471_v2 = vsel %vm10_vm1, %v3242_v60, %v1467_v59  ;;  %v3245_v36 = vld [vmem:[%s6059_s0 + $0x178] sm:$0x2]   ;;  %v3272_v45 = vld [vmem:[%s6059_s0 + $0xea] sm:$0x1]  }
  0x97   :  { %396 = vst.msk [vmem:[#allocation2 + $0x66] sm:$0xc] %vm392_vm4, %v391_v6   ;;  %v495_v21 = vpop.permute.xlu2 %494   ;;  %vm538_vm4 = vcmask 982904   ;;  %v1366_v6 = vsel %vm10_vm1, %v3222_v62, %v1362_v61  ;;  %v1475_v12 = vsel %vm14_vm2, %v3243_v3, %v1471_v2  ;;  %v1488_v43 = vsel %vm6_vm0, %v3245_v36, %v3244_v35  ;;  %v3273_v47 = vld [vmem:[%s6059_s0 + $0x1e9] sm:$0x2]  }
  0x98   :  { %184 = vst.msk [vmem:[#allocation2 + $0x8] sm:$0x3] %vm182_vm3, %v4692_v31   ;;  %v1370_v15 = vsel %vm14_vm2, %v3223_v7, %v1366_v6  ;;  %v1634_v57 = vsel %vm6_vm0, %v3273_v47, %v3272_v45  ;;  %v3277_v59 = vld [vmem:[%s6059_s0 + $0x1b0] sm:$0x2]   ;;  %v3256_v61 = vld [vmem:[%s6059_s0 + $0x4e] sm:$0x1]  }
  0x99   :  { %414 = vst.msk [vmem:[#allocation2] sm:$0x3] %vm413_vm6, %v412_v17   ;;  %v3257_v62 = vld [vmem:[%s6059_s0 + $0x14d] sm:$0x2]   ;;  %v1655_v2 = vsel %vm6_vm0, %v3277_v59, %v3276_v58  ;;  %v3278_v3 = vld [vmem:[%s6059_s0 + $0x2f] sm:$0x4]  }
  0x9a   :  { %416 = vst.msk [vmem:[#allocation2 + $0x46] sm:$0xc] %vm413_vm6, %v412_v17   ;;  %v3251_v17 = vld [vmem:[%s6059_s0 + $0x1bd] sm:$0x8]   ;;  %vm601_vm6 = vcmask 958304   ;;  %v1659_v10 = vsel %vm10_vm1, %v3278_v3, %v1655_v2 }
  0x9b   :  { %1330 = vrot.lane.b32.xlu0 %v1329_v16, %s3710_s29  ;;  %186 = vst.msk [vmem:[#allocation2 + $0x4e] sm:$0xc] %vm182_vm3, %v4692_v31   ;;  %v1245_v31 = vsel %vm14_vm2, %v3199_v23, %v1241_v22  ;;  %1351 = vrot.lane.b32.xlu1 %v1350_v27, %s3711_s9  ;;  %vm621_vm3 = vcmask 950104   ;;  %v3260_v22 = vld [vmem:[%s6059_s0 + $0x15] sm:$0x1]   ;;  %s3730_s29 = smov 59  }
  0x9c   :  { %268 = vst.msk [vmem:[#allocation2 + $0x10] sm:$0x3] %vm266_vm8, %v4644_v11   ;;  %v3261_v23 = vld [vmem:[%s6059_s0 + $0x114] sm:$0x2]   ;;  %v3255_v27 = vld [vmem:[%s6059_s0 + $0x184] sm:$0x8]  }
  0x9d   :  { %v453_v32 = vpop.permute.xlu0 %452   ;;  %270 = vst.msk [vmem:[#allocation2 + $0x56] sm:$0xc] %vm266_vm8, %v4644_v11   ;;  %v1404_v11 = vsel %vm6_vm0, %v3229_v26, %v3228_v25  ;;  %1246 = vrot.lane.b32.xlu2 %v1245_v31, %s3712_s12  ;;  %v474_v40 = vpop.permute.xlu1 %473   ;;  %v1534_v26 = vsel %vm10_vm1, %v3254_v19, %v1530_v18  ;;  %v3235_v31 = vld [vmem:[%s6059_s0 + $0x1a1] sm:$0x8]   ;;  %vm684_vm8 = vcmask 925504   ;;  %s3740_s9 = smov 43  }
  0x9e   :  { %456 = vst.msk [vmem:[#allocation2 + $0x8] sm:$0x3] %vm454_vm7, %v453_v32   ;;  %v1408_v41 = vsel %vm10_vm1, %v3230_v34, %v1404_v11  ;;  %v3265_v11 = vld [vmem:[%s6059_s0 + $0x15b] sm:$0x2]   ;;  %v1538_v34 = vsel %vm14_vm2, %v3255_v27, %v1534_v26  ;;  %v3284_v6 = vld [vmem:[%s6059_s0 + $0x3f] sm:$0x1]  }
  0x9f   :  { %458 = vst.msk [vmem:[#allocation2 + $0x4e] sm:$0xc] %vm454_vm7, %v453_v32   ;;  %v558_v44 = vpop.permute.xlu2 %557   ;;  %vm642_vm7 = vcmask 941904   ;;  %v1571_v32 = vsel %vm6_vm0, %v3261_v23, %v3260_v22  ;;  %v3285_v7 = vld [vmem:[%s6059_s0 + $0x13e] sm:$0x2]   ;;  %s3750_s12 = smov 33  }
  0xa0   :  { %498 = vst.msk [vmem:[#allocation2 + $0x10] sm:$0x3] %vm496_vm9, %v495_v21   ;;  %v3289_v18 = vld [vmem:[%s6059_s0 + $0x105] sm:$0x2]   ;;  %v3298_v35 = vld [vmem:[%s6059_s0 + $0x92] sm:$0x4]  }
  0xa1   :  { %500 = vst.msk [vmem:[#allocation2 + $0x56] sm:$0xc] %vm496_vm9, %v495_v21   ;;  %v3234_v21 = vld [vmem:[%s6059_s0 + $0xa2] sm:$0x4]   ;;  %vm663_vm9 = vcmask 933704  }
  0xa2   :  { %226 = vst.msk [vmem:[#allocation2 + $0x30] sm:$0x3] %vm224_vm10, %v4589_v51   ;;  %v1429_v30 = vsel %vm10_vm1, %v3234_v21, %v1425_v20  ;;  %v3268_v20 = vld [vmem:[%s6059_s0 + $0x23] sm:$0x1]   ;;  %v3290_v27 = vld [vmem:[%s6059_s0 + $0x84] sm:$0x4]  }
  0xa3   :  { %1392 = vrot.lane.b32.xlu0 %v1391_v39, %s3713_s27  ;;  %228 = vst.msk [vmem:[#allocation2 + $0x76] sm:$0xc] %vm224_vm10, %v4589_v51   ;;  %v1412_v51 = vsel %vm14_vm2, %v3231_v42, %v1408_v41  ;;  %v1433_v38 = vsel %vm14_vm2, %v3235_v31, %v1429_v30  ;;  %v1592_v41 = vsel %vm6_vm0, %v3265_v11, %v3264_v33  ;;  %v3266_v42 = vld [vmem:[%s6059_s0 + $0xda] sm:$0x4]   ;;  %vm705_vm10 = vcmask 917304   ;;  %s3733_s27 = smov 56  }
  0xa4   :  { %477 = vst.msk [vmem:[#allocation2 + $0x30] sm:$0x3] %vm475_vm11, %v474_v40   ;;  %1413 = vrot.lane.b32.xlu1 %v1412_v51, %s3714_s7  ;;  %v1596_v50 = vsel %vm10_vm1, %v3266_v42, %v1592_v41  ;;  %v3267_v51 = vld [vmem:[%s6059_s0 + $0x1d9] sm:$0x8]   ;;  %v3269_v21 = vld [vmem:[%s6059_s0 + $0x122] sm:$0x2]  }
  0xa5   :  { %479 = vst.msk [vmem:[#allocation2 + $0x76] sm:$0xc] %vm475_vm11, %v474_v40   ;;  %v516_v55 = vpop.permute.xlu0 %515   ;;  %1309 = vrot.lane.b32.xlu2 %v1308_v54, %s3715_s10  ;;  %v537_v1 = vpop.permute.xlu1 %536   ;;  %v1575_v40 = vsel %vm10_vm1, %v3262_v28, %v1571_v32  ;;  %vm747_vm11 = vcmask 900904   ;;  %v1600_v60 = vsel %vm14_vm2, %v3267_v51, %v1596_v50  ;;  %v1613_v28 = vsel %vm6_vm0, %v3269_v21, %v3268_v20  ;;  %v3296_v30 = vld [vmem:[%s6059_s0 + $0x14] sm:$0x1]   ;;  %s3743_s7 = smov 40  }
  0xa6   :  { %310 = vst.msk [vmem:[#allocation2 + $0x80] sm:$0x3] %vm308_vm12, %v4730_v46   ;;  %v1579_v48 = vsel %vm14_vm2, %v3263_v37, %v1575_v40  ;;  %v3297_v31 = vld [vmem:[%s6059_s0 + $0x113] sm:$0x2]   ;;  %v3300_v40 = vld [vmem:[%s6059_s0 + $0x5b] sm:$0x1]  }
  0xa7   :  { %312 = vst.msk [vmem:[#allocation2 + $0x36] sm:$0xc] %vm308_vm12, %v4730_v46   ;;  %v3248_v46 = vld [vmem:[%s6059_s0 + $0x40] sm:$0x1]   ;;  %v620_v5 = vpop.permute.xlu2 %619   ;;  %vm726_vm12 = vcmask 909104   ;;  %s3753_s10 = smov 30  }
  0xa8   :  { %519 = vst.msk [vmem:[#allocation2 + $0x80] sm:$0x3] %vm517_vm13, %v516_v55   ;;  %v1509_v8 = vsel %vm6_vm0, %v3249_v63, %v3248_v46  ;;  %v3301_v41 = vld [vmem:[%s6059_s0 + $0x15a] sm:$0x2]   ;;  %v3313_v2 = vld [vmem:[%s6059_s0 + $0x1af] sm:$0x2]  }
  0xa9   :  { %521 = vst.msk [vmem:[#allocation2 + $0x36] sm:$0xc] %vm517_vm13, %v516_v55   ;;  %v1513_v16 = vsel %vm10_vm1, %v3250_v4, %v1509_v8  ;;  %v3247_v55 = vld [vmem:[%s6059_s0 + $0x1f6] sm:$0x8]   ;;  %v1550_v4 = vsel %vm6_vm0, %v3257_v62, %v3256_v61  ;;  %vm768_vm13 = vcmask 892704   ;;  %v1780_v50 = vsel %vm6_vm0, %v3301_v41, %v3300_v40 }
  0xaa   :  { %561 = vst.msk [vmem:[#allocation2 + $0x40] sm:$0x3] %vm559_vm14, %v558_v44   ;;  %v1517_v24 = vsel %vm14_vm2, %v3251_v17, %v1513_v16  ;;  %v1697_v16 = vsel %vm6_vm0, %v3285_v7, %v3284_v6  ;;  %v3288_v17 = vld [vmem:[%s6059_s0 + $0x6] sm:$0x1]   ;;  %v3302_v51 = vld [vmem:[%s6059_s0 + $0xd9] sm:$0x4]  }
  0xab   :  { %1455 = vrot.lane.b32.xlu0 %v1454_v0, %s3716_s25  ;;  %563 = vst.msk [vmem:[#allocation2 + $0x86] sm:$0xc] %vm559_vm14, %v558_v44   ;;  %v3246_v44 = vld [vmem:[%s6059_s0 + $0xf7] sm:$0x4]   ;;  %v1638_v0 = vsel %vm10_vm1, %v3274_v52, %v1634_v57  ;;  %vm809_vm14 = vcmask 876304   ;;  %v1718_v26 = vsel %vm6_vm0, %v3289_v18, %v3288_v17  ;;  %v1784_v59 = vsel %vm10_vm1, %v3302_v51, %v1780_v50  ;;  %s3736_s25 = smov 53  }
  0xac   :  { %352 = vst.msk [vmem:[#allocation2 + $0x60] sm:$0x3] %vm350_vm15, %v4753_v56   ;;  %1476 = vrot.lane.b32.xlu1 %v1475_v12, %s3717_s5  ;;  %v1492_v54 = vsel %vm10_vm1, %v3246_v44, %v1488_v43  ;;  %v3279_v12 = vld [vmem:[%s6059_s0 + $0x12e] sm:$0x8]   ;;  %v1722_v11 = vsel %vm10_vm1, %v3290_v27, %v1718_v26  ;;  %v3280_v43 = vld [vmem:[%s6059_s0 + $0x78] sm:$0x1]  }
  0xad   :  { %354 = vst.msk [vmem:[#allocation2 + $0x16] sm:$0xc] %vm350_vm15, %v4753_v56   ;;  %v579_v56 = vpop.permute.xlu0 %578   ;;  %1371 = vrot.lane.b32.xlu2 %v1370_v15, %s3718_s8  ;;  %v600_v25 = vpop.permute.xlu1 %599   ;;  %v1496_v46 = vsel %vm14_vm2, %v3247_v55, %v1492_v54  ;;  %v1663_v19 = vsel %vm14_vm2, %v3279_v12, %v1659_v10  ;;  %vm789_vm15 = vcmask 884504   ;;  %v3281_v44 = vld [vmem:[%s6059_s0 + $0x177] sm:$0x2]   ;;  %s3746_s5 = smov 37  }
  0xae   :  { %540 = vst.msk [vmem:[#allocation2 + $0x60] sm:$0x3] %vm538_vm4, %v537_v1   ;;  %v1676_v52 = vsel %vm6_vm0, %v3281_v44, %v3280_v43  ;;  %v3308_v54 = vld [vmem:[%s6059_s0 + $0xe9] sm:$0x1]   ;;  %v3314_v12 = vld [vmem:[%s6059_s0 + $0x2e] sm:$0x4]  }
  0xaf   :  { %542 = vst.msk [vmem:[#allocation2 + $0x16] sm:$0xc] %vm538_vm4, %v537_v1   ;;  %v683_v29 = vpop.permute.xlu2 %682   ;;  %v3275_v1 = vld [vmem:[%s6059_s0 + $0x167] sm:$0x8]   ;;  %vm830_vm4 = vcmask 868104   ;;  %s3756_s8 = smov 27  }
  0xb0   :  { %582 = vst.msk [vmem:[#allocation2 + $0x20] sm:$0x3] %vm580_vm5, %v579_v56   ;;  %v1642_v8 = vsel %vm14_vm2, %v3275_v1, %v1638_v0  ;;  %v3309_v55 = vld [vmem:[%s6059_s0 + $0x1e8] sm:$0x2]   ;;  %v3312_v1 = vld [vmem:[%s6059_s0 + $0xb0] sm:$0x1]  }
  0xb1   :  { %584 = vst.msk [vmem:[#allocation2 + $0x66] sm:$0xc] %vm580_vm5, %v579_v56   ;;  %v3259_v56 = vld [vmem:[%s6059_s0 + $0x1cb] sm:$0x8]   ;;  %vm872_vm5 = vcmask 851704   ;;  %v1822_v0 = vsel %vm6_vm0, %v3309_v55, %v3308_v54  ;;  %v1843_v10 = vsel %vm6_vm0, %v3313_v2, %v3312_v1 }
  0xb2   :  { %623 = vst.msk [vmem:[#allocation2 + $0x28] sm:$0x3] %vm621_vm3, %v620_v5   ;;  %v3310_v61 = vld [vmem:[%s6059_s0 + $0x67] sm:$0x4]   ;;  %v1847_v18 = vsel %vm10_vm1, %v3314_v12, %v1843_v10  ;;  %v3322_v20 = vld [vmem:[%s6059_s0 + $0xbc] sm:$0x4]  }
  0xb3   :  { %1518 = vrot.lane.b32.xlu0 %v1517_v24, %s3719_s23  ;;  %625 = vst.msk [vmem:[#allocation2 + $0x6e] sm:$0xc] %vm621_vm3, %v620_v5   ;;  %v3258_v5 = vld [vmem:[%s6059_s0 + $0xcc] sm:$0x4]   ;;  %v1701_v24 = vsel %vm10_vm1, %v3286_v13, %v1697_v16  ;;  %vm851_vm3 = vcmask 859904   ;;  %s3739_s23 = smov 50  }
  0xb4   :  { %602 = vst.msk [vmem:[#allocation2] sm:$0x3] %vm601_vm6, %v600_v25   ;;  %1539 = vrot.lane.b32.xlu1 %v1538_v34, %s3720_s3  ;;  %v1554_v15 = vsel %vm10_vm1, %v3258_v5, %v1550_v4  ;;  %v3291_v34 = vld [vmem:[%s6059_s0 + $0x183] sm:$0x8]   ;;  %v3292_v4 = vld [vmem:[%s6059_s0 + $0x4d] sm:$0x1]  }
  0xb5   :  { %604 = vst.msk [vmem:[#allocation2 + $0x46] sm:$0xc] %vm601_vm6, %v600_v25   ;;  %v641_v39 = vpop.permute.xlu0 %640   ;;  %1434 = vrot.lane.b32.xlu2 %v1433_v38, %s3721_s6  ;;  %v662_v49 = vpop.permute.xlu1 %661   ;;  %v1558_v22 = vsel %vm14_vm2, %v3259_v56, %v1554_v15  ;;  %v3287_v25 = vld [vmem:[%s6059_s0 + $0x1bc] sm:$0x8]   ;;  %v3271_v38 = vld [vmem:[%s6059_s0 + $0x1a0] sm:$0x8]   ;;  %v1726_v42 = vsel %vm14_vm2, %v3291_v34, %v1722_v11 }
  0xb6   :  { %644 = vst.msk [vmem:[#allocation2 + $0x8] sm:$0x3] %vm642_vm7, %v641_v39   ;;  %v1705_v32 = vsel %vm14_vm2, %v3287_v25, %v1701_v24  ;;  %vm893_vm6 = vcmask 843504   ;;  %v3293_v5 = vld [vmem:[%s6059_s0 + $0x14c] sm:$0x2]   ;;  %s3749_s3 = smov 34  }
  0xb7   :  { %646 = vst.msk [vmem:[#allocation2 + $0x4e] sm:$0xc] %vm642_vm7, %v641_v39   ;;  %v746_v53 = vpop.permute.xlu2 %745   ;;  %v1759_v39 = vsel %vm6_vm0, %v3297_v31, %v3296_v30  ;;  %vm935_vm7 = vcmask 827104   ;;  %v1738_v13 = vsel %vm6_vm0, %v3293_v5, %v3292_v4  ;;  %v3320_v15 = vld [vmem:[%s6059_s0 + $0x3e] sm:$0x1]   ;;  %s3759_s6 = smov 24  }
  0xb8   :  { %686 = vst.msk [vmem:[#allocation2 + $0x10] sm:$0x3] %vm684_vm8, %v683_v29   ;;  %v3321_v56 = vld [vmem:[%s6059_s0 + $0x13d] sm:$0x2]   ;;  %v3324_v25 = vld [vmem:[%s6059_s0 + $0x5] sm:$0x1]  }
  0xb9   :  { %688 = vst.msk [vmem:[#allocation2 + $0x56] sm:$0xc] %vm684_vm8, %v683_v29   ;;  %v3270_v29 = vld [vmem:[%s6059_s0 + $0xa1] sm:$0x4]   ;;  %vm914_vm8 = vcmask 835304   ;;  %v1885_v24 = vsel %vm6_vm0, %v3321_v56, %v3320_v15 }
  0xba   :  { %665 = vst.msk [vmem:[#allocation2 + $0x30] sm:$0x3] %vm663_vm9, %v662_v49   ;;  %v1617_v37 = vsel %vm10_vm1, %v3270_v29, %v1613_v28  ;;  %v3325_v26 = vld [vmem:[%s6059_s0 + $0x104] sm:$0x2]   ;;  %v3304_v28 = vld [vmem:[%s6059_s0 + $0x22] sm:$0x1]  }
  0xbb   :  { %1580 = vrot.lane.b32.xlu0 %v1579_v48, %s3722_s21  ;;  %667 = vst.msk [vmem:[#allocation2 + $0x76] sm:$0xc] %vm663_vm9, %v662_v49   ;;  %v1621_v45 = vsel %vm14_vm2, %v3271_v38, %v1617_v37  ;;  %v1763_v48 = vsel %vm10_vm1, %v3298_v35, %v1759_v39  ;;  %v3299_v49 = vld [vmem:[%s6059_s0 + $0x191] sm:$0x8]   ;;  %vm956_vm9 = vcmask 818904   ;;  %v1906_v11 = vsel %vm6_vm0, %v3325_v26, %v3324_v25  ;;  %s3742_s21 = smov 47  }
  0xbc   :  { %749 = vst.msk [vmem:[#allocation2 + $0x40] sm:$0x3] %vm747_vm11, %v746_v53   ;;  %1601 = vrot.lane.b32.xlu1 %v1600_v60, %s3723_s30  ;;  %v1767_v57 = vsel %vm14_vm2, %v3299_v49, %v1763_v48  ;;  %v3303_v60 = vld [vmem:[%s6059_s0 + $0x1d8] sm:$0x8]   ;;  %v3305_v29 = vld [vmem:[%s6059_s0 + $0x121] sm:$0x2]  }
  0xbd   :  { %v704_v63 = vpop.permute.xlu0 %703   ;;  %751 = vst.msk [vmem:[#allocation2 + $0x86] sm:$0xc] %vm747_vm11, %v746_v53   ;;  %1497 = vrot.lane.b32.xlu2 %v1496_v46, %s3724_s4  ;;  %v725_v9 = vpop.permute.xlu1 %724   ;;  %v3282_v53 = vld [vmem:[%s6059_s0 + $0xf6] sm:$0x4]   ;;  %v1788_v3 = vsel %vm14_vm2, %v3303_v60, %v1784_v59  ;;  %v3326_v34 = vld [vmem:[%s6059_s0 + $0x83] sm:$0x4]   ;;  %v1801_v35 = vsel %vm6_vm0, %v3305_v29, %v3304_v28 }
  0xbe   :  { %707 = vst.msk [vmem:[#allocation2 + $0x80] sm:$0x3] %vm705_vm10, %v704_v63   ;;  %v1680_v46 = vsel %vm10_vm1, %v3282_v53, %v1676_v52  ;;  %vm977_vm11 = vcmask 810704   ;;  %v3332_v37 = vld [vmem:[%s6059_s0 + $0x13] sm:$0x1]   ;;  %v1910_v41 = vsel %vm10_vm1, %v3326_v34, %v1906_v11  ;;  %s3752_s30 = smov 31  }
  0xbf   :  { %709 = vst.msk [vmem:[#allocation2 + $0x36] sm:$0xc] %vm705_vm10, %v704_v63   ;;  %v808_v14 = vpop.permute.xlu2 %807   ;;  %v3283_v63 = vld [vmem:[%s6059_s0 + $0x1f5] sm:$0x8]   ;;  %vm997_vm10 = vcmask 802504   ;;  %s3762_s4 = smov 21  }
  0xc0   :  { %728 = vst.msk [vmem:[#allocation2 + $0x60] sm:$0x3] %vm726_vm12, %v725_v9   ;;  %v1684_v6 = vsel %vm14_vm2, %v3283_v63, %v1680_v46  ;;  %v3333_v38 = vld [vmem:[%s6059_s0 + $0x112] sm:$0x2]   ;;  %v3336_v49 = vld [vmem:[%s6059_s0 + $0x5a] sm:$0x1]  }
  0xc1   :  { %730 = vst.msk [vmem:[#allocation2 + $0x16] sm:$0xc] %vm726_vm12, %v725_v9   ;;  %v3311_v9 = vld [vmem:[%s6059_s0 + $0x166] sm:$0x8]   ;;  %vm1018_vm12 = vcmask 794304   ;;  %v1947_v48 = vsel %vm6_vm0, %v3333_v38, %v3332_v37 }
  0xc2   :  { %811 = vst.msk [vmem:[#allocation2 + $0x28] sm:$0x3] %vm809_vm14, %v808_v14   ;;  %v3334_v43 = vld [vmem:[%s6059_s0 + $0x91] sm:$0x4]   ;;  %v3337_v50 = vld [vmem:[%s6059_s0 + $0x159] sm:$0x2]  }
  0xc3   :  { %1643 = vrot.lane.b32.xlu0 %v1642_v8, %s3725_s19  ;;  %813 = vst.msk [vmem:[#allocation2 + $0x6e] sm:$0xc] %vm809_vm14, %v808_v14   ;;  %v1826_v8 = vsel %vm10_vm1, %v3310_v61, %v1822_v0  ;;  %v3294_v14 = vld [vmem:[%s6059_s0 + $0xcb] sm:$0x4]   ;;  %v3316_v52 = vld [vmem:[%s6059_s0 + $0x77] sm:$0x1]   ;;  %v1968_v59 = vsel %vm6_vm0, %v3337_v50, %v3336_v49 }
  0xc4   :  { %1664 = vrot.lane.b32.xlu1 %v1663_v19, %s3726_s28  ;;  %v1830_v16 = vsel %vm14_vm2, %v3311_v9, %v1826_v8  ;;  %v3315_v19 = vld [vmem:[%s6059_s0 + $0x12d] sm:$0x8]   ;;  %v3317_v53 = vld [vmem:[%s6059_s0 + $0x176] sm:$0x2]   ;;  %v3338_v60 = vld [vmem:[%s6059_s0 + $0xd8] sm:$0x4]  }
  0xc5   :  { %v767_v23 = vpop.permute.xlu0 %766   ;;  %1559 = vrot.lane.b32.xlu2 %v1558_v22, %s3727_s2  ;;  %v788_v33 = vpop.permute.xlu1 %787   ;;  %v1742_v22 = vsel %vm10_vm1, %v3294_v14, %v1738_v13  ;;  %v1851_v27 = vsel %vm14_vm2, %v3315_v19, %v1847_v18  ;;  %vm1039_vm14 = vcmask 786104   ;;  %v1864_v61 = vsel %vm6_vm0, %v3317_v53, %v3316_v52  ;;  %v3344_v46 = vld [vmem:[%s6059_s0 + $0xe8] sm:$0x1]   ;;  %v3348_v9 = vld [vmem:[%s6059_s0 + $0xaf] sm:$0x1]   ;;  %s3745_s19 = smov 44  }
  0xc6   :  { %770 = vst.msk [vmem:[#allocation2 + $0x20] sm:$0x3] %vm768_vm13, %v767_v23   ;;  %v3345_v63 = vld [vmem:[%s6059_s0 + $0x1e7] sm:$0x2]   ;;  %v1972_v2 = vsel %vm10_vm1, %v3338_v60, %v1968_v59  ;;  %v3349_v10 = vld [vmem:[%s6059_s0 + $0x1ae] sm:$0x2]  }
  0xc7   :  { %772 = vst.msk [vmem:[#allocation2 + $0x66] sm:$0xc] %vm768_vm13, %v767_v23   ;;  %v871_v36 = vpop.permute.xlu2 %870   ;;  %v3295_v23 = vld [vmem:[%s6059_s0 + $0x1ca] sm:$0x8]   ;;  %vm1060_vm13 = vcmask 777904   ;;  %v2010_v8 = vsel %vm6_vm0, %v3345_v63, %v3344_v46  ;;  %v2031_v18 = vsel %vm6_vm0, %v3349_v10, %v3348_v9  ;;  %s3755_s28 = smov 28  }
  0xc8   :  { %790 = vst.msk [vmem:[#allocation2] sm:$0x3] %vm789_vm15, %v788_v33   ;;  %v1746_v30 = vsel %vm14_vm2, %v3295_v23, %v1742_v22  ;;  %v3346_v4 = vld [vmem:[%s6059_s0 + $0x66] sm:$0x4]   ;;  %v3328_v13 = vld [vmem:[%s6059_s0 + $0x4c] sm:$0x1]  }
  0xc9   :  { %792 = vst.msk [vmem:[#allocation2 + $0x46] sm:$0xc] %vm789_vm15, %v788_v33   ;;  %v3323_v33 = vld [vmem:[%s6059_s0 + $0x1bb] sm:$0x8]   ;;  %vm1081_vm15 = vcmask 769704   ;;  %s3765_s2 = smov 18  }
  0xca   :  { %874 = vst.msk [vmem:[#allocation2 + $0x10] sm:$0x3] %vm872_vm5, %v871_v36   ;;  %v3329_v14 = vld [vmem:[%s6059_s0 + $0x14b] sm:$0x2]   ;;  %v3350_v19 = vld [vmem:[%s6059_s0 + $0x2d] sm:$0x4]  }
  0xcb   :  { %1706 = vrot.lane.b32.xlu0 %v1705_v32, %s3728_s17  ;;  %876 = vst.msk [vmem:[#allocation2 + $0x56] sm:$0xc] %vm872_vm5, %v871_v36   ;;  %v1889_v32 = vsel %vm10_vm1, %v3322_v20, %v1885_v24  ;;  %v3306_v36 = vld [vmem:[%s6059_s0 + $0xa0] sm:$0x4]   ;;  %vm1102_vm5 = vcmask 761504   ;;  %v1926_v20 = vsel %vm6_vm0, %v3329_v14, %v3328_v13  ;;  %v2035_v26 = vsel %vm10_vm1, %v3350_v19, %v2031_v18  ;;  %s3748_s17 = smov 41  }
  0xcc   :  { %1727 = vrot.lane.b32.xlu1 %v1726_v42, %s3729_s26  ;;  %v1893_v39 = vsel %vm14_vm2, %v3323_v33, %v1889_v32  ;;  %v3327_v42 = vld [vmem:[%s6059_s0 + $0x182] sm:$0x8]   ;;  %v3356_v22 = vld [vmem:[%s6059_s0 + $0x3d] sm:$0x1]   ;;  %v3360_v33 = vld [vmem:[%s6059_s0 + $0x4] sm:$0x1]  }
  0xcd   :  { %v829_v47 = vpop.permute.xlu0 %828   ;;  %1622 = vrot.lane.b32.xlu2 %v1621_v45, %s3730_s29  ;;  %v850_v58 = vpop.permute.xlu1 %849   ;;  %v1805_v45 = vsel %vm10_vm1, %v3306_v36, %v1801_v35  ;;  %v1914_v51 = vsel %vm14_vm2, %v3327_v42, %v1910_v41  ;;  %v3357_v23 = vld [vmem:[%s6059_s0 + $0x13c] sm:$0x2]   ;;  %v3361_v11 = vld [vmem:[%s6059_s0 + $0x103] sm:$0x2]   ;;  %v3340_v35 = vld [vmem:[%s6059_s0 + $0x21] sm:$0x1]  }
  0xce   :  { %832 = vst.msk [vmem:[#allocation2 + $0x8] sm:$0x3] %vm830_vm4, %v829_v47   ;;  %v3358_v28 = vld [vmem:[%s6059_s0 + $0xbb] sm:$0x4]   ;;  %v2073_v32 = vsel %vm6_vm0, %v3357_v23, %v3356_v22  ;;  %v3341_v36 = vld [vmem:[%s6059_s0 + $0x120] sm:$0x2]   ;;  %v2094_v41 = vsel %vm6_vm0, %v3361_v11, %v3360_v33 }
  0xcf   :  { %834 = vst.msk [vmem:[#allocation2 + $0x4e] sm:$0xc] %vm830_vm4, %v829_v47   ;;  %v934_v62 = vpop.permute.xlu2 %933   ;;  %v3307_v47 = vld [vmem:[%s6059_s0 + $0x19f] sm:$0x8]   ;;  %vm1123_vm4 = vcmask 753304   ;;  %s3758_s26 = smov 25  }
  0xd0   :  { %853 = vst.msk [vmem:[#allocation2 + $0x30] sm:$0x3] %vm851_vm3, %v850_v58   ;;  %v1809_v54 = vsel %vm14_vm2, %v3307_v47, %v1805_v45  ;;  %v3362_v42 = vld [vmem:[%s6059_s0 + $0x82] sm:$0x4]   ;;  %v3368_v45 = vld [vmem:[%s6059_s0 + $0x12] sm:$0x1]  }
  0xd1   :  { %855 = vst.msk [vmem:[#allocation2 + $0x76] sm:$0xc] %vm851_vm3, %v850_v58   ;;  %v3335_v58 = vld [vmem:[%s6059_s0 + $0x190] sm:$0x8]   ;;  %vm1144_vm3 = vcmask 745104   ;;  %v2098_v50 = vsel %vm10_vm1, %v3362_v42, %v2094_v41  ;;  %s3768_s29 = smov 15  }
  0xd2   :  { %937 = vst.msk [vmem:[#allocation2 + $0x40] sm:$0x3] %vm935_vm7, %v934_v62   ;;  %v3369_v47 = vld [vmem:[%s6059_s0 + $0x111] sm:$0x2]   ;;  %v3373_v59 = vld [vmem:[%s6059_s0 + $0x158] sm:$0x2]  }
  0xd3   :  { %1768 = vrot.lane.b32.xlu0 %v1767_v57, %s3731_s15  ;;  %939 = vst.msk [vmem:[#allocation2 + $0x86] sm:$0xc] %vm935_vm7, %v934_v62   ;;  %v1951_v57 = vsel %vm10_vm1, %v3334_v43, %v1947_v48  ;;  %v3318_v62 = vld [vmem:[%s6059_s0 + $0xf5] sm:$0x4]   ;;  %vm1165_vm7 = vcmask 736904   ;;  %v1989_v43 = vsel %vm6_vm0, %v3341_v36, %v3340_v35  ;;  %s3751_s15 = smov 38  }
  0xd4   :  { %1789 = vrot.lane.b32.xlu1 %v1788_v3, %s3732_s24  ;;  %v1955_v0 = vsel %vm14_vm2, %v3335_v58, %v1951_v57  ;;  %v3339_v3 = vld [vmem:[%s6059_s0 + $0x1d7] sm:$0x8]   ;;  %v3370_v52 = vld [vmem:[%s6059_s0 + $0x90] sm:$0x4]   ;;  %v2135_v57 = vsel %vm6_vm0, %v3369_v47, %v3368_v45  ;;  %v3372_v58 = vld [vmem:[%s6059_s0 + $0x59] sm:$0x1]  }
  0xd5   :  { %v892_v7 = vpop.permute.xlu0 %891   ;;  %1685 = vrot.lane.b32.xlu2 %v1684_v6, %s3733_s27  ;;  %v913_v17 = vpop.permute.xlu1 %912   ;;  %v1868_v6 = vsel %vm10_vm1, %v3318_v62, %v1864_v61  ;;  %v1976_v12 = vsel %vm14_vm2, %v3339_v3, %v1972_v2  ;;  %v3352_v61 = vld [vmem:[%s6059_s0 + $0x76] sm:$0x1]   ;;  %v2156_v2 = vsel %vm6_vm0, %v3373_v59, %v3372_v58  ;;  %v3374_v3 = vld [vmem:[%s6059_s0 + $0xd7] sm:$0x4]   ;;  %v3382_v13 = vld [vmem:[%s6059_s0 + $0x65] sm:$0x4]  }
  0xd6   :  { %895 = vst.msk [vmem:[#allocation2 + $0x80] sm:$0x3] %vm893_vm6, %v892_v7   ;;  %v3353_v62 = vld [vmem:[%s6059_s0 + $0x175] sm:$0x2]   ;;  %v2160_v10 = vsel %vm10_vm1, %v3374_v3, %v2156_v2  ;;  %v3385_v18 = vld [vmem:[%s6059_s0 + $0x1ad] sm:$0x2]  }
  0xd7   :  { %897 = vst.msk [vmem:[#allocation2 + $0x36] sm:$0xc] %vm893_vm6, %v892_v7   ;;  %v996_v21 = vpop.permute.xlu2 %995   ;;  %v3319_v7 = vld [vmem:[%s6059_s0 + $0x1f4] sm:$0x8]   ;;  %vm1185_vm6 = vcmask 728704   ;;  %s3761_s24 = smov 22  }
  0xd8   :  { %916 = vst.msk [vmem:[#allocation2 + $0x60] sm:$0x3] %vm914_vm8, %v913_v17   ;;  %v1872_v15 = vsel %vm14_vm2, %v3319_v7, %v1868_v6  ;;  %v3380_v6 = vld [vmem:[%s6059_s0 + $0xe7] sm:$0x1]   ;;  %v3394_v35 = vld [vmem:[%s6059_s0 + $0xba] sm:$0x4]  }
  0xd9   :  { %918 = vst.msk [vmem:[#allocation2 + $0x16] sm:$0xc] %vm914_vm8, %v913_v17   ;;  %v3347_v17 = vld [vmem:[%s6059_s0 + $0x165] sm:$0x8]   ;;  %vm1206_vm8 = vcmask 720504   ;;  %s3771_s27 = smov 12  }
  0xda   :  { %999 = vst.msk [vmem:[#allocation2 + $0x28] sm:$0x3] %vm997_vm10, %v996_v21   ;;  %v3381_v7 = vld [vmem:[%s6059_s0 + $0x1e6] sm:$0x2]   ;;  %v3397_v41 = vld [vmem:[%s6059_s0 + $0x102] sm:$0x2]  }
  0xdb   :  { %1831 = vrot.lane.b32.xlu0 %v1830_v16, %s3734_s13  ;;  %1001 = vst.msk [vmem:[#allocation2 + $0x6e] sm:$0xc] %vm997_vm10, %v996_v21   ;;  %v2014_v16 = vsel %vm10_vm1, %v3346_v4, %v2010_v8  ;;  %v3330_v21 = vld [vmem:[%s6059_s0 + $0xca] sm:$0x4]   ;;  %vm1227_vm10 = vcmask 712304   ;;  %v2052_v4 = vsel %vm6_vm0, %v3353_v62, %v3352_v61  ;;  %s3754_s13 = smov 35  }
  0xdc   :  { %1852 = vrot.lane.b32.xlu1 %v1851_v27, %s3735_s22  ;;  %v2018_v24 = vsel %vm14_vm2, %v3347_v17, %v2014_v16  ;;  %v3351_v27 = vld [vmem:[%s6059_s0 + $0x12c] sm:$0x8]   ;;  %v2198_v16 = vsel %vm6_vm0, %v3381_v7, %v3380_v6  ;;  %v3384_v17 = vld [vmem:[%s6059_s0 + $0xae] sm:$0x1]   ;;  %v3406_v61 = vld [vmem:[%s6059_s0 + $0x8f] sm:$0x4]  }
  0xdd   :  { %v955_v31 = vpop.permute.xlu0 %954   ;;  %1747 = vrot.lane.b32.xlu2 %v1746_v30, %s3736_s25  ;;  %v976_v40 = vpop.permute.xlu1 %975   ;;  %v1930_v30 = vsel %vm10_vm1, %v3330_v21, %v1926_v20  ;;  %v2039_v34 = vsel %vm14_vm2, %v3351_v27, %v2035_v26  ;;  %v3364_v20 = vld [vmem:[%s6059_s0 + $0x4b] sm:$0x1]   ;;  %v2219_v26 = vsel %vm6_vm0, %v3385_v18, %v3384_v17  ;;  %v3386_v27 = vld [vmem:[%s6059_s0 + $0x2c] sm:$0x4]   ;;  %v3409_v2 = vld [vmem:[%s6059_s0 + $0x157] sm:$0x2]  }
  0xde   :  { %958 = vst.msk [vmem:[#allocation2 + $0x20] sm:$0x3] %vm956_vm9, %v955_v31   ;;  %v3365_v21 = vld [vmem:[%s6059_s0 + $0x14a] sm:$0x2]   ;;  %v2223_v11 = vsel %vm10_vm1, %v3386_v27, %v2219_v26  ;;  %v3421_v26 = vld [vmem:[%s6059_s0 + $0x1ac] sm:$0x2]  }
  0xdf   :  { %960 = vst.msk [vmem:[#allocation2 + $0x66] sm:$0xc] %vm956_vm9, %v955_v31   ;;  %v1059_v44 = vpop.permute.xlu2 %1058   ;;  %v3331_v31 = vld [vmem:[%s6059_s0 + $0x1c9] sm:$0x8]   ;;  %vm1248_vm9 = vcmask 704104   ;;  %s3764_s22 = smov 19  }
  0xe0   :  { %978 = vst.msk [vmem:[#allocation2] sm:$0x3] %vm977_vm11, %v976_v40   ;;  %v1934_v37 = vsel %vm14_vm2, %v3331_v31, %v1930_v30  ;;  %v3392_v30 = vld [vmem:[%s6059_s0 + $0x3c] sm:$0x1]   ;;  %s3774_s25 = smov 9  }
  0xe1   :  { %980 = vst.msk [vmem:[#allocation2 + $0x46] sm:$0xc] %vm977_vm11, %v976_v40   ;;  %v3359_v40 = vld [vmem:[%s6059_s0 + $0x1ba] sm:$0x8]   ;;  %vm1269_vm11 = vcmask 695904  }
  0xe2   :  { %1062 = vst.msk [vmem:[#allocation2 + $0x10] sm:$0x3] %vm1060_vm13, %v1059_v44   ;;  %v3393_v31 = vld [vmem:[%s6059_s0 + $0x13b] sm:$0x2]  }
  0xe3   :  { %1894 = vrot.lane.b32.xlu0 %v1893_v39, %s3737_s11  ;;  %1064 = vst.msk [vmem:[#allocation2 + $0x56] sm:$0xc] %vm1060_vm13, %v1059_v44   ;;  %v2077_v39 = vsel %vm10_vm1, %v3358_v28, %v2073_v32  ;;  %v3342_v44 = vld [vmem:[%s6059_s0 + $0x9f] sm:$0x4]   ;;  %vm1290_vm13 = vcmask 687704   ;;  %v2114_v28 = vsel %vm6_vm0, %v3365_v21, %v3364_v20  ;;  %s3757_s11 = smov 32  }
  0xe4   :  { %1915 = vrot.lane.b32.xlu1 %v1914_v51, %s3738_s20  ;;  %v2081_v48 = vsel %vm14_vm2, %v3359_v40, %v2077_v39  ;;  %v3363_v51 = vld [vmem:[%s6059_s0 + $0x181] sm:$0x8]   ;;  %v2261_v39 = vsel %vm6_vm0, %v3393_v31, %v3392_v30  ;;  %v3396_v40 = vld [vmem:[%s6059_s0 + $0x3] sm:$0x1]   ;;  %v3418_v20 = vld [vmem:[%s6059_s0 + $0x64] sm:$0x4]  }
  0xe5   :  { %v1017_v55 = vpop.permute.xlu0 %1016   ;;  %1810 = vrot.lane.b32.xlu2 %v1809_v54, %s3739_s23  ;;  %v1038_v1 = vpop.permute.xlu1 %1037   ;;  %v1993_v54 = vsel %vm10_vm1, %v3342_v44, %v1989_v43  ;;  %v2102_v60 = vsel %vm14_vm2, %v3363_v51, %v2098_v50  ;;  %v3376_v43 = vld [vmem:[%s6059_s0 + $0x20] sm:$0x1]   ;;  %v2282_v50 = vsel %vm6_vm0, %v3397_v41, %v3396_v40  ;;  %v3398_v51 = vld [vmem:[%s6059_s0 + $0x81] sm:$0x4]   ;;  %s3767_s20 = smov 16   ;;  %s3777_s23 = smov 6  }
  0xe6   :  { %1020 = vst.msk [vmem:[#allocation2 + $0x8] sm:$0x3] %vm1018_vm12, %v1017_v55   ;;  %v3377_v44 = vld [vmem:[%s6059_s0 + $0x11f] sm:$0x2]   ;;  %v2286_v59 = vsel %vm10_vm1, %v3398_v51, %v2282_v50  ;;  %v3433_v50 = vld [vmem:[%s6059_s0 + $0x101] sm:$0x2]  }
  0xe7   :  { %1022 = vst.msk [vmem:[#allocation2 + $0x4e] sm:$0xc] %vm1018_vm12, %v1017_v55   ;;  %v1122_v5 = vpop.permute.xlu2 %1121   ;;  %v3343_v55 = vld [vmem:[%s6059_s0 + $0x19e] sm:$0x8]   ;;  %vm1311_vm12 = vcmask 679504  }
  0xe8   :  { %1041 = vst.msk [vmem:[#allocation2 + $0x30] sm:$0x3] %vm1039_vm14, %v1038_v1   ;;  %v1997_v46 = vsel %vm14_vm2, %v3343_v55, %v1993_v54  ;;  %v3404_v54 = vld [vmem:[%s6059_s0 + $0x11] sm:$0x1]  }
  0xe9   :  { %1043 = vst.msk [vmem:[#allocation2 + $0x76] sm:$0xc] %vm1039_vm14, %v1038_v1   ;;  %v3371_v1 = vld [vmem:[%s6059_s0 + $0x18f] sm:$0x8]   ;;  %vm1332_vm14 = vcmask 671304  }
  0xea   :  { %1125 = vst.msk [vmem:[#allocation2 + $0x40] sm:$0x3] %vm1123_vm4, %v1122_v5   ;;  %v3405_v55 = vld [vmem:[%s6059_s0 + $0x110] sm:$0x2]  }
  0xeb   :  { %1956 = vrot.lane.b32.xlu0 %v1955_v0, %s3740_s9  ;;  %1127 = vst.msk [vmem:[#allocation2 + $0x86] sm:$0xc] %vm1123_vm4, %v1122_v5   ;;  %v2139_v0 = vsel %vm10_vm1, %v3370_v52, %v2135_v57  ;;  %v3354_v5 = vld [vmem:[%s6059_s0 + $0xf4] sm:$0x4]   ;;  %vm1353_vm4 = vcmask 663104   ;;  %v2177_v52 = vsel %vm6_vm0, %v3377_v44, %v3376_v43  ;;  %s3760_s9 = smov 29  }
  0xec   :  { %1977 = vrot.lane.b32.xlu1 %v1976_v12, %s3741_s18  ;;  %v2143_v8 = vsel %vm14_vm2, %v3371_v1, %v2139_v0  ;;  %v3375_v12 = vld [vmem:[%s6059_s0 + $0x1d6] sm:$0x8]   ;;  %v2323_v0 = vsel %vm6_vm0, %v3405_v55, %v3404_v54  ;;  %v3408_v1 = vld [vmem:[%s6059_s0 + $0x58] sm:$0x1]   ;;  %v3430_v43 = vld [vmem:[%s6059_s0 + $0xb9] sm:$0x4]  }
  0xed   :  { %v1080_v56 = vpop.permute.xlu0 %1079   ;;  %1873 = vrot.lane.b32.xlu2 %v1872_v15, %s3742_s21  ;;  %v1101_v25 = vpop.permute.xlu1 %1100   ;;  %v2056_v15 = vsel %vm10_vm1, %v3354_v5, %v2052_v4  ;;  %v2164_v19 = vsel %vm14_vm2, %v3375_v12, %v2160_v10  ;;  %v3388_v4 = vld [vmem:[%s6059_s0 + $0x75] sm:$0x1]   ;;  %v2344_v10 = vsel %vm6_vm0, %v3409_v2, %v3408_v1  ;;  %v3410_v12 = vld [vmem:[%s6059_s0 + $0xd6] sm:$0x4]   ;;  %s3770_s18 = smov 13   ;;  %s3782_s21 = smov 1  }
  0xee   :  { %1083 = vst.msk [vmem:[#allocation2 + $0x80] sm:$0x3] %vm1081_vm15, %v1080_v56   ;;  %v3389_v5 = vld [vmem:[%s6059_s0 + $0x174] sm:$0x2]   ;;  %v2348_v18 = vsel %vm10_vm1, %v3410_v12, %v2344_v10  ;;  %v3445_v10 = vld [vmem:[%s6059_s0 + $0x156] sm:$0x2]  }
  0xef   :  { %1085 = vst.msk [vmem:[#allocation2 + $0x36] sm:$0xc] %vm1081_vm15, %v1080_v56   ;;  %v1184_v29 = vpop.permute.xlu2 %1183   ;;  %v3355_v56 = vld [vmem:[%s6059_s0 + $0x1f3] sm:$0x8]   ;;  %vm1373_vm15 = vcmask 654904  }
  0xf0   :  { %1104 = vst.msk [vmem:[#allocation2 + $0x60] sm:$0x3] %vm1102_vm5, %v1101_v25   ;;  %v2060_v22 = vsel %vm14_vm2, %v3355_v56, %v2056_v15  ;;  %v3416_v15 = vld [vmem:[%s6059_s0 + $0xe6] sm:$0x1]  }
  0xf1   :  { %1106 = vst.msk [vmem:[#allocation2 + $0x16] sm:$0xc] %vm1102_vm5, %v1101_v25   ;;  %v3383_v25 = vld [vmem:[%s6059_s0 + $0x164] sm:$0x8]   ;;  %vm1394_vm5 = vcmask 646704  }
  0xf2   :  { %1187 = vst.msk [vmem:[#allocation2 + $0x28] sm:$0x3] %vm1185_vm6, %v1184_v29   ;;  %v3417_v56 = vld [vmem:[%s6059_s0 + $0x1e5] sm:$0x2]  }
  0xf3   :  { %2019 = vrot.lane.b32.xlu0 %v2018_v24, %s3743_s7  ;;  %1189 = vst.msk [vmem:[#allocation2 + $0x6e] sm:$0xc] %vm1185_vm6, %v1184_v29   ;;  %v2202_v24 = vsel %vm10_vm1, %v3382_v13, %v2198_v16  ;;  %v3366_v29 = vld [vmem:[%s6059_s0 + $0xc9] sm:$0x4]   ;;  %vm1415_vm6 = vcmask 638504   ;;  %v2240_v13 = vsel %vm6_vm0, %v3389_v5, %v3388_v4  ;;  %s3763_s7 = smov 26  }
  0xf4   :  { %2040 = vrot.lane.b32.xlu1 %v2039_v34, %s3744_s16  ;;  %v2206_v32 = vsel %vm14_vm2, %v3383_v25, %v2202_v24  ;;  %v3387_v34 = vld [vmem:[%s6059_s0 + $0x12b] sm:$0x8]   ;;  %v2386_v24 = vsel %vm6_vm0, %v3417_v56, %v3416_v15  ;;  %v3420_v25 = vld [vmem:[%s6059_s0 + $0xad] sm:$0x1]   ;;  %v3442_v4 = vld [vmem:[%s6059_s0 + $0x8e] sm:$0x4]  }
  0xf5   :  { %v1143_v38 = vpop.permute.xlu0 %1142   ;;  %1935 = vrot.lane.b32.xlu2 %v1934_v37, %s3745_s19  ;;  %v1164_v49 = vpop.permute.xlu1 %1163   ;;  %v2118_v37 = vsel %vm10_vm1, %v3366_v29, %v2114_v28  ;;  %v2227_v42 = vsel %vm14_vm2, %v3387_v34, %v2223_v11  ;;  %v3400_v28 = vld [vmem:[%s6059_s0 + $0x4a] sm:$0x1]   ;;  %v2407_v11 = vsel %vm6_vm0, %v3421_v26, %v3420_v25  ;;  %v3422_v34 = vld [vmem:[%s6059_s0 + $0x2b] sm:$0x4]   ;;  %s3773_s16 = smov 10  }
  0xf6   :  { %1146 = vst.msk [vmem:[#allocation2 + $0x20] sm:$0x3] %vm1144_vm3, %v1143_v38   ;;  %v3401_v29 = vld [vmem:[%s6059_s0 + $0x149] sm:$0x2]   ;;  %v2411_v41 = vsel %vm10_vm1, %v3422_v34, %v2407_v11  ;;  %v3457_v11 = vld [vmem:[%s6059_s0 + $0x1ab] sm:$0x2]  }
  0xf7   :  { %1148 = vst.msk [vmem:[#allocation2 + $0x66] sm:$0xc] %vm1144_vm3, %v1143_v38   ;;  %v1247_v53 = vpop.permute.xlu2 %1246   ;;  %v3367_v38 = vld [vmem:[%s6059_s0 + $0x1c8] sm:$0x8]   ;;  %vm1436_vm3 = vcmask 630304  }
  0xf8   :  { %1166 = vst.msk [vmem:[#allocation2] sm:$0x3] %vm1165_vm7, %v1164_v49   ;;  %v2122_v45 = vsel %vm14_vm2, %v3367_v38, %v2118_v37  ;;  %v3428_v37 = vld [vmem:[%s6059_s0 + $0x3b] sm:$0x1]  }
  0xf9   :  { %1168 = vst.msk [vmem:[#allocation2 + $0x46] sm:$0xc] %vm1165_vm7, %v1164_v49   ;;  %v3395_v49 = vld [vmem:[%s6059_s0 + $0x1b9] sm:$0x8]   ;;  %vm1457_vm7 = vcmask 622104  }
  0xfa   :  { %1250 = vst.msk [vmem:[#allocation2 + $0x10] sm:$0x3] %vm1248_vm9, %v1247_v53   ;;  %v3429_v38 = vld [vmem:[%s6059_s0 + $0x13a] sm:$0x2]  }
  0xfb   :  { %2082 = vrot.lane.b32.xlu0 %v2081_v48, %s3746_s5  ;;  %1252 = vst.msk [vmem:[#allocation2 + $0x56] sm:$0xc] %vm1248_vm9, %v1247_v53   ;;  %v2265_v48 = vsel %vm10_vm1, %v3394_v35, %v2261_v39  ;;  %v3378_v53 = vld [vmem:[%s6059_s0 + $0x9e] sm:$0x4]   ;;  %vm1478_vm9 = vcmask 613904   ;;  %v2302_v35 = vsel %vm6_vm0, %v3401_v29, %v3400_v28  ;;  %s3766_s5 = smov 23  }
  0xfc   :  { %2103 = vrot.lane.b32.xlu1 %v2102_v60, %s3747_s14  ;;  %v2269_v57 = vsel %vm14_vm2, %v3395_v49, %v2265_v48  ;;  %v3399_v60 = vld [vmem:[%s6059_s0 + $0x180] sm:$0x8]   ;;  %v2449_v48 = vsel %vm6_vm0, %v3429_v38, %v3428_v37  ;;  %v3432_v49 = vld [vmem:[%s6059_s0 + $0x2] sm:$0x1]   ;;  %v3454_v28 = vld [vmem:[%s6059_s0 + $0x63] sm:$0x4]  }
  0xfd   :  { %v1205_v63 = vpop.permute.xlu0 %1204   ;;  %1998 = vrot.lane.b32.xlu2 %v1997_v46, %s3748_s17  ;;  %v1226_v9 = vpop.permute.xlu1 %1225   ;;  %v2181_v46 = vsel %vm10_vm1, %v3378_v53, %v2177_v52  ;;  %v2290_v3 = vsel %vm14_vm2, %v3399_v60, %v2286_v59  ;;  %v3412_v52 = vld [vmem:[%s6059_s0 + $0x1f] sm:$0x1]   ;;  %v2470_v59 = vsel %vm6_vm0, %v3433_v50, %v3432_v49  ;;  %v3434_v60 = vld [vmem:[%s6059_s0 + $0x80] sm:$0x4]   ;;  %s3776_s14 = smov 7  }
  0xfe   :  { %1208 = vst.msk [vmem:[#allocation2 + $0x8] sm:$0x3] %vm1206_vm8, %v1205_v63   ;;  %v3413_v53 = vld [vmem:[%s6059_s0 + $0x11e] sm:$0x2]   ;;  %v2474_v2 = vsel %vm10_vm1, %v3434_v60, %v2470_v59  ;;  %v3469_v59 = vld [vmem:[%s6059_s0 + $0x100] sm:$0x2]  }
  0xff   :  { %1210 = vst.msk [vmem:[#allocation2 + $0x4e] sm:$0xc] %vm1206_vm8, %v1205_v63   ;;  %v1310_v14 = vpop.permute.xlu2 %1309   ;;  %v3379_v63 = vld [vmem:[%s6059_s0 + $0x19d] sm:$0x8]   ;;  %vm1499_vm8 = vcmask 605704  }
 0x100   :  { %1229 = vst.msk [vmem:[#allocation2 + $0x30] sm:$0x3] %vm1227_vm10, %v1226_v9   ;;  %v2185_v6 = vsel %vm14_vm2, %v3379_v63, %v2181_v46  ;;  %v3440_v46 = vld [vmem:[%s6059_s0 + $0x10] sm:$0x1]  }
 0x101   :  { %1231 = vst.msk [vmem:[#allocation2 + $0x76] sm:$0xc] %vm1227_vm10, %v1226_v9   ;;  %v3407_v9 = vld [vmem:[%s6059_s0 + $0x18e] sm:$0x8]   ;;  %vm1520_vm10 = vcmask 597504  }
 0x102   :  { %1313 = vst.msk [vmem:[#allocation2 + $0x40] sm:$0x3] %vm1311_vm12, %v1310_v14   ;;  %v3441_v63 = vld [vmem:[%s6059_s0 + $0x10f] sm:$0x2]  }
 0x103   :  { %2144 = vrot.lane.b32.xlu0 %v2143_v8, %s3749_s3  ;;  %1315 = vst.msk [vmem:[#allocation2 + $0x86] sm:$0xc] %vm1311_vm12, %v1310_v14   ;;  %v2327_v8 = vsel %vm10_vm1, %v3406_v61, %v2323_v0  ;;  %v3390_v14 = vld [vmem:[%s6059_s0 + $0xf3] sm:$0x4]   ;;  %vm1541_vm12 = vcmask 589304   ;;  %v2365_v61 = vsel %vm6_vm0, %v3413_v53, %v3412_v52  ;;  %s3769_s3 = smov 20  }
 0x104   :  { %2165 = vrot.lane.b32.xlu1 %v2164_v19, %s3750_s12  ;;  %v2331_v16 = vsel %vm14_vm2, %v3407_v9, %v2327_v8  ;;  %v3411_v19 = vld [vmem:[%s6059_s0 + $0x1d5] sm:$0x8]   ;;  %v2511_v8 = vsel %vm6_vm0, %v3441_v63, %v3440_v46  ;;  %v3444_v9 = vld [vmem:[%s6059_s0 + $0x57] sm:$0x1]   ;;  %v3466_v52 = vld [vmem:[%s6059_s0 + $0xb8] sm:$0x4]  }
 0x105   :  { %v1268_v23 = vpop.permute.xlu0 %1267   ;;  %2061 = vrot.lane.b32.xlu2 %v2060_v22, %s3751_s15  ;;  %v1289_v33 = vpop.permute.xlu1 %1288   ;;  %v2244_v22 = vsel %vm10_vm1, %v3390_v14, %v2240_v13  ;;  %v2352_v27 = vsel %vm14_vm2, %v3411_v19, %v2348_v18  ;;  %v3424_v13 = vld [vmem:[%s6059_s0 + $0x74] sm:$0x1]   ;;  %v2532_v18 = vsel %vm6_vm0, %v3445_v10, %v3444_v9  ;;  %v3446_v19 = vld [vmem:[%s6059_s0 + $0xd5] sm:$0x4]   ;;  %s3780_s15 = smov 3  }
 0x106   :  { %1271 = vst.msk [vmem:[#allocation2 + $0x80] sm:$0x3] %vm1269_vm11, %v1268_v23   ;;  %v3425_v14 = vld [vmem:[%s6059_s0 + $0x173] sm:$0x2]   ;;  %v2536_v26 = vsel %vm10_vm1, %v3446_v19, %v2532_v18  ;;  %v3481_v18 = vld [vmem:[%s6059_s0 + $0x155] sm:$0x2]  }
 0x107   :  { %1273 = vst.msk [vmem:[#allocation2 + $0x36] sm:$0xc] %vm1269_vm11, %v1268_v23   ;;  %v1372_v36 = vpop.permute.xlu2 %1371   ;;  %v3391_v23 = vld [vmem:[%s6059_s0 + $0x1f2] sm:$0x8]   ;;  %vm1561_vm11 = vcmask 581104  }
 0x108   :  { %1292 = vst.msk [vmem:[#allocation2 + $0x60] sm:$0x3] %vm1290_vm13, %v1289_v33   ;;  %v2248_v30 = vsel %vm14_vm2, %v3391_v23, %v2244_v22  ;;  %v3452_v22 = vld [vmem:[%s6059_s0 + $0xe5] sm:$0x1]  }
 0x109   :  { %1294 = vst.msk [vmem:[#allocation2 + $0x16] sm:$0xc] %vm1290_vm13, %v1289_v33   ;;  %v3419_v33 = vld [vmem:[%s6059_s0 + $0x163] sm:$0x8]   ;;  %vm1582_vm13 = vcmask 572904  }
 0x10a   :  { %1375 = vst.msk [vmem:[#allocation2 + $0x28] sm:$0x3] %vm1373_vm15, %v1372_v36   ;;  %v3453_v23 = vld [vmem:[%s6059_s0 + $0x1e4] sm:$0x2]  }
 0x10b   :  { %2207 = vrot.lane.b32.xlu0 %v2206_v32, %s3752_s30  ;;  %1377 = vst.msk [vmem:[#allocation2 + $0x6e] sm:$0xc] %vm1373_vm15, %v1372_v36   ;;  %v2390_v32 = vsel %vm10_vm1, %v3418_v20, %v2386_v24  ;;  %v3402_v36 = vld [vmem:[%s6059_s0 + $0xc8] sm:$0x4]   ;;  %vm1603_vm15 = vcmask 564704   ;;  %v2428_v20 = vsel %vm6_vm0, %v3425_v14, %v3424_v13  ;;  %s3772_s30 = smov 17  }
 0x10c   :  { %2228 = vrot.lane.b32.xlu1 %v2227_v42, %s3753_s10  ;;  %v2394_v39 = vsel %vm14_vm2, %v3419_v33, %v2390_v32  ;;  %v3423_v42 = vld [vmem:[%s6059_s0 + $0x12a] sm:$0x8]   ;;  %v2574_v32 = vsel %vm6_vm0, %v3453_v23, %v3452_v22  ;;  %v3456_v33 = vld [vmem:[%s6059_s0 + $0xac] sm:$0x1]   ;;  %v3478_v13 = vld [vmem:[%s6059_s0 + $0x8d] sm:$0x4]  }
 0x10d   :  { %v1331_v47 = vpop.permute.xlu0 %1330   ;;  %2123 = vrot.lane.b32.xlu2 %v2122_v45, %s3754_s13  ;;  %v1352_v58 = vpop.permute.xlu1 %1351   ;;  %v2306_v45 = vsel %vm10_vm1, %v3402_v36, %v2302_v35  ;;  %v2415_v51 = vsel %vm14_vm2, %v3423_v42, %v2411_v41  ;;  %v3436_v35 = vld [vmem:[%s6059_s0 + $0x49] sm:$0x1]   ;;  %v2595_v41 = vsel %vm6_vm0, %v3457_v11, %v3456_v33  ;;  %v3458_v42 = vld [vmem:[%s6059_s0 + $0x2a] sm:$0x4]  }
 0x10e   :  { %1334 = vst.msk [vmem:[#allocation2 + $0x20] sm:$0x3] %vm1332_vm14, %v1331_v47   ;;  %v3437_v36 = vld [vmem:[%s6059_s0 + $0x148] sm:$0x2]   ;;  %v2599_v50 = vsel %vm10_vm1, %v3458_v42, %v2595_v41  ;;  %v3493_v41 = vld [vmem:[%s6059_s0 + $0x1aa] sm:$0x2]  }
 0x10f   :  { %1336 = vst.msk [vmem:[#allocation2 + $0x66] sm:$0xc] %vm1332_vm14, %v1331_v47   ;;  %v1435_v62 = vpop.permute.xlu2 %1434   ;;  %v3403_v47 = vld [vmem:[%s6059_s0 + $0x1c7] sm:$0x8]   ;;  %vm1624_vm14 = vcmask 556504  }
 0x110   :  { %1354 = vst.msk [vmem:[#allocation2] sm:$0x3] %vm1353_vm4, %v1352_v58   ;;  %v2310_v54 = vsel %vm14_vm2, %v3403_v47, %v2306_v45  ;;  %v3464_v45 = vld [vmem:[%s6059_s0 + $0x3a] sm:$0x1]  }
 0x111   :  { %1356 = vst.msk [vmem:[#allocation2 + $0x46] sm:$0xc] %vm1353_vm4, %v1352_v58   ;;  %v3431_v58 = vld [vmem:[%s6059_s0 + $0x1b8] sm:$0x8]   ;;  %vm1645_vm4 = vcmask 548304  }
 0x112   :  { %1438 = vst.msk [vmem:[#allocation2 + $0x10] sm:$0x3] %vm1436_vm3, %v1435_v62   ;;  %v3465_v47 = vld [vmem:[%s6059_s0 + $0x139] sm:$0x2]  }
 0x113   :  { %2270 = vrot.lane.b32.xlu0 %v2269_v57, %s3755_s28  ;;  %1440 = vst.msk [vmem:[#allocation2 + $0x56] sm:$0xc] %vm1436_vm3, %v1435_v62   ;;  %v2453_v57 = vsel %vm10_vm1, %v3430_v43, %v2449_v48  ;;  %v3414_v62 = vld [vmem:[%s6059_s0 + $0x9d] sm:$0x4]   ;;  %vm1666_vm3 = vcmask 540104   ;;  %v2490_v43 = vsel %vm6_vm0, %v3437_v36, %v3436_v35  ;;  %s3775_s28 = smov 14  }
 0x114   :  { %2291 = vrot.lane.b32.xlu1 %v2290_v3, %s3756_s8  ;;  %v2457_v0 = vsel %vm14_vm2, %v3431_v58, %v2453_v57  ;;  %v3435_v3 = vld [vmem:[%s6059_s0 + $0x17f] sm:$0x8]   ;;  %v2637_v57 = vsel %vm6_vm0, %v3465_v47, %v3464_v45  ;;  %v3468_v58 = vld [vmem:[%s6059_s0 + $0x1] sm:$0x1]   ;;  %v3490_v35 = vld [vmem:[%s6059_s0 + $0x62] sm:$0x4]  }
 0x115   :  { %v1393_v7 = vpop.permute.xlu0 %1392   ;;  %2186 = vrot.lane.b32.xlu2 %v2185_v6, %s3757_s11  ;;  %v2369_v6 = vsel %vm10_vm1, %v3414_v62, %v2365_v61  ;;  %v2478_v12 = vsel %vm14_vm2, %v3435_v3, %v2474_v2  ;;  %v3448_v61 = vld [vmem:[%s6059_s0 + $0x1e] sm:$0x1]   ;;  %v2658_v2 = vsel %vm6_vm0, %v3469_v59, %v3468_v58  ;;  %v3470_v3 = vld [vmem:[%s6059_s0 + $0x7f] sm:$0x4]   ;;  %s3779_s8 = smov 4  }
 0x116   :  { %1396 = vst.msk [vmem:[#allocation2 + $0x8] sm:$0x3] %vm1394_vm5, %v1393_v7   ;;  %v1414_v17 = vpop.permute.xlu1 %1413   ;;  %v3449_v62 = vld [vmem:[%s6059_s0 + $0x11d] sm:$0x2]   ;;  %v2662_v10 = vsel %vm10_vm1, %v3470_v3, %v2658_v2  ;;  %v3484_v2 = vld [vmem:[%s6059_s0 + $0x1d] sm:$0x1]  }
 0x117   :  { %1398 = vst.msk [vmem:[#allocation2 + $0x4e] sm:$0xc] %vm1394_vm5, %v1393_v7   ;;  %v1498_v21 = vpop.permute.xlu2 %1497   ;;  %v3415_v7 = vld [vmem:[%s6059_s0 + $0x19c] sm:$0x8]   ;;  %vm1687_vm5 = vcmask 531904  }
 0x118   :  { %1417 = vst.msk [vmem:[#allocation2 + $0x30] sm:$0x3] %vm1415_vm6, %v1414_v17   ;;  %v2373_v15 = vsel %vm14_vm2, %v3415_v7, %v2369_v6  ;;  %v3476_v6 = vld [vmem:[%s6059_s0 + $0xf] sm:$0x1]   ;;  %v3485_v3 = vld [vmem:[%s6059_s0 + $0x11c] sm:$0x2]  }
 0x119   :  { %1419 = vst.msk [vmem:[#allocation2 + $0x76] sm:$0xc] %vm1415_vm6, %v1414_v17   ;;  %v3443_v17 = vld [vmem:[%s6059_s0 + $0x18d] sm:$0x8]   ;;  %vm1708_vm6 = vcmask 523704  }
 0x11a   :  { %1501 = vst.msk [vmem:[#allocation2 + $0x40] sm:$0x3] %vm1499_vm8, %v1498_v21   ;;  %v3477_v7 = vld [vmem:[%s6059_s0 + $0x10e] sm:$0x2]  }
 0x11b   :  { %2332 = vrot.lane.b32.xlu0 %v2331_v16, %s3758_s26  ;;  %1503 = vst.msk [vmem:[#allocation2 + $0x86] sm:$0xc] %vm1499_vm8, %v1498_v21   ;;  %v2515_v16 = vsel %vm10_vm1, %v3442_v4, %v2511_v8  ;;  %v3426_v21 = vld [vmem:[%s6059_s0 + $0xf2] sm:$0x4]   ;;  %vm1729_vm8 = vcmask 515504   ;;  %v2553_v4 = vsel %vm6_vm0, %v3449_v62, %v3448_v61  ;;  %s3778_s26 = smov 11  }
 0x11c   :  { %2353 = vrot.lane.b32.xlu1 %v2352_v27, %s3759_s6  ;;  %v2519_v24 = vsel %vm14_vm2, %v3443_v17, %v2515_v16  ;;  %v3447_v27 = vld [vmem:[%s6059_s0 + $0x1d4] sm:$0x8]   ;;  %v2699_v16 = vsel %vm6_vm0, %v3477_v7, %v3476_v6  ;;  %v3480_v17 = vld [vmem:[%s6059_s0 + $0x56] sm:$0x1]   ;;  %v3503_v7 = vld [vmem:[%s6059_s0 + $0x1b6] sm:$0x8]  }
 0x11d   :  { %v1456_v31 = vpop.permute.xlu0 %1455   ;;  %2249 = vrot.lane.b32.xlu2 %v2248_v30, %s3760_s9  ;;  %v2432_v30 = vsel %vm10_vm1, %v3426_v21, %v2428_v20  ;;  %v2540_v34 = vsel %vm14_vm2, %v3447_v27, %v2536_v26  ;;  %v3460_v20 = vld [vmem:[%s6059_s0 + $0x73] sm:$0x1]   ;;  %v2720_v26 = vsel %vm6_vm0, %v3481_v18, %v3480_v17  ;;  %v3482_v27 = vld [vmem:[%s6059_s0 + $0xd4] sm:$0x4]  }
 0x11e   :  { %1459 = vst.msk [vmem:[#allocation2 + $0x80] sm:$0x3] %vm1457_vm7, %v1456_v31   ;;  %v1477_v40 = vpop.permute.xlu1 %1476   ;;  %v3461_v21 = vld [vmem:[%s6059_s0 + $0x172] sm:$0x2]   ;;  %v2724_v11 = vsel %vm10_vm1, %v3482_v27, %v2720_v26 }
 0x11f   :  { %1461 = vst.msk [vmem:[#allocation2 + $0x36] sm:$0xc] %vm1457_vm7, %v1456_v31   ;;  %v1560_v44 = vpop.permute.xlu2 %1559   ;;  %v3427_v31 = vld [vmem:[%s6059_s0 + $0x1f1] sm:$0x8]   ;;  %vm1749_vm7 = vcmask 507304  }
 0x120   :  { %1480 = vst.msk [vmem:[#allocation2 + $0x60] sm:$0x3] %vm1478_vm9, %v1477_v40   ;;  %v2436_v37 = vsel %vm14_vm2, %v3427_v31, %v2432_v30  ;;  %v3488_v30 = vld [vmem:[%s6059_s0 + $0xe4] sm:$0x1]  }
 0x121   :  { %1482 = vst.msk [vmem:[#allocation2 + $0x16] sm:$0xc] %vm1478_vm9, %v1477_v40   ;;  %v3455_v40 = vld [vmem:[%s6059_s0 + $0x162] sm:$0x8]   ;;  %vm1770_vm9 = vcmask 499104  }
 0x122   :  { %1563 = vst.msk [vmem:[#allocation2 + $0x28] sm:$0x3] %vm1561_vm11, %v1560_v44   ;;  %v3489_v31 = vld [vmem:[%s6059_s0 + $0x1e3] sm:$0x2]  }
 0x123   :  { %2395 = vrot.lane.b32.xlu0 %v2394_v39, %s3761_s24  ;;  %1565 = vst.msk [vmem:[#allocation2 + $0x6e] sm:$0xc] %vm1561_vm11, %v1560_v44   ;;  %v2578_v39 = vsel %vm10_vm1, %v3454_v28, %v2574_v32  ;;  %v3438_v44 = vld [vmem:[%s6059_s0 + $0xc7] sm:$0x4]   ;;  %vm1791_vm11 = vcmask 490904   ;;  %v2616_v28 = vsel %vm6_vm0, %v3461_v21, %v3460_v20 }
 0x124   :  { %2416 = vrot.lane.b32.xlu1 %v2415_v51, %s3762_s4  ;;  %v2582_v48 = vsel %vm14_vm2, %v3455_v40, %v2578_v39  ;;  %v3459_v51 = vld [vmem:[%s6059_s0 + $0x129] sm:$0x8]   ;;  %v2762_v39 = vsel %vm6_vm0, %v3489_v31, %v3488_v30  ;;  %v3492_v40 = vld [vmem:[%s6059_s0 + $0xab] sm:$0x1]   ;;  %v3498_v20 = vld [vmem:[%s6059_s0 + $0xf0] sm:$0x4]  }
 0x125   :  { %v1519_v55 = vpop.permute.xlu0 %1518   ;;  %2311 = vrot.lane.b32.xlu2 %v2310_v54, %s3763_s7  ;;  %v2494_v54 = vsel %vm10_vm1, %v3438_v44, %v2490_v43  ;;  %v2603_v60 = vsel %vm14_vm2, %v3459_v51, %v2599_v50  ;;  %v3472_v43 = vld [vmem:[%s6059_s0 + $0x48] sm:$0x1]   ;;  %v2783_v50 = vsel %vm6_vm0, %v3493_v41, %v3492_v40  ;;  %v3494_v51 = vld [vmem:[%s6059_s0 + $0x29] sm:$0x4]  }
 0x126   :  { %1522 = vst.msk [vmem:[#allocation2 + $0x20] sm:$0x3] %vm1520_vm10, %v1519_v55   ;;  %v1540_v1 = vpop.permute.xlu1 %1539   ;;  %v3473_v44 = vld [vmem:[%s6059_s0 + $0x147] sm:$0x2]   ;;  %v2787_v59 = vsel %vm10_vm1, %v3494_v51, %v2783_v50 }
 0x127   :  { %1524 = vst.msk [vmem:[#allocation2 + $0x66] sm:$0xc] %vm1520_vm10, %v1519_v55   ;;  %v1623_v5 = vpop.permute.xlu2 %1622   ;;  %v3439_v55 = vld [vmem:[%s6059_s0 + $0x1c6] sm:$0x8]   ;;  %vm1812_vm10 = vcmask 482704  }
 0x128   :  { %1542 = vst.msk [vmem:[#allocation2] sm:$0x3] %vm1541_vm12, %v1540_v1   ;;  %v2498_v46 = vsel %vm14_vm2, %v3439_v55, %v2494_v54  ;;  %v3500_v54 = vld [vmem:[%s6059_s0 + $0x39] sm:$0x1]  }
 0x129   :  { %1544 = vst.msk [vmem:[#allocation2 + $0x46] sm:$0xc] %vm1541_vm12, %v1540_v1   ;;  %v3467_v1 = vld [vmem:[%s6059_s0 + $0x1b7] sm:$0x8]   ;;  %vm1833_vm12 = vcmask 474504  }
 0x12a   :  { %1626 = vst.msk [vmem:[#allocation2 + $0x10] sm:$0x3] %vm1624_vm14, %v1623_v5   ;;  %v3501_v55 = vld [vmem:[%s6059_s0 + $0x138] sm:$0x2]  }
 0x12b   :  { %2458 = vrot.lane.b32.xlu0 %v2457_v0, %s3764_s22  ;;  %1628 = vst.msk [vmem:[#allocation2 + $0x56] sm:$0xc] %vm1624_vm14, %v1623_v5   ;;  %v2641_v0 = vsel %vm10_vm1, %v3466_v52, %v2637_v57  ;;  %v3450_v5 = vld [vmem:[%s6059_s0 + $0x9c] sm:$0x4]   ;;  %vm1854_vm14 = vcmask 466304   ;;  %v2678_v52 = vsel %vm6_vm0, %v3473_v44, %v3472_v43 }
 0x12c   :  { %2479 = vrot.lane.b32.xlu1 %v2478_v12, %s3765_s2  ;;  %v2645_v8 = vsel %vm14_vm2, %v3467_v1, %v2641_v0  ;;  %v3471_v12 = vld [vmem:[%s6059_s0 + $0x17e] sm:$0x8]   ;;  %v3502_v0 = vld [vmem:[%s6059_s0 + $0xb7] sm:$0x4]   ;;  %s3785_s2 = smov [#allocation0]  }
 0x12d   :  { %v1581_v56 = vpop.permute.xlu0 %1580   ;;  %2374 = vrot.lane.b32.xlu2 %v2373_v15, %s3766_s5  ;;  %v2557_v15 = vsel %vm10_vm1, %v3450_v5, %v2553_v4  ;;  %v2666_v19 = vsel %vm14_vm2, %v3471_v12, %v2662_v10 }
 0x12e   :  { %1584 = vst.msk [vmem:[#allocation2 + $0x8] sm:$0x3] %vm1582_vm13, %v1581_v56   ;;  %v1602_v25 = vpop.permute.xlu1 %1601  }
 0x12f   :  { %1586 = vst.msk [vmem:[#allocation2 + $0x4e] sm:$0xc] %vm1582_vm13, %v1581_v56   ;;  %v1686_v29 = vpop.permute.xlu2 %1685   ;;  %v3451_v56 = vld [vmem:[%s6059_s0 + $0x19b] sm:$0x8]   ;;  %vm1875_vm13 = vcmask 458104  }
 0x130   :  { %1605 = vst.msk [vmem:[#allocation2 + $0x30] sm:$0x3] %vm1603_vm15, %v1602_v25   ;;  %v2561_v22 = vsel %vm14_vm2, %v3451_v56, %v2557_v15  ;;  %v3487_v15 = vld [vmem:[%s6059_s0 + $0x19a] sm:$0x8]   ;;  %v3496_v56 = vld [vmem:[%s6059_s0 + $0x72] sm:$0x1]  }
 0x131   :  { %1607 = vst.msk [vmem:[#allocation2 + $0x76] sm:$0xc] %vm1603_vm15, %v1602_v25   ;;  %v3479_v25 = vld [vmem:[%s6059_s0 + $0x18c] sm:$0x8]   ;;  %vm1937_vm15 = vcmask 433504  }
 0x132   :  { %1689 = vst.msk [vmem:[#allocation2 + $0x40] sm:$0x3] %vm1687_vm5, %v1686_v29  }
 0x133   :  { %2520 = vrot.lane.b32.xlu0 %v2519_v24, %s3767_s20  ;;  %1691 = vst.msk [vmem:[#allocation2 + $0x86] sm:$0xc] %vm1687_vm5, %v1686_v29   ;;  %v2703_v24 = vsel %vm10_vm1, %v3478_v13, %v2699_v16  ;;  %v3462_v29 = vld [vmem:[%s6059_s0 + $0xf1] sm:$0x4]   ;;  %vm1917_vm5 = vcmask 441704  }
 0x134   :  { %2541 = vrot.lane.b32.xlu1 %v2540_v34, %s3768_s29  ;;  %v2707_v32 = vsel %vm14_vm2, %v3479_v25, %v2703_v24  ;;  %v3483_v34 = vld [vmem:[%s6059_s0 + $0x1d3] sm:$0x8]   ;;  %v3497_v16 = vld [vmem:[%s6059_s0 + $0x171] sm:$0x2]  }
 0x135   :  { %v1644_v38 = vpop.permute.xlu0 %1643   ;;  %2437 = vrot.lane.b32.xlu2 %v2436_v37, %s3769_s3  ;;  %v2620_v37 = vsel %vm10_vm1, %v3462_v29, %v2616_v28  ;;  %v2728_v42 = vsel %vm14_vm2, %v3483_v34, %v2724_v11  ;;  %v3499_v24 = vld [vmem:[%s6059_s0 + $0x1ef] sm:$0x8]   ;;  %s2952_s3 = sshll.u32 %s3785_s2, 4  ;;  %s2953_s3 = int_to_ptr.vmem [resolvable:$true] %s2952_s3 }
 0x136   :  { %1647 = vst.msk [vmem:[#allocation2 + $0x80] sm:$0x3] %vm1645_vm4, %v1644_v38   ;;  %v1665_v49 = vpop.permute.xlu1 %1664  }
 0x137   :  { %1649 = vst.msk [vmem:[#allocation2 + $0x36] sm:$0xc] %vm1645_vm4, %v1644_v38   ;;  %v1748_v53 = vpop.permute.xlu2 %1747   ;;  %v3463_v38 = vld [vmem:[%s6059_s0 + $0x1f0] sm:$0x8]   ;;  %vm1896_vm4 = vcmask 449904  }
 0x138   :  { %1668 = vst.msk [vmem:[#allocation2 + $0x60] sm:$0x3] %vm1666_vm3, %v1665_v49   ;;  %v2624_v45 = vsel %vm14_vm2, %v3463_v38, %v2620_v37 }
 0x139   :  { %1670 = vst.msk [vmem:[#allocation2 + $0x16] sm:$0xc] %vm1666_vm3, %v1665_v49   ;;  %v3491_v49 = vld [vmem:[%s6059_s0 + $0x161] sm:$0x8]   ;;  %vm2000_vm3 = vcmask 408904  }
 0x13a   :  { %1751 = vst.msk [vmem:[#allocation2 + $0x28] sm:$0x3] %vm1749_vm7, %v1748_v53  }
 0x13b   :  { %2583 = vrot.lane.b32.xlu0 %v2582_v48, %s3770_s18  ;;  %1753 = vst.msk [vmem:[#allocation2 + $0x6e] sm:$0xc] %vm1749_vm7, %v1748_v53   ;;  %v2766_v48 = vsel %vm10_vm1, %v3490_v35, %v2762_v39  ;;  %v3474_v53 = vld [vmem:[%s6059_s0 + $0xc6] sm:$0x4]   ;;  %s3781_s18 = smov 8   ;;  %vm1979_vm7 = vcmask 417104  }
 0x13c   :  { %2604 = vrot.lane.b32.xlu1 %v2603_v60, %s3771_s27  ;;  %v2770_v57 = vsel %vm14_vm2, %v3491_v49, %v2766_v48  ;;  %v3495_v60 = vld [vmem:[%s6059_s0 + $0x128] sm:$0x8]   ;;  %v2682_v62 = vsel %vm10_vm1, %v3474_v53, %v2678_v52 }
 0x13d   :  { %v1707_v63 = vpop.permute.xlu0 %1706   ;;  %2499 = vrot.lane.b32.xlu2 %v2498_v46, %s3772_s30  ;;  %v3475_v46 = vld [vmem:[%s6059_s0 + $0x1c5] sm:$0x8]   ;;  %v2791_v1 = vsel %vm14_vm2, %v3495_v60, %v2787_v59 }
 0x13e   :  { %1710 = vst.msk [vmem:[#allocation2 + $0x20] sm:$0x3] %vm1708_vm6, %v1707_v63   ;;  %v1728_v9 = vpop.permute.xlu1 %1727   ;;  %v2686_v4 = vsel %vm14_vm2, %v3475_v46, %v2682_v62 }
 0x13f   :  { %1712 = vst.msk [vmem:[#allocation2 + $0x66] sm:$0xc] %vm1708_vm6, %v1707_v63   ;;  %v1811_v14 = vpop.permute.xlu2 %1810   ;;  %v2825_v63 = vsel %vm6_vm0, %v3501_v55, %v3500_v54  ;;  %vm1958_vm6 = vcmask 425304  }
 0x140   :  { %1730 = vst.msk [vmem:[#allocation2] sm:$0x3] %vm1729_vm8, %v1728_v9   ;;  %v2829_v6 = vsel %vm10_vm1, %v3502_v0, %v2825_v63 }
 0x141   :  { %1732 = vst.msk [vmem:[#allocation2 + $0x46] sm:$0xc] %vm1729_vm8, %v1728_v9   ;;  %v3486_v9 = vld [vmem:[%s6059_s0 + $0x9b] sm:$0x4]   ;;  %v2833_v10 = vsel %vm14_vm2, %v3503_v7, %v2829_v6  ;;  %s3784_s0 = smov 2   ;;  %vm2125_vm8 = vcmask 359704  }
 0x142   :  { %1814 = vst.msk [vmem:[#allocation2 + $0x10] sm:$0x3] %vm1812_vm10, %v1811_v14  }
 0x143   :  { %2646 = vrot.lane.b32.xlu0 %v2645_v8, %s3773_s16  ;;  %1816 = vst.msk [vmem:[#allocation2 + $0x56] sm:$0xc] %vm1812_vm10, %v1811_v14   ;;  %v2741_v8 = vsel %vm6_vm0, %v3485_v3, %v3484_v2  ;;  %vm2105_vm10 = vcmask 367904  }
 0x144   :  { %2667 = vrot.lane.b32.xlu1 %v2666_v19, %s3774_s25  ;;  %v2745_v14 = vsel %vm10_vm1, %v3486_v9, %v2741_v8  ;;  %v2804_v19 = vsel %vm6_vm0, %v3497_v16, %v3496_v56  ;;  %vm2063_vm0 = vcmask 384304  }
 0x145   :  { %v1769_v23 = vpop.permute.xlu0 %1768   ;;  %2562 = vrot.lane.b32.xlu2 %v2561_v22, %s3775_s28  ;;  %v2749_v17 = vsel %vm14_vm2, %v3487_v15, %v2745_v14  ;;  %s3783_s28 = smov 5  }
 0x146   :  { %1772 = vst.msk [vmem:[#allocation2 + $0x8] sm:$0x3] %vm1770_vm9, %v1769_v23   ;;  %v1790_v33 = vpop.permute.xlu1 %1789  }
 0x147   :  { %1774 = vst.msk [vmem:[#allocation2 + $0x4e] sm:$0xc] %vm1770_vm9, %v1769_v23   ;;  %v1874_v36 = vpop.permute.xlu2 %1873   ;;  %v2808_v23 = vsel %vm10_vm1, %v3498_v20, %v2804_v19  ;;  %vm2021_vm1 = vcmask 400704   ;;  %vm2084_vm9 = vcmask 376104  }
 0x148   :  { %1793 = vst.msk [vmem:[#allocation2 + $0x30] sm:$0x3] %vm1791_vm11, %v1790_v33   ;;  %v2812_v25 = vsel %vm14_vm2, %v3499_v24, %v2808_v23  ;;  %vm2042_vm2 = vcmask 392504  }
 0x149   :  { %1795 = vst.msk [vmem:[#allocation2 + $0x76] sm:$0xc] %vm1791_vm11, %v1790_v33   ;;  %vm2188_vm11 = vcmask 335104  }
 0x14a   :  { %1877 = vst.msk [vmem:[#allocation2 + $0x40] sm:$0x3] %vm1875_vm13, %v1874_v36  }
 0x14b   :  { %2708 = vrot.lane.b32.xlu0 %v2707_v32, %s3776_s14  ;;  %1879 = vst.msk [vmem:[#allocation2 + $0x86] sm:$0xc] %vm1875_vm13, %v1874_v36   ;;  %vm2167_vm13 = vcmask 343304  }
 0x14c   :  { %2729 = vrot.lane.b32.xlu1 %v2728_v42, %s3777_s23 }
 0x14d   :  { %v1832_v47 = vpop.permute.xlu0 %1831   ;;  %2625 = vrot.lane.b32.xlu2 %v2624_v45, %s3778_s26 }
 0x14e   :  { %1835 = vst.msk [vmem:[#allocation2 + $0x80] sm:$0x3] %vm1833_vm12, %v1832_v47   ;;  %v1853_v58 = vpop.permute.xlu1 %1852  }
 0x14f   :  { %1837 = vst.msk [vmem:[#allocation2 + $0x36] sm:$0xc] %vm1833_vm12, %v1832_v47   ;;  %v1936_v61 = vpop.permute.xlu2 %1935   ;;  %vm2146_vm12 = vcmask 351504  }
 0x150   :  { %1856 = vst.msk [vmem:[#allocation2 + $0x60] sm:$0x3] %vm1854_vm14, %v1853_v58  }
 0x151   :  { %1858 = vst.msk [vmem:[#allocation2 + $0x16] sm:$0xc] %vm1854_vm14, %v1853_v58   ;;  %vm2251_vm14 = vcmask 310504  }
 0x152   :  { %1939 = vst.msk [vmem:[#allocation2 + $0x28] sm:$0x3] %vm1937_vm15, %v1936_v61  }
 0x153   :  { %2771 = vrot.lane.b32.xlu0 %v2770_v57, %s3779_s8  ;;  %1941 = vst.msk [vmem:[#allocation2 + $0x6e] sm:$0xc] %vm1937_vm15, %v1936_v61   ;;  %vm2209_vm15 = vcmask 326904  }
 0x154   :  { %2792 = vrot.lane.b32.xlu1 %v2791_v1, %s3780_s15 }
 0x155   :  { %v1895_v5 = vpop.permute.xlu0 %1894   ;;  %2687 = vrot.lane.b32.xlu2 %v2686_v4, %s3781_s18 }
 0x156   :  { %1898 = vst.msk [vmem:[#allocation2 + $0x20] sm:$0x3] %vm1896_vm4, %v1895_v5   ;;  %v1916_v12 = vpop.permute.xlu1 %1915  }
 0x157   :  { %1900 = vst.msk [vmem:[#allocation2 + $0x66] sm:$0xc] %vm1896_vm4, %v1895_v5   ;;  %v1999_v13 = vpop.permute.xlu2 %1998   ;;  %vm2230_vm4 = vcmask 318704  }
 0x158   :  { %1918 = vst.msk [vmem:[#allocation2] sm:$0x3] %vm1917_vm5, %v1916_v12  }
 0x159   :  { %1920 = vst.msk [vmem:[#allocation2 + $0x46] sm:$0xc] %vm1917_vm5, %v1916_v12   ;;  %vm2313_vm5 = vcmask 285904  }
 0x15a   :  { %2002 = vst.msk [vmem:[#allocation2 + $0x10] sm:$0x3] %vm2000_vm3, %v1999_v13  }
 0x15b   :  { %2834 = vrot.lane.b32.xlu0 %v2833_v10, %s3782_s21  ;;  %2004 = vst.msk [vmem:[#allocation2 + $0x56] sm:$0xc] %vm2000_vm3, %v1999_v13   ;;  %vm2272_vm3 = vcmask 302304  }
 0x15d   :  { %v1957_v18 = vpop.permute.xlu0 %1956   ;;  %2750 = vrot.lane.b32.xlu2 %v2749_v17, %s3783_s28 }
 0x15e   :  { %1960 = vst.msk [vmem:[#allocation2 + $0x8] sm:$0x3] %vm1958_vm6, %v1957_v18   ;;  %v1978_v21 = vpop.permute.xlu1 %1977  }
 0x15f   :  { %1962 = vst.msk [vmem:[#allocation2 + $0x4e] sm:$0xc] %vm1958_vm6, %v1957_v18   ;;  %v2062_v22 = vpop.permute.xlu2 %2061   ;;  %vm2293_vm6 = vcmask 294104  }
 0x160   :  { %1981 = vst.msk [vmem:[#allocation2 + $0x30] sm:$0x3] %vm1979_vm7, %v1978_v21  }
 0x161   :  { %1983 = vst.msk [vmem:[#allocation2 + $0x76] sm:$0xc] %vm1979_vm7, %v1978_v21   ;;  %vm2376_vm7 = vcmask 261304  }
 0x162   :  { %2065 = vst.msk [vmem:[#allocation2 + $0x40] sm:$0x3] %vm2063_vm0, %v2062_v22  }
 0x163   :  { %2067 = vst.msk [vmem:[#allocation2 + $0x86] sm:$0xc] %vm2063_vm0, %v2062_v22   ;;  %vm2334_vm0 = vcmask 277704  }
 0x165   :  { %v2020_v26 = vpop.permute.xlu0 %2019   ;;  %2813 = vrot.lane.b32.xlu2 %v2812_v25, %s3784_s0 }
 0x166   :  { %2023 = vst.msk [vmem:[#allocation2 + $0x80] sm:$0x3] %vm2021_vm1, %v2020_v26   ;;  %v2041_v27 = vpop.permute.xlu1 %2040  }
 0x167   :  { %2025 = vst.msk [vmem:[#allocation2 + $0x36] sm:$0xc] %vm2021_vm1, %v2020_v26   ;;  %v2124_v28 = vpop.permute.xlu2 %2123   ;;  %vm2355_vm1 = vcmask 269504  }
 0x168   :  { %2044 = vst.msk [vmem:[#allocation2 + $0x60] sm:$0x3] %vm2042_vm2, %v2041_v27  }
 0x169   :  { %2046 = vst.msk [vmem:[#allocation2 + $0x16] sm:$0xc] %vm2042_vm2, %v2041_v27   ;;  %vm2439_vm2 = vcmask 236704  }
 0x16a   :  { %2127 = vst.msk [vmem:[#allocation2 + $0x28] sm:$0x3] %vm2125_vm8, %v2124_v28  }
 0x16b   :  { %2129 = vst.msk [vmem:[#allocation2 + $0x6e] sm:$0xc] %vm2125_vm8, %v2124_v28   ;;  %vm2397_vm8 = vcmask 253104  }
 0x16d   :  { %v2083_v29 = vpop.permute.xlu0 %2082  }
 0x16e   :  { %2086 = vst.msk [vmem:[#allocation2 + $0x20] sm:$0x3] %vm2084_vm9, %v2083_v29   ;;  %v2104_v30 = vpop.permute.xlu1 %2103  }
 0x16f   :  { %2088 = vst.msk [vmem:[#allocation2 + $0x66] sm:$0xc] %vm2084_vm9, %v2083_v29   ;;  %v2187_v31 = vpop.permute.xlu2 %2186   ;;  %vm2418_vm9 = vcmask 244904  }
 0x170   :  { %2106 = vst.msk [vmem:[#allocation2] sm:$0x3] %vm2105_vm10, %v2104_v30  }
 0x171   :  { %2108 = vst.msk [vmem:[#allocation2 + $0x46] sm:$0xc] %vm2105_vm10, %v2104_v30   ;;  %vm2501_vm10 = vcmask 212104  }
 0x172   :  { %2190 = vst.msk [vmem:[#allocation2 + $0x10] sm:$0x3] %vm2188_vm11, %v2187_v31  }
 0x173   :  { %2192 = vst.msk [vmem:[#allocation2 + $0x56] sm:$0xc] %vm2188_vm11, %v2187_v31   ;;  %vm2460_vm11 = vcmask 228504  }
 0x175   :  { %v2145_v32 = vpop.permute.xlu0 %2144  }
 0x176   :  { %2148 = vst.msk [vmem:[#allocation2 + $0x8] sm:$0x3] %vm2146_vm12, %v2145_v32   ;;  %v2166_v33 = vpop.permute.xlu1 %2165  }
 0x177   :  { %2150 = vst.msk [vmem:[#allocation2 + $0x4e] sm:$0xc] %vm2146_vm12, %v2145_v32   ;;  %v2250_v11 = vpop.permute.xlu2 %2249   ;;  %vm2481_vm12 = vcmask 220304  }
 0x178   :  { %2169 = vst.msk [vmem:[#allocation2 + $0x30] sm:$0x3] %vm2167_vm13, %v2166_v33  }
 0x179   :  { %2171 = vst.msk [vmem:[#allocation2 + $0x76] sm:$0xc] %vm2167_vm13, %v2166_v33   ;;  %vm2564_vm13 = vcmask 187504  }
 0x17a   :  { %2253 = vst.msk [vmem:[#allocation2 + $0x40] sm:$0x3] %vm2251_vm14, %v2250_v11  }
 0x17b   :  { %2255 = vst.msk [vmem:[#allocation2 + $0x86] sm:$0xc] %vm2251_vm14, %v2250_v11   ;;  %vm2522_vm14 = vcmask 203904  }
 0x17d   :  { %v2208_v34 = vpop.permute.xlu0 %2207  }
 0x17e   :  { %2211 = vst.msk [vmem:[#allocation2 + $0x80] sm:$0x3] %vm2209_vm15, %v2208_v34   ;;  %v2229_v35 = vpop.permute.xlu1 %2228  }
 0x17f   :  { %2213 = vst.msk [vmem:[#allocation2 + $0x36] sm:$0xc] %vm2209_vm15, %v2208_v34   ;;  %v2312_v36 = vpop.permute.xlu2 %2311   ;;  %vm2543_vm15 = vcmask 195704  }
 0x180   :  { %2232 = vst.msk [vmem:[#allocation2 + $0x60] sm:$0x3] %vm2230_vm4, %v2229_v35  }
 0x181   :  { %2234 = vst.msk [vmem:[#allocation2 + $0x16] sm:$0xc] %vm2230_vm4, %v2229_v35   ;;  %vm2627_vm4 = vcmask 162904  }
 0x182   :  { %2315 = vst.msk [vmem:[#allocation2 + $0x28] sm:$0x3] %vm2313_vm5, %v2312_v36  }
 0x183   :  { %2317 = vst.msk [vmem:[#allocation2 + $0x6e] sm:$0xc] %vm2313_vm5, %v2312_v36   ;;  %vm2585_vm5 = vcmask 179304  }
 0x185   :  { %v2271_v37 = vpop.permute.xlu0 %2270  }
 0x186   :  { %2274 = vst.msk [vmem:[#allocation2 + $0x20] sm:$0x3] %vm2272_vm3, %v2271_v37   ;;  %v2292_v38 = vpop.permute.xlu1 %2291  }
 0x187   :  { %2276 = vst.msk [vmem:[#allocation2 + $0x66] sm:$0xc] %vm2272_vm3, %v2271_v37   ;;  %v2375_v39 = vpop.permute.xlu2 %2374   ;;  %vm2606_vm3 = vcmask 171104  }
 0x188   :  { %2294 = vst.msk [vmem:[#allocation2] sm:$0x3] %vm2293_vm6, %v2292_v38  }
 0x189   :  { %2296 = vst.msk [vmem:[#allocation2 + $0x46] sm:$0xc] %vm2293_vm6, %v2292_v38   ;;  %vm2689_vm6 = vcmask 138304  }
 0x18a   :  { %2378 = vst.msk [vmem:[#allocation2 + $0x10] sm:$0x3] %vm2376_vm7, %v2375_v39  }
 0x18b   :  { %2380 = vst.msk [vmem:[#allocation2 + $0x56] sm:$0xc] %vm2376_vm7, %v2375_v39   ;;  %vm2648_vm7 = vcmask 154704  }
 0x18d   :  { %v2333_v40 = vpop.permute.xlu0 %2332  }
 0x18e   :  { %2336 = vst.msk [vmem:[#allocation2 + $0x8] sm:$0x3] %vm2334_vm0, %v2333_v40   ;;  %v2354_v41 = vpop.permute.xlu1 %2353  }
 0x18f   :  { %2338 = vst.msk [vmem:[#allocation2 + $0x4e] sm:$0xc] %vm2334_vm0, %v2333_v40   ;;  %v2438_v42 = vpop.permute.xlu2 %2437   ;;  %vm2669_vm0 = vcmask 146504  }
 0x190   :  { %2357 = vst.msk [vmem:[#allocation2 + $0x30] sm:$0x3] %vm2355_vm1, %v2354_v41  }
 0x191   :  { %2359 = vst.msk [vmem:[#allocation2 + $0x76] sm:$0xc] %vm2355_vm1, %v2354_v41   ;;  %vm2752_vm1 = vcmask 113704  }
 0x192   :  { %2441 = vst.msk [vmem:[#allocation2 + $0x40] sm:$0x3] %vm2439_vm2, %v2438_v42  }
 0x193   :  { %2443 = vst.msk [vmem:[#allocation2 + $0x86] sm:$0xc] %vm2439_vm2, %v2438_v42   ;;  %vm2710_vm2 = vcmask 130104  }
 0x195   :  { %v2396_v43 = vpop.permute.xlu0 %2395  }
 0x196   :  { %2399 = vst.msk [vmem:[#allocation2 + $0x80] sm:$0x3] %vm2397_vm8, %v2396_v43   ;;  %v2417_v44 = vpop.permute.xlu1 %2416  }
 0x197   :  { %2401 = vst.msk [vmem:[#allocation2 + $0x36] sm:$0xc] %vm2397_vm8, %v2396_v43   ;;  %v2500_v45 = vpop.permute.xlu2 %2499   ;;  %vm2731_vm8 = vcmask 121904  }
 0x198   :  { %2420 = vst.msk [vmem:[#allocation2 + $0x60] sm:$0x3] %vm2418_vm9, %v2417_v44  }
 0x199   :  { %2422 = vst.msk [vmem:[#allocation2 + $0x16] sm:$0xc] %vm2418_vm9, %v2417_v44   ;;  %vm2773_vm9 = vcmask 105504  }
 0x19a   :  { %2503 = vst.msk [vmem:[#allocation2 + $0x28] sm:$0x3] %vm2501_vm10, %v2500_v45  }
 0x19b   :  { %2505 = vst.msk [vmem:[#allocation2 + $0x6e] sm:$0xc] %vm2501_vm10, %v2500_v45   ;;  %vm2815_vm10 = vcmask 89104  }
 0x19d   :  { %v2459_v47 = vpop.permute.xlu0 %2458  }
 0x19e   :  { %2462 = vst.msk [vmem:[#allocation2 + $0x20] sm:$0x3] %vm2460_vm11, %v2459_v47   ;;  %v2480_v48 = vpop.permute.xlu1 %2479  }
 0x19f   :  { %2464 = vst.msk [vmem:[#allocation2 + $0x66] sm:$0xc] %vm2460_vm11, %v2459_v47   ;;  %v2563_v49 = vpop.permute.xlu2 %2562   ;;  %vm2794_vm11 = vcmask 97304  }
 0x1a0   :  { %2482 = vst.msk [vmem:[#allocation2] sm:$0x3] %vm2481_vm12, %v2480_v48  }
 0x1a1   :  { %2484 = vst.msk [vmem:[#allocation2 + $0x46] sm:$0xc] %vm2481_vm12, %v2480_v48   ;;  %vm2836_vm12 = vcmask 80904  }
 0x1a2   :  { %2566 = vst.msk [vmem:[#allocation2 + $0x10] sm:$0x3] %vm2564_vm13, %v2563_v49  }
 0x1a3   :  { %2568 = vst.msk [vmem:[#allocation2 + $0x56] sm:$0xc] %vm2564_vm13, %v2563_v49  }
 0x1a5   :  { %v2521_v50 = vpop.permute.xlu0 %2520  }
 0x1a6   :  { %2524 = vst.msk [vmem:[#allocation2 + $0x8] sm:$0x3] %vm2522_vm14, %v2521_v50   ;;  %v2542_v51 = vpop.permute.xlu1 %2541  }
 0x1a7   :  { %2526 = vst.msk [vmem:[#allocation2 + $0x4e] sm:$0xc] %vm2522_vm14, %v2521_v50   ;;  %v2626_v52 = vpop.permute.xlu2 %2625  }
 0x1a8   :  { %2545 = vst.msk [vmem:[#allocation2 + $0x30] sm:$0x3] %vm2543_vm15, %v2542_v51  }
 0x1a9   :  { %2547 = vst.msk [vmem:[#allocation2 + $0x76] sm:$0xc] %vm2543_vm15, %v2542_v51  }
 0x1aa   :  { %2629 = vst.msk [vmem:[#allocation2 + $0x40] sm:$0x3] %vm2627_vm4, %v2626_v52  }
 0x1ab   :  { %2631 = vst.msk [vmem:[#allocation2 + $0x86] sm:$0xc] %vm2627_vm4, %v2626_v52  }
 0x1ad   :  { %v2584_v53 = vpop.permute.xlu0 %2583  }
 0x1ae   :  { %2587 = vst.msk [vmem:[#allocation2 + $0x80] sm:$0x3] %vm2585_vm5, %v2584_v53   ;;  %v2605_v54 = vpop.permute.xlu1 %2604  }
 0x1af   :  { %2589 = vst.msk [vmem:[#allocation2 + $0x36] sm:$0xc] %vm2585_vm5, %v2584_v53   ;;  %v2688_v55 = vpop.permute.xlu2 %2687  }
 0x1b0   :  { %2608 = vst.msk [vmem:[#allocation2 + $0x60] sm:$0x3] %vm2606_vm3, %v2605_v54  }
 0x1b1   :  { %2610 = vst.msk [vmem:[#allocation2 + $0x16] sm:$0xc] %vm2606_vm3, %v2605_v54  }
 0x1b2   :  { %2691 = vst.msk [vmem:[#allocation2 + $0x28] sm:$0x3] %vm2689_vm6, %v2688_v55  }
 0x1b3   :  { %2693 = vst.msk [vmem:[#allocation2 + $0x6e] sm:$0xc] %vm2689_vm6, %v2688_v55  }
 0x1b5   :  { %v2647_v57 = vpop.permute.xlu0 %2646  }
 0x1b6   :  { %2650 = vst.msk [vmem:[#allocation2 + $0x20] sm:$0x3] %vm2648_vm7, %v2647_v57   ;;  %v2668_v58 = vpop.permute.xlu1 %2667  }
 0x1b7   :  { %2652 = vst.msk [vmem:[#allocation2 + $0x66] sm:$0xc] %vm2648_vm7, %v2647_v57   ;;  %v2751_v59 = vpop.permute.xlu2 %2750  }
 0x1b8   :  { %2670 = vst.msk [vmem:[#allocation2] sm:$0x3] %vm2669_vm0, %v2668_v58  }
 0x1b9   :  { %v2872_v60 = vld [vmem:[#allocation2 + $0x28] sm:$0x3]  ;;  %2672 = vst.msk [vmem:[#allocation2 + $0x46] sm:$0xc] %vm2669_vm0, %v2668_v58  }
 0x1ba   :  { %2876 = vst [vmem:[#allocation0 + $0xa] sm:$0x3] %v2872_v60  ;;  %v2926_v61 = vld [vmem:[#allocation2 + $0x70] sm:$0x3] }
 0x1bb   :  { %2930 = vst [vmem:[#allocation0 + $0x1c] sm:$0x3] %v2926_v61 }
 0x1bc   :  { %2754 = vst.msk [vmem:[#allocation2 + $0x10] sm:$0x3] %vm2752_vm1, %v2751_v59  }
 0x1bd   :  { %v2709_v62 = vpop.permute.xlu0 %2708   ;;  %2756 = vst.msk [vmem:[#allocation2 + $0x56] sm:$0xc] %vm2752_vm1, %v2751_v59  }
 0x1be   :  { %2712 = vst.msk [vmem:[#allocation2 + $0x8] sm:$0x3] %vm2710_vm2, %v2709_v62   ;;  %v2730_v63 = vpop.permute.xlu1 %2729  }
 0x1bf   :  { %2714 = vst.msk [vmem:[#allocation2 + $0x4e] sm:$0xc] %vm2710_vm2, %v2709_v62   ;;  %v2843_v46 = vld [vmem:[#allocation2] sm:$0x3]  ;;  %v2814_v1 = vpop.permute.xlu2 %2813  }
 0x1c0   :  { %2846 = vst [vmem:[#allocation0] sm:$0x3] %v2843_v46  ;;  %v2896_v0 = vld [vmem:[#allocation2 + $0x48] sm:$0x3] }
 0x1c1   :  { %2900 = vst [vmem:[#allocation0 + $0x12] sm:$0x3] %v2896_v0 }
 0x1c2   :  { %2733 = vst.msk [vmem:[#allocation2 + $0x30] sm:$0x3] %vm2731_vm8, %v2730_v63  }
 0x1c3   :  { %v2854_v2 = vld [vmem:[#allocation2 + $0x10] sm:$0x3]  ;;  %2735 = vst.msk [vmem:[#allocation2 + $0x76] sm:$0xc] %vm2731_vm8, %v2730_v63  }
 0x1c4   :  { %2858 = vst [vmem:[#allocation0 + $0x4] sm:$0x3] %v2854_v2  ;;  %v2908_v6 = vld [vmem:[#allocation2 + $0x58] sm:$0x3] }
 0x1c5   :  { %v2848_v3 = vld [vmem:[#allocation2 + $0x8] sm:$0x3]  ;;  %v2772_v4 = vpop.permute.xlu0 %2771   ;;  %2912 = vst [vmem:[#allocation0 + $0x16] sm:$0x3] %v2908_v6 }
 0x1c6   :  { %2852 = vst [vmem:[#allocation0 + $0x2] sm:$0x3] %v2848_v3  ;;  %v2902_v5 = vld [vmem:[#allocation2 + $0x50] sm:$0x3]  ;;  %v2793_v7 = vpop.permute.xlu1 %2792  }
 0x1c7   :  { %2906 = vst [vmem:[#allocation0 + $0x14] sm:$0x3] %v2902_v5 }
 0x1c8   :  { %2775 = vst.msk [vmem:[#allocation2 + $0x80] sm:$0x3] %vm2773_vm9, %v2772_v4  }
 0x1c9   :  { %v2878_v8 = vld [vmem:[#allocation2 + $0x30] sm:$0x3]  ;;  %2777 = vst.msk [vmem:[#allocation2 + $0x36] sm:$0xc] %vm2773_vm9, %v2772_v4  }
 0x1ca   :  { %2882 = vst [vmem:[#allocation0 + $0xc] sm:$0x3] %v2878_v8  ;;  %v2932_v9 = vld [vmem:[#allocation2 + $0x78] sm:$0x3] }
 0x1cb   :  { %2936 = vst [vmem:[#allocation0 + $0x1e] sm:$0x3] %v2932_v9 }
 0x1cc   :  { %2817 = vst.msk [vmem:[#allocation2 + $0x40] sm:$0x3] %vm2815_vm10, %v2814_v1  }
 0x1cd   :  { %v2835_v10 = vpop.permute.xlu0 %2834   ;;  %2819 = vst.msk [vmem:[#allocation2 + $0x86] sm:$0xc] %vm2815_vm10, %v2814_v1  }
 0x1ce   :  { %2796 = vst.msk [vmem:[#allocation2 + $0x60] sm:$0x3] %vm2794_vm11, %v2793_v7  }
 0x1cf   :  { %v2938_v12 = vld [vmem:[#allocation2 + $0x80] sm:$0x3]  ;;  %2798 = vst.msk [vmem:[#allocation2 + $0x16] sm:$0xc] %vm2794_vm11, %v2793_v7  }
 0x1d0   :  { %v2884_v13 = vld [vmem:[#allocation2 + $0x38] sm:$0x3]  ;;  %2942 = vst [vmem:[#allocation0 + $0x20] sm:$0x3] %v2938_v12 }
 0x1d1   :  { %2888 = vst [vmem:[#allocation0 + $0xe] sm:$0x3] %v2884_v13 }
 0x1d2   :  { %2838 = vst.msk [vmem:[#allocation2 + $0x20] sm:$0x3] %vm2836_vm12, %v2835_v10  }
 0x1d3   :  { %v2890_v14 = vld [vmem:[#allocation2 + $0x40] sm:$0x3]  ;;  %2840 = vst.msk [vmem:[#allocation2 + $0x66] sm:$0xc] %vm2836_vm12, %v2835_v10  }
 0x1d4   :  { %2894 = vst [vmem:[#allocation0 + $0x10] sm:$0x3] %v2890_v14  ;;  %v2944_v15 = vld [vmem:[#allocation2 + $0x88] sm:$0x3] }
 0x1d5   :  { %2948 = vst [vmem:[#allocation0 + $0x22] sm:$0x3] %v2944_v15  ;;  %v2914_v56 = vld [vmem:[#allocation2 + $0x60] sm:$0x3] }
 0x1d6   :  { %v2860_v16 = vld [vmem:[#allocation2 + $0x18] sm:$0x3]  ;;  %2918 = vst [vmem:[#allocation0 + $0x18] sm:$0x3] %v2914_v56 }
 0x1d7   :  { %2864 = vst [vmem:[#allocation0 + $0x6] sm:$0x3] %v2860_v16 }
 0x1d9   :  { %v2866_v17 = vld [vmem:[#allocation2 + $0x20] sm:$0x3] }
 0x1da   :  { %2870 = vst [vmem:[#allocation0 + $0x8] sm:$0x3] %v2866_v17  ;;  %v2920_v18 = vld [vmem:[#allocation2 + $0x68] sm:$0x3] }
 0x1db   :  { %2924 = vst [vmem:[#allocation0 + $0x1a] sm:$0x3] %v2920_v18 }
 0x1dc   :  { %2957 = dma.vmem_to_hbm [thread:$0]  %s2953_s3, 576, %s2955_s1, [#allocation1]  }
 0x1dd   :  { %3656 = dma.done.wait [#allocation1], 576  }
 0x1de   :  { %3657 = vsyncadd [#allocation1], 4294966720 }
 0x1df   :  { %2960 = vsyncpa [#allocation1], 1 }

// kernel: a_call__.1
= control target key start
LH: loop header
LB: loop body
LE: loop exit
PB: predicated region body
PF: predicated region fallthrough
CT: control target
= control target key end

     0   :  { %s909_s12 = smov 0   ;;  %s911_s13 = smov 0   ;;  %s1060_s0 = inlined_call_operand.vmem [shape: bf16[512,36], index: 0, kind: input, shape index: {}]   ;;  %s1061_s1 = inlined_call_operand.vmem [shape: bf16[36,128], index: 1, kind: input, shape index: {}]   ;;  %s1062_s2 = inlined_call_operand.vmem [shape: f32[1,128], index: 2, kind: input, shape index: {}]   ;;  %s1063_s3 = inlined_call_operand.vmem [shape: f32[512,128], index: 3, kind: output, shape index: {}]  }
   0x1   :  { %s913_s14 = smov 0  }
   0x2 LB: > { %s25_s15 = sadd.s32 1, %s883_s13  ;;  %p718_p0 = scmp.ge.s32.totalorder %s887_s14, 1  ;;  %s887_s14 = sphi %s913_s14, %s13_s14   ;;  %s883_s13 = sphi %s911_s13, %s1065_s13   ;;  %s879_s12 = sphi %s909_s12, %s1064_s12  }
   0x3   : > { %p27_p1 = scmp.ge.s32.totalorder %s25_s15, 2  ;;  %p166_p2 = scmp.lt.s32.totalorder %s887_s14, 3 }
   0x5   : > { %s1067_s15 = smov (%p27_p1, %s25_s15), 0  ;;  %p167_p3 = pnand %p718_p0, %p166_p2 }
   0x6   : > { %s719_s18 = sshll.u32 (!%p167_p3), %s879_s12, 5 }
   0x7   : > { %170 = sbr.rel (%p167_p3) target bundleno = 222 (0xde), region = 32  ;;  %p199_p4 = scmp.lt.s32.totalorder (!%p167_p3), %s719_s18, 63 }
   0xc   : > { %v328_v0 = vld [vmem:[%s1061_s1 + $0x10] sm:$0x3]  ;;  %vm473_vm0 = vcmask 1041408   ;;  %s1069_s18 = smov (!%p199_p4, %s719_s18), 63  ;;  %v830_v4 = vld [vmem:[%s1061_s1 + $0x8] sm:$0xff]  ;;  %v829_v5 = vld [vmem:[%s1061_s1] sm:$0xff] }
   0xd   : > { %v418_v1 = vunpack.c.l.b16 %v328_v0  ;;  %s720_s21 = sshll.u32 %s1069_s18, 2  ;;  %vm424_vm1 = vcmask 293888   ;;  %s722_s27 = sshll.u32 %s1069_s18, 3  ;;  %v980_v22 = vld [vmem:[%s1062_s2] ss:$0 sm:$0xff] }
   0xe   : > { %s942_s26 = scalar_lea.vmem %s1060_s0, %s720_s21  ;;  %s985_s5 = scalar_lea.vmem %s1063_s3, %s722_s27 }
   0xf   : > { %v421_v2 = vpack.c.b16 %v418_v1, %v418_v1  ;;  %v813_v6 = vld [vmem:[%s942_s26] sm:$0xff]  ;;  %v814_v10 = vld [vmem:[%s942_s26 + $0x8] sm:$0xff]  ;;  %v815_v14 = vld [vmem:[%s942_s26 + $0x10] sm:$0xff] }
  0x10   : > { %v817_v7 = vld [vmem:[%s942_s26 + $0x20] sm:$0xff]  ;;  %v818_v11 = vld [vmem:[%s942_s26 + $0x28] sm:$0xff]  ;;  %v819_v15 = vld [vmem:[%s942_s26 + $0x30] sm:$0xff] }
  0x11   : > { %v475_v3 = vsel %vm473_vm0, %v421_v2, 0  ;;  %v821_v8 = vld [vmem:[%s942_s26 + $0x40] sm:$0xff]  ;;  %v822_v12 = vld [vmem:[%s942_s26 + $0x48] sm:$0xff]  ;;  %v823_v16 = vld [vmem:[%s942_s26 + $0x50] sm:$0xff] }
  0x12   : > { %482 = vmatpush.bf16.msra.mxu0 %v475_v3  ;;  %831 = vmatpush.bf16.msra.mxu1 %v475_v3  ;;  %v825_v9 = vld [vmem:[%s942_s26 + $0x60] sm:$0xff]  ;;  %v826_v13 = vld [vmem:[%s942_s26 + $0x68] sm:$0xff]  ;;  %v827_v17 = vld [vmem:[%s942_s26 + $0x70] sm:$0xff] }
  0x13   : > { %832 = vmatpush.bf16.msra.mxu2 %v475_v3  ;;  %833 = vmatpush.bf16.msra.mxu3 %v475_v3  ;;  %v816_v18 = vld [vmem:[%s942_s26 + $0x18] sm:$0xff] }
  0x14   : > { %v820_v19 = vld [vmem:[%s942_s26 + $0x38] sm:$0xff] }
  0x15   : > { %v824_v20 = vld [vmem:[%s942_s26 + $0x58] sm:$0xff] }
  0x16   : > { %483 = vmatpush.bf16.msra.mxu0 %v830_v4  ;;  %834 = vmatpush.bf16.msra.mxu1 %v830_v4  ;;  %v828_v21 = vld [vmem:[%s942_s26 + $0x78] sm:$0xff] }
  0x17   : > { %835 = vmatpush.bf16.msra.mxu2 %v830_v4  ;;  %836 = vmatpush.bf16.msra.mxu3 %v830_v4 }
  0x1a   : > { %484 = vmatpush.bf16.msra.mxu0 %v829_v5  ;;  %837 = vmatpush.bf16.msra.mxu1 %v829_v5 }
  0x1b   : > { %838 = vmatpush.bf16.msra.mxu2 %v829_v5  ;;  %839 = vmatpush.bf16.msra.mxu3 %v829_v5 }
  0x1d   : > { %795 = vmatmul.msk.bf16.vlgmr.msra.gmra.mxu0 %vm424_vm1, %v813_v6  ;;  %799 = vmatmul.msk.bf16.vlgmr.msra.gmra.mxu1 %vm424_vm1, %v817_v7 }
  0x1e   : > { %803 = vmatmul.msk.bf16.vlgmr.msra.gmra.mxu2 %vm424_vm1, %v821_v8  ;;  %807 = vmatmul.msk.bf16.vlgmr.msra.gmra.mxu3 %vm424_vm1, %v825_v9 }
  0x2d   : > { %796 = vmatmul.msk.bf16.gmra.mxu0 %vm424_vm1, %v814_v10  ;;  %800 = vmatmul.msk.bf16.gmra.mxu1 %vm424_vm1, %v818_v11 }
  0x2e   : > { %804 = vmatmul.msk.bf16.gmra.mxu2 %vm424_vm1, %v822_v12  ;;  %808 = vmatmul.msk.bf16.gmra.mxu3 %vm424_vm1, %v826_v13 }
  0x3d   : > { %797 = vmatmul.msk.bf16.gmra.mxu0 %vm424_vm1, %v815_v14  ;;  %801 = vmatmul.msk.bf16.gmra.mxu1 %vm424_vm1, %v819_v15 }
  0x3e   : > { %805 = vmatmul.msk.bf16.gmra.mxu2 %vm424_vm1, %v823_v16  ;;  %809 = vmatmul.msk.bf16.gmra.mxu3 %vm424_vm1, %v827_v17 }
  0x4d   : > { %798 = vmatmul.msk.bf16.gmra.mxu0 %vm424_vm1, %v816_v18  ;;  %802 = vmatmul.msk.bf16.gmra.mxu1 %vm424_vm1, %v820_v19 }
  0x4e   : > { %806 = vmatmul.msk.bf16.gmra.mxu2 %vm424_vm1, %v824_v20  ;;  %810 = vmatmul.msk.bf16.gmra.mxu3 %vm424_vm1, %v828_v21 }
  0x9a   : > { %v486_v23 = vpop.f32.mrf.mxu0  ;;  %v506_v24 = vpop.f32.mrf.mxu1 }
  0x9b   : > { %v566_v25 = vadd.f32 %v980_v22, %v486_v23  ;;  %v574_v26 = vadd.f32 %v980_v22, %v506_v24 }
  0x9d   : > { %598 = vst [vmem:[%s985_s5] sm:$0xff] %v566_v25 }
  0x9e   : > { %606 = vst [vmem:[%s985_s5 + $0x40] sm:$0xff] %v574_v26 }
  0xa1   : > { %v526_v27 = vpop.f32.mrf.mxu2  ;;  %v546_v28 = vpop.f32.mrf.mxu3 }
  0xa2   : > { %v582_v29 = vadd.f32 %v980_v22, %v526_v27  ;;  %v590_v30 = vadd.f32 %v980_v22, %v546_v28  ;;  %v488_v31 = vpop.f32.mrf.mxu0  ;;  %v508_v32 = vpop.f32.mrf.mxu1 }
  0xa3   : > { %v567_v33 = vadd.f32 %v980_v22, %v488_v31  ;;  %v575_v34 = vadd.f32 %v980_v22, %v508_v32 }
  0xa4   : > { %614 = vst [vmem:[%s985_s5 + $0x80] sm:$0xff] %v582_v29 }
  0xa5   : > { %622 = vst [vmem:[%s985_s5 + $0xc0] sm:$0xff] %v590_v30 }
  0xa6   : > { %599 = vst [vmem:[%s985_s5 + $0x8] sm:$0xff] %v567_v33 }
  0xa7   : > { %607 = vst [vmem:[%s985_s5 + $0x48] sm:$0xff] %v575_v34 }
  0xa9   : > { %v528_v35 = vpop.f32.mrf.mxu2  ;;  %v548_v36 = vpop.f32.mrf.mxu3 }
  0xaa   : > { %v583_v37 = vadd.f32 %v980_v22, %v528_v35  ;;  %v591_v38 = vadd.f32 %v980_v22, %v548_v36  ;;  %v491_v39 = vpop.f32.mrf.mxu0  ;;  %v511_v40 = vpop.f32.mrf.mxu1 }
  0xab   : > { %v568_v41 = vadd.f32 %v980_v22, %v491_v39  ;;  %v576_v42 = vadd.f32 %v980_v22, %v511_v40 }
  0xac   : > { %615 = vst [vmem:[%s985_s5 + $0x88] sm:$0xff] %v583_v37 }
  0xad   : > { %623 = vst [vmem:[%s985_s5 + $0xc8] sm:$0xff] %v591_v38 }
  0xae   : > { %600 = vst [vmem:[%s985_s5 + $0x10] sm:$0xff] %v568_v41 }
  0xaf   : > { %608 = vst [vmem:[%s985_s5 + $0x50] sm:$0xff] %v576_v42 }
  0xb1   : > { %v531_v43 = vpop.f32.mrf.mxu2  ;;  %v551_v44 = vpop.f32.mrf.mxu3 }
  0xb2   : > { %v584_v45 = vadd.f32 %v980_v22, %v531_v43  ;;  %v592_v46 = vadd.f32 %v980_v22, %v551_v44  ;;  %v493_v47 = vpop.f32.mrf.mxu0  ;;  %v513_v48 = vpop.f32.mrf.mxu1 }
  0xb3   : > { %v569_v49 = vadd.f32 %v980_v22, %v493_v47  ;;  %v577_v50 = vadd.f32 %v980_v22, %v513_v48 }
  0xb4   : > { %616 = vst [vmem:[%s985_s5 + $0x90] sm:$0xff] %v584_v45 }
  0xb5   : > { %624 = vst [vmem:[%s985_s5 + $0xd0] sm:$0xff] %v592_v46 }
  0xb6   : > { %601 = vst [vmem:[%s985_s5 + $0x18] sm:$0xff] %v569_v49 }
  0xb7   : > { %609 = vst [vmem:[%s985_s5 + $0x58] sm:$0xff] %v577_v50 }
  0xb9   : > { %v533_v51 = vpop.f32.mrf.mxu2  ;;  %v553_v52 = vpop.f32.mrf.mxu3 }
  0xba   : > { %v585_v53 = vadd.f32 %v980_v22, %v533_v51  ;;  %v593_v54 = vadd.f32 %v980_v22, %v553_v52  ;;  %v496_v55 = vpop.f32.mrf.mxu0  ;;  %v516_v56 = vpop.f32.mrf.mxu1 }
  0xbb   : > { %v570_v57 = vadd.f32 %v980_v22, %v496_v55  ;;  %v578_v58 = vadd.f32 %v980_v22, %v516_v56 }
  0xbc   : > { %617 = vst [vmem:[%s985_s5 + $0x98] sm:$0xff] %v585_v53 }
  0xbd   : > { %625 = vst [vmem:[%s985_s5 + $0xd8] sm:$0xff] %v593_v54 }
  0xbe   : > { %602 = vst [vmem:[%s985_s5 + $0x20] sm:$0xff] %v570_v57 }
  0xbf   : > { %610 = vst [vmem:[%s985_s5 + $0x60] sm:$0xff] %v578_v58 }
  0xc1   : > { %v536_v59 = vpop.f32.mrf.mxu2  ;;  %v556_v60 = vpop.f32.mrf.mxu3 }
  0xc2   : > { %v586_v61 = vadd.f32 %v980_v22, %v536_v59  ;;  %v594_v62 = vadd.f32 %v980_v22, %v556_v60  ;;  %v498_v63 = vpop.f32.mrf.mxu0  ;;  %v518_v0 = vpop.f32.mrf.mxu1 }
  0xc3   : > { %v571_v1 = vadd.f32 %v980_v22, %v498_v63  ;;  %v579_v2 = vadd.f32 %v980_v22, %v518_v0 }
  0xc4   : > { %618 = vst [vmem:[%s985_s5 + $0xa0] sm:$0xff] %v586_v61 }
  0xc5   : > { %626 = vst [vmem:[%s985_s5 + $0xe0] sm:$0xff] %v594_v62 }
  0xc6   : > { %603 = vst [vmem:[%s985_s5 + $0x28] sm:$0xff] %v571_v1 }
  0xc7   : > { %611 = vst [vmem:[%s985_s5 + $0x68] sm:$0xff] %v579_v2 }
  0xc9   : > { %v538_v3 = vpop.f32.mrf.mxu2  ;;  %v558_v4 = vpop.f32.mrf.mxu3 }
  0xca   : > { %v587_v5 = vadd.f32 %v980_v22, %v538_v3  ;;  %v595_v6 = vadd.f32 %v980_v22, %v558_v4  ;;  %v501_v7 = vpop.f32.mrf.mxu0  ;;  %v521_v8 = vpop.f32.mrf.mxu1 }
  0xcb   : > { %v572_v9 = vadd.f32 %v980_v22, %v501_v7  ;;  %v580_v10 = vadd.f32 %v980_v22, %v521_v8 }
  0xcc   : > { %619 = vst [vmem:[%s985_s5 + $0xa8] sm:$0xff] %v587_v5 }
  0xcd   : > { %627 = vst [vmem:[%s985_s5 + $0xe8] sm:$0xff] %v595_v6 }
  0xce   : > { %604 = vst [vmem:[%s985_s5 + $0x30] sm:$0xff] %v572_v9 }
  0xcf   : > { %612 = vst [vmem:[%s985_s5 + $0x70] sm:$0xff] %v580_v10 }
  0xd1   : > { %v541_v11 = vpop.f32.mrf.mxu2  ;;  %v561_v12 = vpop.f32.mrf.mxu3 }
  0xd2   : > { %v588_v13 = vadd.f32 %v980_v22, %v541_v11  ;;  %v596_v14 = vadd.f32 %v980_v22, %v561_v12  ;;  %v503_v15 = vpop.f32.mrf.mxu0  ;;  %v523_v16 = vpop.f32.mrf.mxu1 }
  0xd3   : > { %v573_v17 = vadd.f32 %v980_v22, %v503_v15  ;;  %v581_v18 = vadd.f32 %v980_v22, %v523_v16 }
  0xd4   : > { %620 = vst [vmem:[%s985_s5 + $0xb0] sm:$0xff] %v588_v13 }
  0xd5   : > { %628 = vst [vmem:[%s985_s5 + $0xf0] sm:$0xff] %v596_v14 }
  0xd6   : > { %605 = vst [vmem:[%s985_s5 + $0x38] sm:$0xff] %v573_v17 }
  0xd7   : > { %613 = vst [vmem:[%s985_s5 + $0x78] sm:$0xff] %v581_v18 }
  0xd9   : > { %v543_v19 = vpop.f32.mrf.mxu2  ;;  %v563_v20 = vpop.f32.mrf.mxu3 }
  0xda   : > { %v589_v21 = vadd.f32 %v980_v22, %v543_v19  ;;  %v597_v23 = vadd.f32 %v980_v22, %v563_v20 }
  0xdc   : > { %621 = vst [vmem:[%s985_s5 + $0xb8] sm:$0xff] %v589_v21 }
  0xdd   : > { %629 = vst [vmem:[%s985_s5 + $0xf8] sm:$0xff] %v597_v23 }
  0xde PF: > { %s13_s14 = sadd.s32 1, %s887_s14   ;;  %s1064_s12 = smov %s883_s13 }
  0xdf   : > { %p10_p5 = scmp.ge.s32.totalorder %s13_s14, 4   ;;  %s1065_s13 = smov %s1067_s15 }
  0xe1   :  { %12 = sbr.rel (!%p10_p5) target bundleno = 2 (0x2), region = 69 }

</bundles_post_ra>
